<compile_context>
chip_gen: v5e
topology: v5e:2x2
jax: 0.10.0
libtpu: 0.0.40
codegen_flags: <defaults>
</compile_context>

<pallas_src>
import math
from functools import partial

import jax
import jax.numpy as jnp
from jax import lax
from jax.experimental import pallas as pl
from jax.experimental.pallas import tpu as pltpu

VMEM = pl.BlockSpec(memory_space=pltpu.MemorySpace.VMEM)

_SQRT_2_OVER_PI = 0.7978845608028654


def _gelu(x):
    # TODO(synk): PyTorch nn.GELU() is the exact erf GELU; the tanh approximation
    # is used (max abs diff ~1e-3) because tanh maps to the EUP slot and lowers
    # on all Mosaic versions without a runtime probe.
    return 0.5 * x * (1.0 + jnp.tanh(_SQRT_2_OVER_PI * (x + 0.044715 * x * x * x)))


# ----------------------------------------------------------------------------
# Fused forward kernel
# ----------------------------------------------------------------------------
def _make_fused_kernel(T, Bp, Hp, num_layers):
    """encode -> GRU(num_layers) -> decode -> latent pack, all in VMEM.

    Rows are time-major (T*Bp, feat) with Bp a multiple of 8 so every
    per-timestep slice is (8,128)-tile aligned.  Hp = n_env padded to 128.
    """
    GW = 3 * Hp
    full_unroll = T <= 32

    def kernel(x_ref, wenc_ref, benc_ref, wih_ref, whh_ref, gbias_ref, bhhn_ref,
               wdec_ref, bdec_ref, summat_ref, sumbias_ref, latpack_ref,
               envpack_ref, out_ref, act_buf, gi_buf):
        f32 = jnp.float32
        bf16 = jnp.bfloat16

        # ---- encode: Linear (input normalization folded in) + GELU ----------
        # act_buf pad lanes (>= n_env) are exactly 0 and stay 0 through the GRU
        # (zero-padded weights/biases give r=z=0.5, n=0 there -> h_pad stays 0).
        act_buf[...] = _gelu(
            jnp.dot(x_ref[...], wenc_ref[...], preferred_element_type=f32)
            + benc_ref[...])

        # ---- GRU stack (PyTorch gate order r|z|n, one 128-lane tile / gate) --
        for l in range(num_layers):
            whh_l = whh_ref[l]                                  # (Hp, 3Hp) bf16
            # Hoisted input-side gate GEMM over all timesteps at once; the
            # recurrent r/z biases are pre-folded into gbias so the step body
            # only adds the n-gate recurrent bias (it is scaled by r).
            gi_buf[...] = (
                jnp.dot(act_buf[...].astype(bf16), wih_ref[l],
                        preferred_element_type=f32)
                + gbias_ref[l])
            # Hoist the (1,Hp)->(Bp,Hp) broadcast out of the loop.
            bhn = jnp.broadcast_to(bhhn_ref[l], (Bp, Hp))

            def step(t, h, _whh=whh_l, _bhn=bhn):
                row = t * Bp
                if not isinstance(row, int):
                    row = pl.multiple_of(row, 8)
                gi = gi_buf[pl.ds(row, Bp), :]                  # (Bp, 3Hp) f32
                gh = jnp.dot(h.astype(bf16), _whh,
                             preferred_element_type=f32)        # (Bp, 3Hp) f32
                r = jax.nn.sigmoid(gi[:, 0:Hp] + gh[:, 0:Hp])
                z = jax.nn.sigmoid(gi[:, Hp:2 * Hp] + gh[:, Hp:2 * Hp])
                n = jnp.tanh(gi[:, 2 * Hp:GW] + r * (gh[:, 2 * Hp:GW] + _bhn))
                h_new = n + z * (h - n)                         # == (1-z)*n + z*h
                # layer output (full-tile store, off the recurrence chain)
                act_buf[pl.ds(row, Bp), :] = h_new
                return h_new

            h0 = jnp.zeros((Bp, Hp), f32)
            if full_unroll:
                h = h0
                for t in range(T):              # static full unroll (short T)
                    h = step(t, h)
            else:
                lax.fori_loop(0, T, step, h0, unroll=8)

        # ---- decode (GELU + Linear) and FixedLatentNoiseDecoder --------------
        env = (jnp.dot(_gelu(act_buf[...]).astype(bf16), wdec_ref[...],
                       preferred_element_type=f32)
               + bdec_ref[...])                                 # (T*Bp, n_env)
        # per-split sums via a block-diagonal ones matmul; sum_bias puts 1.0 in
        # the (never-divided) noise-envelope lanes so the reciprocal stays finite.
        # Same unguarded env / env.sum(-1) as the torch code for the real splits.
        sums = (jnp.dot(env, summat_ref[...], preferred_element_type=f32)
                + sumbias_ref[...])
        env_norm = env * pl.reciprocal(sums, approx=True)
        # lane-dense packed output: [latents (S*W*L) | envelopes (n_env) | pad]
        out_ref[...] = (
            jnp.dot(env_norm, latpack_ref[...], preferred_element_type=f32)
            + jnp.dot(env, envpack_ref[...], preferred_element_type=f32))

    return kernel


# ----------------------------------------------------------------------------
# Parameters (deterministic in-script init; layouts follow the torch module,
# Linear / GRU weights pre-transposed, GRU gates concatenated as (r|z|n))
# ----------------------------------------------------------------------------
def init_params(key, c_in, n_env, num_layers, S, Hd, n_ws, L):
    ks = jax.random.split(key, 7 + 4 * num_layers)

    def u(k, shape, scale):
        return jax.random.uniform(k, shape, jnp.float32, -scale, scale)

    p = {}
    p["input_mean"] = 0.1 * jax.random.normal(ks[0], (c_in,), jnp.float32)
    p["input_std"] = jnp.abs(jax.random.normal(ks[1], (c_in,), jnp.float32)) + 0.5
    s_enc = 1.0 / math.sqrt(c_in)
    p["enc_w"] = u(ks[2], (c_in, n_env), s_enc)          # Linear(input_size, n_env)^T
    p["enc_b"] = u(ks[3], (1, n_env), s_enc)
    s_gru = 1.0 / math.sqrt(n_env)
    p["gru"] = [dict(
        wih=u(ks[7 + 4 * l + 0], (n_env, 3 * n_env), s_gru),
        whh=u(ks[7 + 4 * l + 1], (n_env, 3 * n_env), s_gru),
        bih=u(ks[7 + 4 * l + 2], (1, 3 * n_env), s_gru),
        bhh=u(ks[7 + 4 * l + 3], (1, 3 * n_env), s_gru),
    ) for l in range(num_layers)]
    s_dec = 1.0 / math.sqrt(n_env)
    p["dec_w"] = u(ks[4], (n_env, n_env), s_dec)         # Linear(n_env, n_env)^T
    p["dec_b"] = u(ks[5], (1, n_env), s_dec)
    # Fixed latent bank: (S*Hd, n_ws, L) (analogue of the W+ latents argument)
    p["latents"] = jax.random.normal(ks[6], (S * Hd, n_ws, L), jnp.float32)
    return p


def prepare_params(p, *, S, Hd):
    """One-time conversion into the fused kernel's padded bf16/f32 layout."""
    f32, bf16 = jnp.float32, jnp.bfloat16
    c_in, H = p["enc_w"].shape                   # H = n_env
    Hp = 128 * ((H + 127) // 128)                # padded feature / gate-tile width

    # fold (x - mean) / std into the encoder Linear, pad output lanes to Hp
    inv_std = 1.0 / p["input_std"]
    w_enc = p["enc_w"] * inv_std[:, None]
    b_enc = p["enc_b"] - (p["input_mean"] * inv_std)[None, :] @ p["enc_w"]
    w_enc_p = jnp.zeros((c_in, Hp), f32).at[:, :H].set(w_enc).astype(bf16)
    b_enc_p = jnp.zeros((1, Hp), f32).at[:, :H].set(b_enc)

    def pad_gates(w):       # (H, 3H) -> (Hp, 3Hp): gate g at cols [g*Hp, g*Hp+H)
        out = jnp.zeros((Hp, 3 * Hp), f32)
        for g in range(3):
            out = out.at[:H, g * Hp:g * Hp + H].set(w[:, g * H:(g + 1) * H])
        return out

    def pad_gate_bias(b):   # (1, 3H) -> (1, 3Hp)
        out = jnp.zeros((1, 3 * Hp), f32)
        for g in range(3):
            out = out.at[:, g * Hp:g * Hp + H].set(b[:, g * H:(g + 1) * H])
        return out

    wih, whh, gbias, bhhn = [], [], [], []
    for lyr in p["gru"]:
        wih.append(pad_gates(lyr["wih"]).astype(bf16))
        whh.append(pad_gates(lyr["whh"]).astype(bf16))
        # fold recurrent r/z biases into the hoisted input-side gate bias
        b_rz = jnp.concatenate(
            [lyr["bih"][:, :2 * H] + lyr["bhh"][:, :2 * H],
             lyr["bih"][:, 2 * H:]], axis=1)
        gbias.append(pad_gate_bias(b_rz))
        bhhn.append(jnp.zeros((1, Hp), f32).at[:, :H].set(lyr["bhh"][:, 2 * H:]))
    wih = jnp.stack(wih); whh = jnp.stack(whh)
    gbias = jnp.stack(gbias); bhhn = jnp.stack(bhhn)

    # decoder Linear: pad input rows to Hp (GELU(0)=0 pad lanes x zero rows)
    w_dec_p = jnp.zeros((Hp, H), f32).at[:H, :].set(p["dec_w"]).astype(bf16)
    b_dec = p["dec_b"].astype(f32)

    # FixedLatentNoiseDecoder as matmuls
    lat_bank = p["latents"]                      # (S*Hd, n_ws, L)
    n_ws, L = lat_bank.shape[1], lat_bank.shape[2]
    W = n_ws // S
    n_lat_in, n_lat_out = S * Hd, n_ws * L
    OW = 128 * ((n_lat_out + H + 127) // 128)    # lane-dense packed output width

    sum_mat = jnp.zeros((H, H), f32).at[:n_lat_in, :n_lat_in].set(
        jnp.kron(jnp.eye(S, dtype=f32), jnp.ones((Hd, Hd), f32)))
    # 1.0 in the noise-envelope lanes so rcp never sees a structural 0 there
    sum_bias = jnp.zeros((1, H), f32).at[:, n_lat_in:].set(1.0)

    lat_pack = jnp.zeros((H, OW), f32)           # block-diag latent bank
    for i in range(S):
        blk = lat_bank[i * Hd:(i + 1) * Hd, i * W:(i + 1) * W, :].reshape(Hd, W * L)
        lat_pack = lat_pack.at[i * Hd:(i + 1) * Hd,
                               i * W * L:(i + 1) * W * L].set(blk)
    # identity passthrough of the raw envelopes into cols [n_lat_out, n_lat_out+H)
    env_pack = jnp.pad(jnp.eye(H, dtype=f32),
                       ((0, 0), (n_lat_out, OW - n_lat_out - H)))

    return dict(w_enc=w_enc_p, b_enc=b_enc_p, wih=wih, whh=whh, gbias=gbias,
                bhhn=bhhn, w_dec=w_dec_p, b_dec=b_dec, sum_mat=sum_mat,
                sum_bias=sum_bias, lat_pack=lat_pack, env_pack=env_pack)


# ----------------------------------------------------------------------------
# Forward pass
# ----------------------------------------------------------------------------
@partial(jax.jit, static_argnames=("S", "Hd", "n_noise", "n_ws", "L", "residual"))
def latent_noise_reactor_forward(kp, x, noise_key, *, S, Hd, n_noise, n_ws, L,
                                 residual=True):
    B, T, c_in = x.shape
    n_env = S * Hd + 2 * n_noise
    n_lat_in = S * Hd
    n_lat_out = n_ws * L
    num_layers = kp["wih"].shape[0]
    Hp = kp["wih"].shape[1]
    OW = kp["lat_pack"].shape[1]

    # time-major rows, batch padded to a sublane multiple (aligned per-step slices)
    Bp = max(8, ((B + 7) // 8) * 8)
    x_tm = jnp.transpose(x, (1, 0, 2))                            # (T, B, c_in)
    x_tm = jnp.pad(x_tm, ((0, 0), (0, Bp - B), (0, 0))).reshape(T * Bp, c_in)
    x_tm = x_tm.astype(jnp.bfloat16)                              # bf16 MXU input

    kernel = _make_fused_kernel(T, Bp, Hp, num_layers)

    # vmem limit derived from resident buffers (v5e default is only 16 MiB)
    def _nbytes(a):
        return int(math.prod(a.shape)) * jnp.dtype(a.dtype).itemsize
    resident = (sum(_nbytes(v) for v in kp.values()) + _nbytes(x_tm)
                + T * Bp * OW * 4                     # packed output
                + T * Bp * Hp * 4                     # act_buf
                + T * Bp * 3 * Hp * 4)                # gi_buf
    vmem_limit = int(min(112 << 20, max(32 << 20, 2 * resident + (4 << 20))))

    out_flat = pl.pallas_call(
        kernel,
        out_shape=jax.ShapeDtypeStruct((T * Bp, OW), jnp.float32),
        in_specs=[VMEM] * 13,
        out_specs=VMEM,
        scratch_shapes=[
            pltpu.VMEM((T * Bp, Hp), jnp.float32),       # act_buf (layer in/out)
            pltpu.VMEM((T * Bp, 3 * Hp), jnp.float32),   # gi_buf (hoisted gates)
        ],
        compiler_params=pltpu.CompilerParams(vmem_limit_bytes=vmem_limit),
    )(x_tm, kp["w_enc"], kp["b_enc"], kp["wih"], kp["whh"], kp["gbias"],
      kp["bhhn"], kp["w_dec"], kp["b_dec"], kp["sum_mat"], kp["sum_bias"],
      kp["lat_pack"], kp["env_pack"])

    # back to batch-major, drop batch padding (tiny ops, fused by XLA under jit)
    out = out_flat.reshape(T, Bp, OW)[:, :B]
    latents = out[..., :n_lat_out].reshape(T, B, n_ws, L).transpose(1, 0, 2, 3)
    env = out[..., n_lat_out:n_lat_out + n_env].transpose(1, 0, 2)   # (B,T,n_env)

    if residual:
        latents = latents - jnp.mean(latents, axis=1, keepdims=True)

    # ---- noise maps: mu + sig * N(0,1), plain jnp (KB-sized; XLA fuses) ----
    # TODO(synk): gaussian_filter (temporal sigma=5 smoothing of the random
    # noise, defined outside this module) is not reproduced; unsmoothed N(0,1).
    noise_envs = env[:, :, n_lat_in:]                                # (B,T,2*n_noise)
    noise = []
    nkeys = jax.random.split(noise_key, n_noise)
    for i in range(n_noise):
        size = 2 ** (i + 2)
        mu = noise_envs[:, :, 2 * i][:, :, None, None]
        sig = noise_envs[:, :, 2 * i + 1][:, :, None, None]
        n = jax.random.normal(nkeys[i], (B, T, size, size), jnp.float32)
        noise.append(mu + sig * n)

    return latents, noise


# ----------------------------------------------------------------------------
if __name__ == "__main__":
    key = jax.random.PRNGKey(0)
    B, T, INPUT_SIZE = 2, 8, 16
    S, HD, N_NOISE = 3, 8, 4            # n_latent_split, decoder hidden, n_noise
    N_WS, L = 6, 16                     # latent bank: (S*HD, N_WS, L); W = N_WS // S
    NUM_LAYERS = 2
    N_ENV = S * HD + 2 * N_NOISE        # envelope width for the 'fixed' decoder

    kpk, kx, kn = jax.random.split(key, 3)
    params = init_params(kpk, INPUT_SIZE, N_ENV, NUM_LAYERS, S, HD, N_WS, L)
    kparams = prepare_params(params, S=S, Hd=HD)
    x = jax.random.normal(kx, (B, T, INPUT_SIZE), jnp.float32)

    latents, noise = latent_noise_reactor_forward(
        kparams, x, kn, S=S, Hd=HD, n_noise=N_NOISE, n_ws=N_WS, L=L, residual=True)
    jax.block_until_ready((latents, noise))

    assert latents.shape == (B, T, N_WS, L), latents.shape
    assert [tuple(n.shape) for n in noise] == \
        [(B, T, 2 ** (i + 2), 2 ** (i + 2)) for i in range(N_NOISE)]
    print("KERNEL_OK")
</pallas_src>

<mosaic_0001>
module attributes {stable_mosaic.version = 11 : i64} {
  func.func @kernel(%arg0: memref<64x16xbf16, #tpu.memory_space<vmem>>, %arg1: memref<16x128xbf16, #tpu.memory_space<vmem>>, %arg2: memref<1x128xf32, #tpu.memory_space<vmem>>, %arg3: memref<2x128x384xbf16, #tpu.memory_space<vmem>>, %arg4: memref<2x128x384xbf16, #tpu.memory_space<vmem>>, %arg5: memref<2x1x384xf32, #tpu.memory_space<vmem>>, %arg6: memref<2x1x128xf32, #tpu.memory_space<vmem>>, %arg7: memref<128x32xbf16, #tpu.memory_space<vmem>>, %arg8: memref<1x32xf32, #tpu.memory_space<vmem>>, %arg9: memref<32x32xf32, #tpu.memory_space<vmem>>, %arg10: memref<1x32xf32, #tpu.memory_space<vmem>>, %arg11: memref<32x128xf32, #tpu.memory_space<vmem>>, %arg12: memref<32x128xf32, #tpu.memory_space<vmem>>, %arg13: memref<64x128xf32, #tpu.memory_space<vmem>>, %arg14: memref<64x128xf32, #tpu.memory_space<vmem>>, %arg15: memref<64x384xf32, #tpu.memory_space<vmem>>) attributes {dimension_semantics = [], scalar_prefetch = 0 : i64, scratch_operands = 2 : i64, tpu.core_type = #tpu.core_type<tc>} {
    %c0 = arith.constant 0 : index
    %c0_0 = arith.constant 0 : index
    %0 = vector.load %arg0[%c0, %c0_0] : memref<64x16xbf16, #tpu.memory_space<vmem>>, vector<64x16xbf16>
    %c0_1 = arith.constant 0 : index
    %c0_2 = arith.constant 0 : index
    %1 = vector.load %arg1[%c0_1, %c0_2] : memref<16x128xbf16, #tpu.memory_space<vmem>>, vector<16x128xbf16>
    %cst = arith.constant dense<0.000000e+00> : vector<64x128xf32>
    %2 = tpu.matmul %0, %1, %cst {dimension_numbers = #tpu.dot_dimension_numbers<[1], [0], [0], [1], [0, 0, 1, 1], [], []>} : vector<64x16xbf16>, vector<16x128xbf16>, vector<64x128xf32> -> vector<64x128xf32>
    %c0_3 = arith.constant 0 : index
    %c0_4 = arith.constant 0 : index
    %3 = vector.load %arg2[%c0_3, %c0_4] : memref<1x128xf32, #tpu.memory_space<vmem>>, vector<1x128xf32>
    %4 = vector.broadcast %3 : vector<1x128xf32> to vector<64x128xf32>
    %5 = arith.addf %2, %4 : vector<64x128xf32>
    %cst_5 = arith.constant 5.000000e-01 : f32
    %6 = vector.broadcast %cst_5 : f32 to vector<64x128xf32>
    %7 = arith.mulf %6, %5 : vector<64x128xf32>
    %cst_6 = arith.constant 4.471500e-02 : f32
    %8 = vector.broadcast %cst_6 : f32 to vector<64x128xf32>
    %9 = arith.mulf %8, %5 : vector<64x128xf32>
    %10 = arith.mulf %9, %5 : vector<64x128xf32>
    %11 = arith.mulf %10, %5 : vector<64x128xf32>
    %12 = arith.addf %5, %11 : vector<64x128xf32>
    %cst_7 = arith.constant 0.797884583 : f32
    %13 = vector.broadcast %cst_7 : f32 to vector<64x128xf32>
    %14 = arith.mulf %13, %12 : vector<64x128xf32>
    %15 = math.tanh %14 : vector<64x128xf32>
    %cst_8 = arith.constant 1.000000e+00 : f32
    %16 = vector.broadcast %cst_8 : f32 to vector<64x128xf32>
    %17 = arith.addf %16, %15 : vector<64x128xf32>
    %18 = arith.mulf %7, %17 : vector<64x128xf32>
    %c0_9 = arith.constant 0 : index
    %c0_10 = arith.constant 0 : index
    %19 = vector.load %arg14[%c0_9, %c0_10] : memref<64x128xf32, #tpu.memory_space<vmem>>, vector<64x128xf32>
    tpu.vector_store %arg14[%c0_9, %c0_10], %18 {strides = array<i32>} : memref<64x128xf32, #tpu.memory_space<vmem>>, vector<64x128xf32>,
    %c0_11 = arith.constant 0 : index
    %c0_12 = arith.constant 0 : index
    %c0_13 = arith.constant 0 : index
    %20 = vector.load %arg4[%c0_11, %c0_12, %c0_13] : memref<2x128x384xbf16, #tpu.memory_space<vmem>>, vector<1x128x384xbf16>
    %21 = vector.shape_cast %20 : vector<1x128x384xbf16> to vector<128x384xbf16>
    %c0_14 = arith.constant 0 : index
    %c0_15 = arith.constant 0 : index
    %22 = vector.load %arg14[%c0_14, %c0_15] : memref<64x128xf32, #tpu.memory_space<vmem>>, vector<64x128xf32>
    %23 = arith.truncf %22 : vector<64x128xf32> to vector<64x128xbf16>
    %c0_16 = arith.constant 0 : index
    %c0_17 = arith.constant 0 : index
    %c0_18 = arith.constant 0 : index
    %24 = vector.load %arg3[%c0_16, %c0_17, %c0_18] : memref<2x128x384xbf16, #tpu.memory_space<vmem>>, vector<1x128x384xbf16>
    %25 = vector.shape_cast %24 : vector<1x128x384xbf16> to vector<128x384xbf16>
    %cst_19 = arith.constant dense<0.000000e+00> : vector<64x384xf32>
    %26 = tpu.matmul %23, %25, %cst_19 {dimension_numbers = #tpu.dot_dimension_numbers<[1], [0], [0], [1], [0, 0, 1, 1], [], []>} : vector<64x128xbf16>, vector<128x384xbf16>, vector<64x384xf32> -> vector<64x384xf32>
    %c0_20 = arith.constant 0 : index
    %c0_21 = arith.constant 0 : index
    %c0_22 = arith.constant 0 : index
    %27 = vector.load %arg5[%c0_20, %c0_21, %c0_22] : memref<2x1x384xf32, #tpu.memory_space<vmem>>, vector<1x1x384xf32>
    %28 = vector.shape_cast %27 : vector<1x1x384xf32> to vector<1x384xf32>
    %29 = vector.broadcast %28 : vector<1x384xf32> to vector<64x384xf32>
    %30 = arith.addf %26, %29 : vector<64x384xf32>
    %c0_23 = arith.constant 0 : index
    %c0_24 = arith.constant 0 : index
    %31 = vector.load %arg15[%c0_23, %c0_24] : memref<64x384xf32, #tpu.memory_space<vmem>>, vector<64x384xf32>
    tpu.vector_store %arg15[%c0_23, %c0_24], %30 {strides = array<i32>} : memref<64x384xf32, #tpu.memory_space<vmem>>, vector<64x384xf32>,
    %c0_25 = arith.constant 0 : index
    %c0_26 = arith.constant 0 : index
    %c0_27 = arith.constant 0 : index
    %32 = vector.load %arg6[%c0_25, %c0_26, %c0_27] : memref<2x1x128xf32, #tpu.memory_space<vmem>>, vector<1x1x128xf32>
    %33 = vector.shape_cast %32 : vector<1x1x128xf32> to vector<1x128xf32>
    %34 = vector.shape_cast %33 : vector<1x128xf32> to vector<1x128xf32>
    %35 = vector.broadcast %34 : vector<1x128xf32> to vector<8x128xf32>
    %cst_28 = arith.constant 0.000000e+00 : f32
    %36 = vector.broadcast %cst_28 : f32 to vector<8x128xf32>
    %c0_29 = arith.constant 0 : index
    %c0_30 = arith.constant 0 : index
    %37 = vector.load %arg15[%c0_29, %c0_30] : memref<64x384xf32, #tpu.memory_space<vmem>>, vector<8x384xf32>
    %38 = arith.truncf %36 : vector<8x128xf32> to vector<8x128xbf16>
    %cst_31 = arith.constant dense<0.000000e+00> : vector<8x384xf32>
    %39 = tpu.matmul %38, %21, %cst_31 {dimension_numbers = #tpu.dot_dimension_numbers<[1], [0], [0], [1], [0, 0, 1, 1], [], []>} : vector<8x128xbf16>, vector<128x384xbf16>, vector<8x384xf32> -> vector<8x384xf32>
    %40 = vector.extract_strided_slice %37 {offsets = [0, 0], sizes = [8, 128], strides = [1, 1]} : vector<8x384xf32> to vector<8x128xf32>
    %41 = vector.extract_strided_slice %39 {offsets = [0, 0], sizes = [8, 128], strides = [1, 1]} : vector<8x384xf32> to vector<8x128xf32>
    %42 = arith.addf %40, %41 : vector<8x128xf32>
    %43 = arith.negf %42 : vector<8x128xf32>
    %44 = math.exp %43 : vector<8x128xf32>
    %cst_32 = arith.constant 1.000000e+00 : f32
    %45 = vector.broadcast %cst_32 : f32 to vector<8x128xf32>
    %46 = arith.addf %45, %44 : vector<8x128xf32>
    %47 = arith.divf %45, %46 : vector<8x128xf32>
    %48 = vector.extract_strided_slice %37 {offsets = [0, 128], sizes = [8, 128], strides = [1, 1]} : vector<8x384xf32> to vector<8x128xf32>
    %49 = vector.extract_strided_slice %39 {offsets = [0, 128], sizes = [8, 128], strides = [1, 1]} : vector<8x384xf32> to vector<8x128xf32>
    %50 = arith.addf %48, %49 : vector<8x128xf32>
    %51 = arith.negf %50 : vector<8x128xf32>
    %52 = math.exp %51 : vector<8x128xf32>
    %cst_33 = arith.constant 1.000000e+00 : f32
    %53 = vector.broadcast %cst_33 : f32 to vector<8x128xf32>
    %54 = arith.addf %53, %52 : vector<8x128xf32>
    %55 = arith.divf %53, %54 : vector<8x128xf32>
    %56 = vector.extract_strided_slice %37 {offsets = [0, 256], sizes = [8, 128], strides = [1, 1]} : vector<8x384xf32> to vector<8x128xf32>
    %57 = vector.extract_strided_slice %39 {offsets = [0, 256], sizes = [8, 128], strides = [1, 1]} : vector<8x384xf32> to vector<8x128xf32>
    %58 = arith.addf %57, %35 : vector<8x128xf32>
    %59 = arith.mulf %47, %58 : vector<8x128xf32>
    %60 = arith.addf %56, %59 : vector<8x128xf32>
    %61 = math.tanh %60 : vector<8x128xf32>
    %62 = arith.subf %36, %61 : vector<8x128xf32>
    %63 = arith.mulf %55, %62 : vector<8x128xf32>
    %64 = arith.addf %61, %63 : vector<8x128xf32>
    %c0_34 = arith.constant 0 : index
    %c0_35 = arith.constant 0 : index
    %65 = vector.load %arg14[%c0_34, %c0_35] : memref<64x128xf32, #tpu.memory_space<vmem>>, vector<8x128xf32>
    tpu.vector_store %arg14[%c0_34, %c0_35], %64 {strides = array<i32>} : memref<64x128xf32, #tpu.memory_space<vmem>>, vector<8x128xf32>,
    %c8 = arith.constant 8 : index
    %c0_36 = arith.constant 0 : index
    %66 = vector.load %arg15[%c8, %c0_36] : memref<64x384xf32, #tpu.memory_space<vmem>>, vector<8x384xf32>
    %67 = arith.truncf %64 : vector<8x128xf32> to vector<8x128xbf16>
    %cst_37 = arith.constant dense<0.000000e+00> : vector<8x384xf32>
    %68 = tpu.matmul %67, %21, %cst_37 {dimension_numbers = #tpu.dot_dimension_numbers<[1], [0], [0], [1], [0, 0, 1, 1], [], []>} : vector<8x128xbf16>, vector<128x384xbf16>, vector<8x384xf32> -> vector<8x384xf32>
    %69 = vector.extract_strided_slice %66 {offsets = [0, 0], sizes = [8, 128], strides = [1, 1]} : vector<8x384xf32> to vector<8x128xf32>
    %70 = vector.extract_strided_slice %68 {offsets = [0, 0], sizes = [8, 128], strides = [1, 1]} : vector<8x384xf32> to vector<8x128xf32>
    %71 = arith.addf %69, %70 : vector<8x128xf32>
    %72 = arith.negf %71 : vector<8x128xf32>
    %73 = math.exp %72 : vector<8x128xf32>
    %cst_38 = arith.constant 1.000000e+00 : f32
    %74 = vector.broadcast %cst_38 : f32 to vector<8x128xf32>
    %75 = arith.addf %74, %73 : vector<8x128xf32>
    %76 = arith.divf %74, %75 : vector<8x128xf32>
    %77 = vector.extract_strided_slice %66 {offsets = [0, 128], sizes = [8, 128], strides = [1, 1]} : vector<8x384xf32> to vector<8x128xf32>
    %78 = vector.extract_strided_slice %68 {offsets = [0, 128], sizes = [8, 128], strides = [1, 1]} : vector<8x384xf32> to vector<8x128xf32>
    %79 = arith.addf %77, %78 : vector<8x128xf32>
    %80 = arith.negf %79 : vector<8x128xf32>
    %81 = math.exp %80 : vector<8x128xf32>
    %cst_39 = arith.constant 1.000000e+00 : f32
    %82 = vector.broadcast %cst_39 : f32 to vector<8x128xf32>
    %83 = arith.addf %82, %81 : vector<8x128xf32>
    %84 = arith.divf %82, %83 : vector<8x128xf32>
    %85 = vector.extract_strided_slice %66 {offsets = [0, 256], sizes = [8, 128], strides = [1, 1]} : vector<8x384xf32> to vector<8x128xf32>
    %86 = vector.extract_strided_slice %68 {offsets = [0, 256], sizes = [8, 128], strides = [1, 1]} : vector<8x384xf32> to vector<8x128xf32>
    %87 = arith.addf %86, %35 : vector<8x128xf32>
    %88 = arith.mulf %76, %87 : vector<8x128xf32>
    %89 = arith.addf %85, %88 : vector<8x128xf32>
    %90 = math.tanh %89 : vector<8x128xf32>
    %91 = arith.subf %64, %90 : vector<8x128xf32>
    %92 = arith.mulf %84, %91 : vector<8x128xf32>
    %93 = arith.addf %90, %92 : vector<8x128xf32>
    %c8_40 = arith.constant 8 : index
    %c0_41 = arith.constant 0 : index
    %94 = vector.load %arg14[%c8_40, %c0_41] : memref<64x128xf32, #tpu.memory_space<vmem>>, vector<8x128xf32>
    tpu.vector_store %arg14[%c8_40, %c0_41], %93 {strides = array<i32>} : memref<64x128xf32, #tpu.memory_space<vmem>>, vector<8x128xf32>,
    %c16 = arith.constant 16 : index
    %c0_42 = arith.constant 0 : index
    %95 = vector.load %arg15[%c16, %c0_42] : memref<64x384xf32, #tpu.memory_space<vmem>>, vector<8x384xf32>
    %96 = arith.truncf %93 : vector<8x128xf32> to vector<8x128xbf16>
    %cst_43 = arith.constant dense<0.000000e+00> : vector<8x384xf32>
    %97 = tpu.matmul %96, %21, %cst_43 {dimension_numbers = #tpu.dot_dimension_numbers<[1], [0], [0], [1], [0, 0, 1, 1], [], []>} : vector<8x128xbf16>, vector<128x384xbf16>, vector<8x384xf32> -> vector<8x384xf32>
    %98 = vector.extract_strided_slice %95 {offsets = [0, 0], sizes = [8, 128], strides = [1, 1]} : vector<8x384xf32> to vector<8x128xf32>
    %99 = vector.extract_strided_slice %97 {offsets = [0, 0], sizes = [8, 128], strides = [1, 1]} : vector<8x384xf32> to vector<8x128xf32>
    %100 = arith.addf %98, %99 : vector<8x128xf32>
    %101 = arith.negf %100 : vector<8x128xf32>
    %102 = math.exp %101 : vector<8x128xf32>
    %cst_44 = arith.constant 1.000000e+00 : f32
    %103 = vector.broadcast %cst_44 : f32 to vector<8x128xf32>
    %104 = arith.addf %103, %102 : vector<8x128xf32>
    %105 = arith.divf %103, %104 : vector<8x128xf32>
    %106 = vector.extract_strided_slice %95 {offsets = [0, 128], sizes = [8, 128], strides = [1, 1]} : vector<8x384xf32> to vector<8x128xf32>
    %107 = vector.extract_strided_slice %97 {offsets = [0, 128], sizes = [8, 128], strides = [1, 1]} : vector<8x384xf32> to vector<8x128xf32>
    %108 = arith.addf %106, %107 : vector<8x128xf32>
    %109 = arith.negf %108 : vector<8x128xf32>
    %110 = math.exp %109 : vector<8x128xf32>
    %cst_45 = arith.constant 1.000000e+00 : f32
    %111 = vector.broadcast %cst_45 : f32 to vector<8x128xf32>
    %112 = arith.addf %111, %110 : vector<8x128xf32>
    %113 = arith.divf %111, %112 : vector<8x128xf32>
    %114 = vector.extract_strided_slice %95 {offsets = [0, 256], sizes = [8, 128], strides = [1, 1]} : vector<8x384xf32> to vector<8x128xf32>
    %115 = vector.extract_strided_slice %97 {offsets = [0, 256], sizes = [8, 128], strides = [1, 1]} : vector<8x384xf32> to vector<8x128xf32>
    %116 = arith.addf %115, %35 : vector<8x128xf32>
    %117 = arith.mulf %105, %116 : vector<8x128xf32>
    %118 = arith.addf %114, %117 : vector<8x128xf32>
    %119 = math.tanh %118 : vector<8x128xf32>
    %120 = arith.subf %93, %119 : vector<8x128xf32>
    %121 = arith.mulf %113, %120 : vector<8x128xf32>
    %122 = arith.addf %119, %121 : vector<8x128xf32>
    %c16_46 = arith.constant 16 : index
    %c0_47 = arith.constant 0 : index
    %123 = vector.load %arg14[%c16_46, %c0_47] : memref<64x128xf32, #tpu.memory_space<vmem>>, vector<8x128xf32>
    tpu.vector_store %arg14[%c16_46, %c0_47], %122 {strides = array<i32>} : memref<64x128xf32, #tpu.memory_space<vmem>>, vector<8x128xf32>,
    %c24 = arith.constant 24 : index
    %c0_48 = arith.constant 0 : index
    %124 = vector.load %arg15[%c24, %c0_48] : memref<64x384xf32, #tpu.memory_space<vmem>>, vector<8x384xf32>
    %125 = arith.truncf %122 : vector<8x128xf32> to vector<8x128xbf16>
    %cst_49 = arith.constant dense<0.000000e+00> : vector<8x384xf32>
    %126 = tpu.matmul %125, %21, %cst_49 {dimension_numbers = #tpu.dot_dimension_numbers<[1], [0], [0], [1], [0, 0, 1, 1], [], []>} : vector<8x128xbf16>, vector<128x384xbf16>, vector<8x384xf32> -> vector<8x384xf32>
    %127 = vector.extract_strided_slice %124 {offsets = [0, 0], sizes = [8, 128], strides = [1, 1]} : vector<8x384xf32> to vector<8x128xf32>
    %128 = vector.extract_strided_slice %126 {offsets = [0, 0], sizes = [8, 128], strides = [1, 1]} : vector<8x384xf32> to vector<8x128xf32>
    %129 = arith.addf %127, %128 : vector<8x128xf32>
    %130 = arith.negf %129 : vector<8x128xf32>
    %131 = math.exp %130 : vector<8x128xf32>
    %cst_50 = arith.constant 1.000000e+00 : f32
    %132 = vector.broadcast %cst_50 : f32 to vector<8x128xf32>
    %133 = arith.addf %132, %131 : vector<8x128xf32>
    %134 = arith.divf %132, %133 : vector<8x128xf32>
    %135 = vector.extract_strided_slice %124 {offsets = [0, 128], sizes = [8, 128], strides = [1, 1]} : vector<8x384xf32> to vector<8x128xf32>
    %136 = vector.extract_strided_slice %126 {offsets = [0, 128], sizes = [8, 128], strides = [1, 1]} : vector<8x384xf32> to vector<8x128xf32>
    %137 = arith.addf %135, %136 : vector<8x128xf32>
    %138 = arith.negf %137 : vector<8x128xf32>
    %139 = math.exp %138 : vector<8x128xf32>
    %cst_51 = arith.constant 1.000000e+00 : f32
    %140 = vector.broadcast %cst_51 : f32 to vector<8x128xf32>
    %141 = arith.addf %140, %139 : vector<8x128xf32>
    %142 = arith.divf %140, %141 : vector<8x128xf32>
    %143 = vector.extract_strided_slice %124 {offsets = [0, 256], sizes = [8, 128], strides = [1, 1]} : vector<8x384xf32> to vector<8x128xf32>
    %144 = vector.extract_strided_slice %126 {offsets = [0, 256], sizes = [8, 128], strides = [1, 1]} : vector<8x384xf32> to vector<8x128xf32>
    %145 = arith.addf %144, %35 : vector<8x128xf32>
    %146 = arith.mulf %134, %145 : vector<8x128xf32>
    %147 = arith.addf %143, %146 : vector<8x128xf32>
    %148 = math.tanh %147 : vector<8x128xf32>
    %149 = arith.subf %122, %148 : vector<8x128xf32>
    %150 = arith.mulf %142, %149 : vector<8x128xf32>
    %151 = arith.addf %148, %150 : vector<8x128xf32>
    %c24_52 = arith.constant 24 : index
    %c0_53 = arith.constant 0 : index
    %152 = vector.load %arg14[%c24_52, %c0_53] : memref<64x128xf32, #tpu.memory_space<vmem>>, vector<8x128xf32>
    tpu.vector_store %arg14[%c24_52, %c0_53], %151 {strides = array<i32>} : memref<64x128xf32, #tpu.memory_space<vmem>>, vector<8x128xf32>,
    %c32 = arith.constant 32 : index
    %c0_54 = arith.constant 0 : index
    %153 = vector.load %arg15[%c32, %c0_54] : memref<64x384xf32, #tpu.memory_space<vmem>>, vector<8x384xf32>
    %154 = arith.truncf %151 : vector<8x128xf32> to vector<8x128xbf16>
    %cst_55 = arith.constant dense<0.000000e+00> : vector<8x384xf32>
    %155 = tpu.matmul %154, %21, %cst_55 {dimension_numbers = #tpu.dot_dimension_numbers<[1], [0], [0], [1], [0, 0, 1, 1], [], []>} : vector<8x128xbf16>, vector<128x384xbf16>, vector<8x384xf32> -> vector<8x384xf32>
    %156 = vector.extract_strided_slice %153 {offsets = [0, 0], sizes = [8, 128], strides = [1, 1]} : vector<8x384xf32> to vector<8x128xf32>
    %157 = vector.extract_strided_slice %155 {offsets = [0, 0], sizes = [8, 128], strides = [1, 1]} : vector<8x384xf32> to vector<8x128xf32>
    %158 = arith.addf %156, %157 : vector<8x128xf32>
    %159 = arith.negf %158 : vector<8x128xf32>
    %160 = math.exp %159 : vector<8x128xf32>
    %cst_56 = arith.constant 1.000000e+00 : f32
    %161 = vector.broadcast %cst_56 : f32 to vector<8x128xf32>
    %162 = arith.addf %161, %160 : vector<8x128xf32>
    %163 = arith.divf %161, %162 : vector<8x128xf32>
    %164 = vector.extract_strided_slice %153 {offsets = [0, 128], sizes = [8, 128], strides = [1, 1]} : vector<8x384xf32> to vector<8x128xf32>
    %165 = vector.extract_strided_slice %155 {offsets = [0, 128], sizes = [8, 128], strides = [1, 1]} : vector<8x384xf32> to vector<8x128xf32>
    %166 = arith.addf %164, %165 : vector<8x128xf32>
    %167 = arith.negf %166 : vector<8x128xf32>
    %168 = math.exp %167 : vector<8x128xf32>
    %cst_57 = arith.constant 1.000000e+00 : f32
    %169 = vector.broadcast %cst_57 : f32 to vector<8x128xf32>
    %170 = arith.addf %169, %168 : vector<8x128xf32>
    %171 = arith.divf %169, %170 : vector<8x128xf32>
    %172 = vector.extract_strided_slice %153 {offsets = [0, 256], sizes = [8, 128], strides = [1, 1]} : vector<8x384xf32> to vector<8x128xf32>
    %173 = vector.extract_strided_slice %155 {offsets = [0, 256], sizes = [8, 128], strides = [1, 1]} : vector<8x384xf32> to vector<8x128xf32>
    %174 = arith.addf %173, %35 : vector<8x128xf32>
    %175 = arith.mulf %163, %174 : vector<8x128xf32>
    %176 = arith.addf %172, %175 : vector<8x128xf32>
    %177 = math.tanh %176 : vector<8x128xf32>
    %178 = arith.subf %151, %177 : vector<8x128xf32>
    %179 = arith.mulf %171, %178 : vector<8x128xf32>
    %180 = arith.addf %177, %179 : vector<8x128xf32>
    %c32_58 = arith.constant 32 : index
    %c0_59 = arith.constant 0 : index
    %181 = vector.load %arg14[%c32_58, %c0_59] : memref<64x128xf32, #tpu.memory_space<vmem>>, vector<8x128xf32>
    tpu.vector_store %arg14[%c32_58, %c0_59], %180 {strides = array<i32>} : memref<64x128xf32, #tpu.memory_space<vmem>>, vector<8x128xf32>,
    %c40 = arith.constant 40 : index
    %c0_60 = arith.constant 0 : index
    %182 = vector.load %arg15[%c40, %c0_60] : memref<64x384xf32, #tpu.memory_space<vmem>>, vector<8x384xf32>
    %183 = arith.truncf %180 : vector<8x128xf32> to vector<8x128xbf16>
    %cst_61 = arith.constant dense<0.000000e+00> : vector<8x384xf32>
    %184 = tpu.matmul %183, %21, %cst_61 {dimension_numbers = #tpu.dot_dimension_numbers<[1], [0], [0], [1], [0, 0, 1, 1], [], []>} : vector<8x128xbf16>, vector<128x384xbf16>, vector<8x384xf32> -> vector<8x384xf32>
    %185 = vector.extract_strided_slice %182 {offsets = [0, 0], sizes = [8, 128], strides = [1, 1]} : vector<8x384xf32> to vector<8x128xf32>
    %186 = vector.extract_strided_slice %184 {offsets = [0, 0], sizes = [8, 128], strides = [1, 1]} : vector<8x384xf32> to vector<8x128xf32>
    %187 = arith.addf %185, %186 : vector<8x128xf32>
    %188 = arith.negf %187 : vector<8x128xf32>
    %189 = math.exp %188 : vector<8x128xf32>
    %cst_62 = arith.constant 1.000000e+00 : f32
    %190 = vector.broadcast %cst_62 : f32 to vector<8x128xf32>
    %191 = arith.addf %190, %189 : vector<8x128xf32>
    %192 = arith.divf %190, %191 : vector<8x128xf32>
    %193 = vector.extract_strided_slice %182 {offsets = [0, 128], sizes = [8, 128], strides = [1, 1]} : vector<8x384xf32> to vector<8x128xf32>
    %194 = vector.extract_strided_slice %184 {offsets = [0, 128], sizes = [8, 128], strides = [1, 1]} : vector<8x384xf32> to vector<8x128xf32>
    %195 = arith.addf %193, %194 : vector<8x128xf32>
    %196 = arith.negf %195 : vector<8x128xf32>
    %197 = math.exp %196 : vector<8x128xf32>
    %cst_63 = arith.constant 1.000000e+00 : f32
    %198 = vector.broadcast %cst_63 : f32 to vector<8x128xf32>
    %199 = arith.addf %198, %197 : vector<8x128xf32>
    %200 = arith.divf %198, %199 : vector<8x128xf32>
    %201 = vector.extract_strided_slice %182 {offsets = [0, 256], sizes = [8, 128], strides = [1, 1]} : vector<8x384xf32> to vector<8x128xf32>
    %202 = vector.extract_strided_slice %184 {offsets = [0, 256], sizes = [8, 128], strides = [1, 1]} : vector<8x384xf32> to vector<8x128xf32>
    %203 = arith.addf %202, %35 : vector<8x128xf32>
    %204 = arith.mulf %192, %203 : vector<8x128xf32>
    %205 = arith.addf %201, %204 : vector<8x128xf32>
    %206 = math.tanh %205 : vector<8x128xf32>
    %207 = arith.subf %180, %206 : vector<8x128xf32>
    %208 = arith.mulf %200, %207 : vector<8x128xf32>
    %209 = arith.addf %206, %208 : vector<8x128xf32>
    %c40_64 = arith.constant 40 : index
    %c0_65 = arith.constant 0 : index
    %210 = vector.load %arg14[%c40_64, %c0_65] : memref<64x128xf32, #tpu.memory_space<vmem>>, vector<8x128xf32>
    tpu.vector_store %arg14[%c40_64, %c0_65], %209 {strides = array<i32>} : memref<64x128xf32, #tpu.memory_space<vmem>>, vector<8x128xf32>,
    %c48 = arith.constant 48 : index
    %c0_66 = arith.constant 0 : index
    %211 = vector.load %arg15[%c48, %c0_66] : memref<64x384xf32, #tpu.memory_space<vmem>>, vector<8x384xf32>
    %212 = arith.truncf %209 : vector<8x128xf32> to vector<8x128xbf16>
    %cst_67 = arith.constant dense<0.000000e+00> : vector<8x384xf32>
    %213 = tpu.matmul %212, %21, %cst_67 {dimension_numbers = #tpu.dot_dimension_numbers<[1], [0], [0], [1], [0, 0, 1, 1], [], []>} : vector<8x128xbf16>, vector<128x384xbf16>, vector<8x384xf32> -> vector<8x384xf32>
    %214 = vector.extract_strided_slice %211 {offsets = [0, 0], sizes = [8, 128], strides = [1, 1]} : vector<8x384xf32> to vector<8x128xf32>
    %215 = vector.extract_strided_slice %213 {offsets = [0, 0], sizes = [8, 128], strides = [1, 1]} : vector<8x384xf32> to vector<8x128xf32>
    %216 = arith.addf %214, %215 : vector<8x128xf32>
    %217 = arith.negf %216 : vector<8x128xf32>
    %218 = math.exp %217 : vector<8x128xf32>
    %cst_68 = arith.constant 1.000000e+00 : f32
    %219 = vector.broadcast %cst_68 : f32 to vector<8x128xf32>
    %220 = arith.addf %219, %218 : vector<8x128xf32>
    %221 = arith.divf %219, %220 : vector<8x128xf32>
    %222 = vector.extract_strided_slice %211 {offsets = [0, 128], sizes = [8, 128], strides = [1, 1]} : vector<8x384xf32> to vector<8x128xf32>
    %223 = vector.extract_strided_slice %213 {offsets = [0, 128], sizes = [8, 128], strides = [1, 1]} : vector<8x384xf32> to vector<8x128xf32>
    %224 = arith.addf %222, %223 : vector<8x128xf32>
    %225 = arith.negf %224 : vector<8x128xf32>
    %226 = math.exp %225 : vector<8x128xf32>
    %cst_69 = arith.constant 1.000000e+00 : f32
    %227 = vector.broadcast %cst_69 : f32 to vector<8x128xf32>
    %228 = arith.addf %227, %226 : vector<8x128xf32>
    %229 = arith.divf %227, %228 : vector<8x128xf32>
    %230 = vector.extract_strided_slice %211 {offsets = [0, 256], sizes = [8, 128], strides = [1, 1]} : vector<8x384xf32> to vector<8x128xf32>
    %231 = vector.extract_strided_slice %213 {offsets = [0, 256], sizes = [8, 128], strides = [1, 1]} : vector<8x384xf32> to vector<8x128xf32>
    %232 = arith.addf %231, %35 : vector<8x128xf32>
    %233 = arith.mulf %221, %232 : vector<8x128xf32>
    %234 = arith.addf %230, %233 : vector<8x128xf32>
    %235 = math.tanh %234 : vector<8x128xf32>
    %236 = arith.subf %209, %235 : vector<8x128xf32>
    %237 = arith.mulf %229, %236 : vector<8x128xf32>
    %238 = arith.addf %235, %237 : vector<8x128xf32>
    %c48_70 = arith.constant 48 : index
    %c0_71 = arith.constant 0 : index
    %239 = vector.load %arg14[%c48_70, %c0_71] : memref<64x128xf32, #tpu.memory_space<vmem>>, vector<8x128xf32>
    tpu.vector_store %arg14[%c48_70, %c0_71], %238 {strides = array<i32>} : memref<64x128xf32, #tpu.memory_space<vmem>>, vector<8x128xf32>,
    %c56 = arith.constant 56 : index
    %c0_72 = arith.constant 0 : index
    %240 = vector.load %arg15[%c56, %c0_72] : memref<64x384xf32, #tpu.memory_space<vmem>>, vector<8x384xf32>
    %241 = arith.truncf %238 : vector<8x128xf32> to vector<8x128xbf16>
    %cst_73 = arith.constant dense<0.000000e+00> : vector<8x384xf32>
    %242 = tpu.matmul %241, %21, %cst_73 {dimension_numbers = #tpu.dot_dimension_numbers<[1], [0], [0], [1], [0, 0, 1, 1], [], []>} : vector<8x128xbf16>, vector<128x384xbf16>, vector<8x384xf32> -> vector<8x384xf32>
    %243 = vector.extract_strided_slice %240 {offsets = [0, 0], sizes = [8, 128], strides = [1, 1]} : vector<8x384xf32> to vector<8x128xf32>
    %244 = vector.extract_strided_slice %242 {offsets = [0, 0], sizes = [8, 128], strides = [1, 1]} : vector<8x384xf32> to vector<8x128xf32>
    %245 = arith.addf %243, %244 : vector<8x128xf32>
    %246 = arith.negf %245 : vector<8x128xf32>
    %247 = math.exp %246 : vector<8x128xf32>
    %cst_74 = arith.constant 1.000000e+00 : f32
    %248 = vector.broadcast %cst_74 : f32 to vector<8x128xf32>
    %249 = arith.addf %248, %247 : vector<8x128xf32>
    %250 = arith.divf %248, %249 : vector<8x128xf32>
    %251 = vector.extract_strided_slice %240 {offsets = [0, 128], sizes = [8, 128], strides = [1, 1]} : vector<8x384xf32> to vector<8x128xf32>
    %252 = vector.extract_strided_slice %242 {offsets = [0, 128], sizes = [8, 128], strides = [1, 1]} : vector<8x384xf32> to vector<8x128xf32>
    %253 = arith.addf %251, %252 : vector<8x128xf32>
    %254 = arith.negf %253 : vector<8x128xf32>
    %255 = math.exp %254 : vector<8x128xf32>
    %cst_75 = arith.constant 1.000000e+00 : f32
    %256 = vector.broadcast %cst_75 : f32 to vector<8x128xf32>
    %257 = arith.addf %256, %255 : vector<8x128xf32>
    %258 = arith.divf %256, %257 : vector<8x128xf32>
    %259 = vector.extract_strided_slice %240 {offsets = [0, 256], sizes = [8, 128], strides = [1, 1]} : vector<8x384xf32> to vector<8x128xf32>
    %260 = vector.extract_strided_slice %242 {offsets = [0, 256], sizes = [8, 128], strides = [1, 1]} : vector<8x384xf32> to vector<8x128xf32>
    %261 = arith.addf %260, %35 : vector<8x128xf32>
    %262 = arith.mulf %250, %261 : vector<8x128xf32>
    %263 = arith.addf %259, %262 : vector<8x128xf32>
    %264 = math.tanh %263 : vector<8x128xf32>
    %265 = arith.subf %238, %264 : vector<8x128xf32>
    %266 = arith.mulf %258, %265 : vector<8x128xf32>
    %267 = arith.addf %264, %266 : vector<8x128xf32>
    %c56_76 = arith.constant 56 : index
    %c0_77 = arith.constant 0 : index
    %268 = vector.load %arg14[%c56_76, %c0_77] : memref<64x128xf32, #tpu.memory_space<vmem>>, vector<8x128xf32>
    tpu.vector_store %arg14[%c56_76, %c0_77], %267 {strides = array<i32>} : memref<64x128xf32, #tpu.memory_space<vmem>>, vector<8x128xf32>,
    %c1 = arith.constant 1 : index
    %c0_78 = arith.constant 0 : index
    %c0_79 = arith.constant 0 : index
    %269 = vector.load %arg4[%c1, %c0_78, %c0_79] : memref<2x128x384xbf16, #tpu.memory_space<vmem>>, vector<1x128x384xbf16>
    %270 = vector.shape_cast %269 : vector<1x128x384xbf16> to vector<128x384xbf16>
    %c0_80 = arith.constant 0 : index
    %c0_81 = arith.constant 0 : index
    %271 = vector.load %arg14[%c0_80, %c0_81] : memref<64x128xf32, #tpu.memory_space<vmem>>, vector<64x128xf32>
    %272 = arith.truncf %271 : vector<64x128xf32> to vector<64x128xbf16>
    %c1_82 = arith.constant 1 : index
    %c0_83 = arith.constant 0 : index
    %c0_84 = arith.constant 0 : index
    %273 = vector.load %arg3[%c1_82, %c0_83, %c0_84] : memref<2x128x384xbf16, #tpu.memory_space<vmem>>, vector<1x128x384xbf16>
    %274 = vector.shape_cast %273 : vector<1x128x384xbf16> to vector<128x384xbf16>
    %cst_85 = arith.constant dense<0.000000e+00> : vector<64x384xf32>
    %275 = tpu.matmul %272, %274, %cst_85 {dimension_numbers = #tpu.dot_dimension_numbers<[1], [0], [0], [1], [0, 0, 1, 1], [], []>} : vector<64x128xbf16>, vector<128x384xbf16>, vector<64x384xf32> -> vector<64x384xf32>
    %c1_86 = arith.constant 1 : index
    %c0_87 = arith.constant 0 : index
    %c0_88 = arith.constant 0 : index
    %276 = vector.load %arg5[%c1_86, %c0_87, %c0_88] : memref<2x1x384xf32, #tpu.memory_space<vmem>>, vector<1x1x384xf32>
    %277 = vector.shape_cast %276 : vector<1x1x384xf32> to vector<1x384xf32>
    %278 = vector.broadcast %277 : vector<1x384xf32> to vector<64x384xf32>
    %279 = arith.addf %275, %278 : vector<64x384xf32>
    %c0_89 = arith.constant 0 : index
    %c0_90 = arith.constant 0 : index
    %280 = vector.load %arg15[%c0_89, %c0_90] : memref<64x384xf32, #tpu.memory_space<vmem>>, vector<64x384xf32>
    tpu.vector_store %arg15[%c0_89, %c0_90], %279 {strides = array<i32>} : memref<64x384xf32, #tpu.memory_space<vmem>>, vector<64x384xf32>,
    %c1_91 = arith.constant 1 : index
    %c0_92 = arith.constant 0 : index
    %c0_93 = arith.constant 0 : index
    %281 = vector.load %arg6[%c1_91, %c0_92, %c0_93] : memref<2x1x128xf32, #tpu.memory_space<vmem>>, vector<1x1x128xf32>
    %282 = vector.shape_cast %281 : vector<1x1x128xf32> to vector<1x128xf32>
    %283 = vector.shape_cast %282 : vector<1x128xf32> to vector<1x128xf32>
    %284 = vector.broadcast %283 : vector<1x128xf32> to vector<8x128xf32>
    %cst_94 = arith.constant 0.000000e+00 : f32
    %285 = vector.broadcast %cst_94 : f32 to vector<8x128xf32>
    %c0_95 = arith.constant 0 : index
    %c0_96 = arith.constant 0 : index
    %286 = vector.load %arg15[%c0_95, %c0_96] : memref<64x384xf32, #tpu.memory_space<vmem>>, vector<8x384xf32>
    %287 = arith.truncf %285 : vector<8x128xf32> to vector<8x128xbf16>
    %cst_97 = arith.constant dense<0.000000e+00> : vector<8x384xf32>
    %288 = tpu.matmul %287, %270, %cst_97 {dimension_numbers = #tpu.dot_dimension_numbers<[1], [0], [0], [1], [0, 0, 1, 1], [], []>} : vector<8x128xbf16>, vector<128x384xbf16>, vector<8x384xf32> -> vector<8x384xf32>
    %289 = vector.extract_strided_slice %286 {offsets = [0, 0], sizes = [8, 128], strides = [1, 1]} : vector<8x384xf32> to vector<8x128xf32>
    %290 = vector.extract_strided_slice %288 {offsets = [0, 0], sizes = [8, 128], strides = [1, 1]} : vector<8x384xf32> to vector<8x128xf32>
    %291 = arith.addf %289, %290 : vector<8x128xf32>
    %292 = arith.negf %291 : vector<8x128xf32>
    %293 = math.exp %292 : vector<8x128xf32>
    %cst_98 = arith.constant 1.000000e+00 : f32
    %294 = vector.broadcast %cst_98 : f32 to vector<8x128xf32>
    %295 = arith.addf %294, %293 : vector<8x128xf32>
    %296 = arith.divf %294, %295 : vector<8x128xf32>
    %297 = vector.extract_strided_slice %286 {offsets = [0, 128], sizes = [8, 128], strides = [1, 1]} : vector<8x384xf32> to vector<8x128xf32>
    %298 = vector.extract_strided_slice %288 {offsets = [0, 128], sizes = [8, 128], strides = [1, 1]} : vector<8x384xf32> to vector<8x128xf32>
    %299 = arith.addf %297, %298 : vector<8x128xf32>
    %300 = arith.negf %299 : vector<8x128xf32>
    %301 = math.exp %300 : vector<8x128xf32>
    %cst_99 = arith.constant 1.000000e+00 : f32
    %302 = vector.broadcast %cst_99 : f32 to vector<8x128xf32>
    %303 = arith.addf %302, %301 : vector<8x128xf32>
    %304 = arith.divf %302, %303 : vector<8x128xf32>
    %305 = vector.extract_strided_slice %286 {offsets = [0, 256], sizes = [8, 128], strides = [1, 1]} : vector<8x384xf32> to vector<8x128xf32>
    %306 = vector.extract_strided_slice %288 {offsets = [0, 256], sizes = [8, 128], strides = [1, 1]} : vector<8x384xf32> to vector<8x128xf32>
    %307 = arith.addf %306, %284 : vector<8x128xf32>
    %308 = arith.mulf %296, %307 : vector<8x128xf32>
    %309 = arith.addf %305, %308 : vector<8x128xf32>
    %310 = math.tanh %309 : vector<8x128xf32>
    %311 = arith.subf %285, %310 : vector<8x128xf32>
    %312 = arith.mulf %304, %311 : vector<8x128xf32>
    %313 = arith.addf %310, %312 : vector<8x128xf32>
    %c0_100 = arith.constant 0 : index
    %c0_101 = arith.constant 0 : index
    %314 = vector.load %arg14[%c0_100, %c0_101] : memref<64x128xf32, #tpu.memory_space<vmem>>, vector<8x128xf32>
    tpu.vector_store %arg14[%c0_100, %c0_101], %313 {strides = array<i32>} : memref<64x128xf32, #tpu.memory_space<vmem>>, vector<8x128xf32>,
    %c8_102 = arith.constant 8 : index
    %c0_103 = arith.constant 0 : index
    %315 = vector.load %arg15[%c8_102, %c0_103] : memref<64x384xf32, #tpu.memory_space<vmem>>, vector<8x384xf32>
    %316 = arith.truncf %313 : vector<8x128xf32> to vector<8x128xbf16>
    %cst_104 = arith.constant dense<0.000000e+00> : vector<8x384xf32>
    %317 = tpu.matmul %316, %270, %cst_104 {dimension_numbers = #tpu.dot_dimension_numbers<[1], [0], [0], [1], [0, 0, 1, 1], [], []>} : vector<8x128xbf16>, vector<128x384xbf16>, vector<8x384xf32> -> vector<8x384xf32>
    %318 = vector.extract_strided_slice %315 {offsets = [0, 0], sizes = [8, 128], strides = [1, 1]} : vector<8x384xf32> to vector<8x128xf32>
    %319 = vector.extract_strided_slice %317 {offsets = [0, 0], sizes = [8, 128], strides = [1, 1]} : vector<8x384xf32> to vector<8x128xf32>
    %320 = arith.addf %318, %319 : vector<8x128xf32>
    %321 = arith.negf %320 : vector<8x128xf32>
    %322 = math.exp %321 : vector<8x128xf32>
    %cst_105 = arith.constant 1.000000e+00 : f32
    %323 = vector.broadcast %cst_105 : f32 to vector<8x128xf32>
    %324 = arith.addf %323, %322 : vector<8x128xf32>
    %325 = arith.divf %323, %324 : vector<8x128xf32>
    %326 = vector.extract_strided_slice %315 {offsets = [0, 128], sizes = [8, 128], strides = [1, 1]} : vector<8x384xf32> to vector<8x128xf32>
    %327 = vector.extract_strided_slice %317 {offsets = [0, 128], sizes = [8, 128], strides = [1, 1]} : vector<8x384xf32> to vector<8x128xf32>
    %328 = arith.addf %326, %327 : vector<8x128xf32>
    %329 = arith.negf %328 : vector<8x128xf32>
    %330 = math.exp %329 : vector<8x128xf32>
    %cst_106 = arith.constant 1.000000e+00 : f32
    %331 = vector.broadcast %cst_106 : f32 to vector<8x128xf32>
    %332 = arith.addf %331, %330 : vector<8x128xf32>
    %333 = arith.divf %331, %332 : vector<8x128xf32>
    %334 = vector.extract_strided_slice %315 {offsets = [0, 256], sizes = [8, 128], strides = [1, 1]} : vector<8x384xf32> to vector<8x128xf32>
    %335 = vector.extract_strided_slice %317 {offsets = [0, 256], sizes = [8, 128], strides = [1, 1]} : vector<8x384xf32> to vector<8x128xf32>
    %336 = arith.addf %335, %284 : vector<8x128xf32>
    %337 = arith.mulf %325, %336 : vector<8x128xf32>
    %338 = arith.addf %334, %337 : vector<8x128xf32>
    %339 = math.tanh %338 : vector<8x128xf32>
    %340 = arith.subf %313, %339 : vector<8x128xf32>
    %341 = arith.mulf %333, %340 : vector<8x128xf32>
    %342 = arith.addf %339, %341 : vector<8x128xf32>
    %c8_107 = arith.constant 8 : index
    %c0_108 = arith.constant 0 : index
    %343 = vector.load %arg14[%c8_107, %c0_108] : memref<64x128xf32, #tpu.memory_space<vmem>>, vector<8x128xf32>
    tpu.vector_store %arg14[%c8_107, %c0_108], %342 {strides = array<i32>} : memref<64x128xf32, #tpu.memory_space<vmem>>, vector<8x128xf32>,
    %c16_109 = arith.constant 16 : index
    %c0_110 = arith.constant 0 : index
    %344 = vector.load %arg15[%c16_109, %c0_110] : memref<64x384xf32, #tpu.memory_space<vmem>>, vector<8x384xf32>
    %345 = arith.truncf %342 : vector<8x128xf32> to vector<8x128xbf16>
    %cst_111 = arith.constant dense<0.000000e+00> : vector<8x384xf32>
    %346 = tpu.matmul %345, %270, %cst_111 {dimension_numbers = #tpu.dot_dimension_numbers<[1], [0], [0], [1], [0, 0, 1, 1], [], []>} : vector<8x128xbf16>, vector<128x384xbf16>, vector<8x384xf32> -> vector<8x384xf32>
    %347 = vector.extract_strided_slice %344 {offsets = [0, 0], sizes = [8, 128], strides = [1, 1]} : vector<8x384xf32> to vector<8x128xf32>
    %348 = vector.extract_strided_slice %346 {offsets = [0, 0], sizes = [8, 128], strides = [1, 1]} : vector<8x384xf32> to vector<8x128xf32>
    %349 = arith.addf %347, %348 : vector<8x128xf32>
    %350 = arith.negf %349 : vector<8x128xf32>
    %351 = math.exp %350 : vector<8x128xf32>
    %cst_112 = arith.constant 1.000000e+00 : f32
    %352 = vector.broadcast %cst_112 : f32 to vector<8x128xf32>
    %353 = arith.addf %352, %351 : vector<8x128xf32>
    %354 = arith.divf %352, %353 : vector<8x128xf32>
    %355 = vector.extract_strided_slice %344 {offsets = [0, 128], sizes = [8, 128], strides = [1, 1]} : vector<8x384xf32> to vector<8x128xf32>
    %356 = vector.extract_strided_slice %346 {offsets = [0, 128], sizes = [8, 128], strides = [1, 1]} : vector<8x384xf32> to vector<8x128xf32>
    %357 = arith.addf %355, %356 : vector<8x128xf32>
    %358 = arith.negf %357 : vector<8x128xf32>
    %359 = math.exp %358 : vector<8x128xf32>
    %cst_113 = arith.constant 1.000000e+00 : f32
    %360 = vector.broadcast %cst_113 : f32 to vector<8x128xf32>
    %361 = arith.addf %360, %359 : vector<8x128xf32>
    %362 = arith.divf %360, %361 : vector<8x128xf32>
    %363 = vector.extract_strided_slice %344 {offsets = [0, 256], sizes = [8, 128], strides = [1, 1]} : vector<8x384xf32> to vector<8x128xf32>
    %364 = vector.extract_strided_slice %346 {offsets = [0, 256], sizes = [8, 128], strides = [1, 1]} : vector<8x384xf32> to vector<8x128xf32>
    %365 = arith.addf %364, %284 : vector<8x128xf32>
    %366 = arith.mulf %354, %365 : vector<8x128xf32>
    %367 = arith.addf %363, %366 : vector<8x128xf32>
    %368 = math.tanh %367 : vector<8x128xf32>
    %369 = arith.subf %342, %368 : vector<8x128xf32>
    %370 = arith.mulf %362, %369 : vector<8x128xf32>
    %371 = arith.addf %368, %370 : vector<8x128xf32>
    %c16_114 = arith.constant 16 : index
    %c0_115 = arith.constant 0 : index
    %372 = vector.load %arg14[%c16_114, %c0_115] : memref<64x128xf32, #tpu.memory_space<vmem>>, vector<8x128xf32>
    tpu.vector_store %arg14[%c16_114, %c0_115], %371 {strides = array<i32>} : memref<64x128xf32, #tpu.memory_space<vmem>>, vector<8x128xf32>,
    %c24_116 = arith.constant 24 : index
    %c0_117 = arith.constant 0 : index
    %373 = vector.load %arg15[%c24_116, %c0_117] : memref<64x384xf32, #tpu.memory_space<vmem>>, vector<8x384xf32>
    %374 = arith.truncf %371 : vector<8x128xf32> to vector<8x128xbf16>
    %cst_118 = arith.constant dense<0.000000e+00> : vector<8x384xf32>
    %375 = tpu.matmul %374, %270, %cst_118 {dimension_numbers = #tpu.dot_dimension_numbers<[1], [0], [0], [1], [0, 0, 1, 1], [], []>} : vector<8x128xbf16>, vector<128x384xbf16>, vector<8x384xf32> -> vector<8x384xf32>
    %376 = vector.extract_strided_slice %373 {offsets = [0, 0], sizes = [8, 128], strides = [1, 1]} : vector<8x384xf32> to vector<8x128xf32>
    %377 = vector.extract_strided_slice %375 {offsets = [0, 0], sizes = [8, 128], strides = [1, 1]} : vector<8x384xf32> to vector<8x128xf32>
    %378 = arith.addf %376, %377 : vector<8x128xf32>
    %379 = arith.negf %378 : vector<8x128xf32>
    %380 = math.exp %379 : vector<8x128xf32>
    %cst_119 = arith.constant 1.000000e+00 : f32
    %381 = vector.broadcast %cst_119 : f32 to vector<8x128xf32>
    %382 = arith.addf %381, %380 : vector<8x128xf32>
    %383 = arith.divf %381, %382 : vector<8x128xf32>
    %384 = vector.extract_strided_slice %373 {offsets = [0, 128], sizes = [8, 128], strides = [1, 1]} : vector<8x384xf32> to vector<8x128xf32>
    %385 = vector.extract_strided_slice %375 {offsets = [0, 128], sizes = [8, 128], strides = [1, 1]} : vector<8x384xf32> to vector<8x128xf32>
    %386 = arith.addf %384, %385 : vector<8x128xf32>
    %387 = arith.negf %386 : vector<8x128xf32>
    %388 = math.exp %387 : vector<8x128xf32>
    %cst_120 = arith.constant 1.000000e+00 : f32
    %389 = vector.broadcast %cst_120 : f32 to vector<8x128xf32>
    %390 = arith.addf %389, %388 : vector<8x128xf32>
    %391 = arith.divf %389, %390 : vector<8x128xf32>
    %392 = vector.extract_strided_slice %373 {offsets = [0, 256], sizes = [8, 128], strides = [1, 1]} : vector<8x384xf32> to vector<8x128xf32>
    %393 = vector.extract_strided_slice %375 {offsets = [0, 256], sizes = [8, 128], strides = [1, 1]} : vector<8x384xf32> to vector<8x128xf32>
    %394 = arith.addf %393, %284 : vector<8x128xf32>
    %395 = arith.mulf %383, %394 : vector<8x128xf32>
    %396 = arith.addf %392, %395 : vector<8x128xf32>
    %397 = math.tanh %396 : vector<8x128xf32>
    %398 = arith.subf %371, %397 : vector<8x128xf32>
    %399 = arith.mulf %391, %398 : vector<8x128xf32>
    %400 = arith.addf %397, %399 : vector<8x128xf32>
    %c24_121 = arith.constant 24 : index
    %c0_122 = arith.constant 0 : index
    %401 = vector.load %arg14[%c24_121, %c0_122] : memref<64x128xf32, #tpu.memory_space<vmem>>, vector<8x128xf32>
    tpu.vector_store %arg14[%c24_121, %c0_122], %400 {strides = array<i32>} : memref<64x128xf32, #tpu.memory_space<vmem>>, vector<8x128xf32>,
    %c32_123 = arith.constant 32 : index
    %c0_124 = arith.constant 0 : index
    %402 = vector.load %arg15[%c32_123, %c0_124] : memref<64x384xf32, #tpu.memory_space<vmem>>, vector<8x384xf32>
    %403 = arith.truncf %400 : vector<8x128xf32> to vector<8x128xbf16>
    %cst_125 = arith.constant dense<0.000000e+00> : vector<8x384xf32>
    %404 = tpu.matmul %403, %270, %cst_125 {dimension_numbers = #tpu.dot_dimension_numbers<[1], [0], [0], [1], [0, 0, 1, 1], [], []>} : vector<8x128xbf16>, vector<128x384xbf16>, vector<8x384xf32> -> vector<8x384xf32>
    %405 = vector.extract_strided_slice %402 {offsets = [0, 0], sizes = [8, 128], strides = [1, 1]} : vector<8x384xf32> to vector<8x128xf32>
    %406 = vector.extract_strided_slice %404 {offsets = [0, 0], sizes = [8, 128], strides = [1, 1]} : vector<8x384xf32> to vector<8x128xf32>
    %407 = arith.addf %405, %406 : vector<8x128xf32>
    %408 = arith.negf %407 : vector<8x128xf32>
    %409 = math.exp %408 : vector<8x128xf32>
    %cst_126 = arith.constant 1.000000e+00 : f32
    %410 = vector.broadcast %cst_126 : f32 to vector<8x128xf32>
    %411 = arith.addf %410, %409 : vector<8x128xf32>
    %412 = arith.divf %410, %411 : vector<8x128xf32>
    %413 = vector.extract_strided_slice %402 {offsets = [0, 128], sizes = [8, 128], strides = [1, 1]} : vector<8x384xf32> to vector<8x128xf32>
    %414 = vector.extract_strided_slice %404 {offsets = [0, 128], sizes = [8, 128], strides = [1, 1]} : vector<8x384xf32> to vector<8x128xf32>
    %415 = arith.addf %413, %414 : vector<8x128xf32>
    %416 = arith.negf %415 : vector<8x128xf32>
    %417 = math.exp %416 : vector<8x128xf32>
    %cst_127 = arith.constant 1.000000e+00 : f32
    %418 = vector.broadcast %cst_127 : f32 to vector<8x128xf32>
    %419 = arith.addf %418, %417 : vector<8x128xf32>
    %420 = arith.divf %418, %419 : vector<8x128xf32>
    %421 = vector.extract_strided_slice %402 {offsets = [0, 256], sizes = [8, 128], strides = [1, 1]} : vector<8x384xf32> to vector<8x128xf32>
    %422 = vector.extract_strided_slice %404 {offsets = [0, 256], sizes = [8, 128], strides = [1, 1]} : vector<8x384xf32> to vector<8x128xf32>
    %423 = arith.addf %422, %284 : vector<8x128xf32>
    %424 = arith.mulf %412, %423 : vector<8x128xf32>
    %425 = arith.addf %421, %424 : vector<8x128xf32>
    %426 = math.tanh %425 : vector<8x128xf32>
    %427 = arith.subf %400, %426 : vector<8x128xf32>
    %428 = arith.mulf %420, %427 : vector<8x128xf32>
    %429 = arith.addf %426, %428 : vector<8x128xf32>
    %c32_128 = arith.constant 32 : index
    %c0_129 = arith.constant 0 : index
    %430 = vector.load %arg14[%c32_128, %c0_129] : memref<64x128xf32, #tpu.memory_space<vmem>>, vector<8x128xf32>
    tpu.vector_store %arg14[%c32_128, %c0_129], %429 {strides = array<i32>} : memref<64x128xf32, #tpu.memory_space<vmem>>, vector<8x128xf32>,
    %c40_130 = arith.constant 40 : index
    %c0_131 = arith.constant 0 : index
    %431 = vector.load %arg15[%c40_130, %c0_131] : memref<64x384xf32, #tpu.memory_space<vmem>>, vector<8x384xf32>
    %432 = arith.truncf %429 : vector<8x128xf32> to vector<8x128xbf16>
    %cst_132 = arith.constant dense<0.000000e+00> : vector<8x384xf32>
    %433 = tpu.matmul %432, %270, %cst_132 {dimension_numbers = #tpu.dot_dimension_numbers<[1], [0], [0], [1], [0, 0, 1, 1], [], []>} : vector<8x128xbf16>, vector<128x384xbf16>, vector<8x384xf32> -> vector<8x384xf32>
    %434 = vector.extract_strided_slice %431 {offsets = [0, 0], sizes = [8, 128], strides = [1, 1]} : vector<8x384xf32> to vector<8x128xf32>
    %435 = vector.extract_strided_slice %433 {offsets = [0, 0], sizes = [8, 128], strides = [1, 1]} : vector<8x384xf32> to vector<8x128xf32>
    %436 = arith.addf %434, %435 : vector<8x128xf32>
    %437 = arith.negf %436 : vector<8x128xf32>
    %438 = math.exp %437 : vector<8x128xf32>
    %cst_133 = arith.constant 1.000000e+00 : f32
    %439 = vector.broadcast %cst_133 : f32 to vector<8x128xf32>
    %440 = arith.addf %439, %438 : vector<8x128xf32>
    %441 = arith.divf %439, %440 : vector<8x128xf32>
    %442 = vector.extract_strided_slice %431 {offsets = [0, 128], sizes = [8, 128], strides = [1, 1]} : vector<8x384xf32> to vector<8x128xf32>
    %443 = vector.extract_strided_slice %433 {offsets = [0, 128], sizes = [8, 128], strides = [1, 1]} : vector<8x384xf32> to vector<8x128xf32>
    %444 = arith.addf %442, %443 : vector<8x128xf32>
    %445 = arith.negf %444 : vector<8x128xf32>
    %446 = math.exp %445 : vector<8x128xf32>
    %cst_134 = arith.constant 1.000000e+00 : f32
    %447 = vector.broadcast %cst_134 : f32 to vector<8x128xf32>
    %448 = arith.addf %447, %446 : vector<8x128xf32>
    %449 = arith.divf %447, %448 : vector<8x128xf32>
    %450 = vector.extract_strided_slice %431 {offsets = [0, 256], sizes = [8, 128], strides = [1, 1]} : vector<8x384xf32> to vector<8x128xf32>
    %451 = vector.extract_strided_slice %433 {offsets = [0, 256], sizes = [8, 128], strides = [1, 1]} : vector<8x384xf32> to vector<8x128xf32>
    %452 = arith.addf %451, %284 : vector<8x128xf32>
    %453 = arith.mulf %441, %452 : vector<8x128xf32>
    %454 = arith.addf %450, %453 : vector<8x128xf32>
    %455 = math.tanh %454 : vector<8x128xf32>
    %456 = arith.subf %429, %455 : vector<8x128xf32>
    %457 = arith.mulf %449, %456 : vector<8x128xf32>
    %458 = arith.addf %455, %457 : vector<8x128xf32>
    %c40_135 = arith.constant 40 : index
    %c0_136 = arith.constant 0 : index
    %459 = vector.load %arg14[%c40_135, %c0_136] : memref<64x128xf32, #tpu.memory_space<vmem>>, vector<8x128xf32>
    tpu.vector_store %arg14[%c40_135, %c0_136], %458 {strides = array<i32>} : memref<64x128xf32, #tpu.memory_space<vmem>>, vector<8x128xf32>,
    %c48_137 = arith.constant 48 : index
    %c0_138 = arith.constant 0 : index
    %460 = vector.load %arg15[%c48_137, %c0_138] : memref<64x384xf32, #tpu.memory_space<vmem>>, vector<8x384xf32>
    %461 = arith.truncf %458 : vector<8x128xf32> to vector<8x128xbf16>
    %cst_139 = arith.constant dense<0.000000e+00> : vector<8x384xf32>
    %462 = tpu.matmul %461, %270, %cst_139 {dimension_numbers = #tpu.dot_dimension_numbers<[1], [0], [0], [1], [0, 0, 1, 1], [], []>} : vector<8x128xbf16>, vector<128x384xbf16>, vector<8x384xf32> -> vector<8x384xf32>
    %463 = vector.extract_strided_slice %460 {offsets = [0, 0], sizes = [8, 128], strides = [1, 1]} : vector<8x384xf32> to vector<8x128xf32>
    %464 = vector.extract_strided_slice %462 {offsets = [0, 0], sizes = [8, 128], strides = [1, 1]} : vector<8x384xf32> to vector<8x128xf32>
    %465 = arith.addf %463, %464 : vector<8x128xf32>
    %466 = arith.negf %465 : vector<8x128xf32>
    %467 = math.exp %466 : vector<8x128xf32>
    %cst_140 = arith.constant 1.000000e+00 : f32
    %468 = vector.broadcast %cst_140 : f32 to vector<8x128xf32>
    %469 = arith.addf %468, %467 : vector<8x128xf32>
    %470 = arith.divf %468, %469 : vector<8x128xf32>
    %471 = vector.extract_strided_slice %460 {offsets = [0, 128], sizes = [8, 128], strides = [1, 1]} : vector<8x384xf32> to vector<8x128xf32>
    %472 = vector.extract_strided_slice %462 {offsets = [0, 128], sizes = [8, 128], strides = [1, 1]} : vector<8x384xf32> to vector<8x128xf32>
    %473 = arith.addf %471, %472 : vector<8x128xf32>
    %474 = arith.negf %473 : vector<8x128xf32>
    %475 = math.exp %474 : vector<8x128xf32>
    %cst_141 = arith.constant 1.000000e+00 : f32
    %476 = vector.broadcast %cst_141 : f32 to vector<8x128xf32>
    %477 = arith.addf %476, %475 : vector<8x128xf32>
    %478 = arith.divf %476, %477 : vector<8x128xf32>
    %479 = vector.extract_strided_slice %460 {offsets = [0, 256], sizes = [8, 128], strides = [1, 1]} : vector<8x384xf32> to vector<8x128xf32>
    %480 = vector.extract_strided_slice %462 {offsets = [0, 256], sizes = [8, 128], strides = [1, 1]} : vector<8x384xf32> to vector<8x128xf32>
    %481 = arith.addf %480, %284 : vector<8x128xf32>
    %482 = arith.mulf %470, %481 : vector<8x128xf32>
    %483 = arith.addf %479, %482 : vector<8x128xf32>
    %484 = math.tanh %483 : vector<8x128xf32>
    %485 = arith.subf %458, %484 : vector<8x128xf32>
    %486 = arith.mulf %478, %485 : vector<8x128xf32>
    %487 = arith.addf %484, %486 : vector<8x128xf32>
    %c48_142 = arith.constant 48 : index
    %c0_143 = arith.constant 0 : index
    %488 = vector.load %arg14[%c48_142, %c0_143] : memref<64x128xf32, #tpu.memory_space<vmem>>, vector<8x128xf32>
    tpu.vector_store %arg14[%c48_142, %c0_143], %487 {strides = array<i32>} : memref<64x128xf32, #tpu.memory_space<vmem>>, vector<8x128xf32>,
    %c56_144 = arith.constant 56 : index
    %c0_145 = arith.constant 0 : index
    %489 = vector.load %arg15[%c56_144, %c0_145] : memref<64x384xf32, #tpu.memory_space<vmem>>, vector<8x384xf32>
    %490 = arith.truncf %487 : vector<8x128xf32> to vector<8x128xbf16>
    %cst_146 = arith.constant dense<0.000000e+00> : vector<8x384xf32>
    %491 = tpu.matmul %490, %270, %cst_146 {dimension_numbers = #tpu.dot_dimension_numbers<[1], [0], [0], [1], [0, 0, 1, 1], [], []>} : vector<8x128xbf16>, vector<128x384xbf16>, vector<8x384xf32> -> vector<8x384xf32>
    %492 = vector.extract_strided_slice %489 {offsets = [0, 0], sizes = [8, 128], strides = [1, 1]} : vector<8x384xf32> to vector<8x128xf32>
    %493 = vector.extract_strided_slice %491 {offsets = [0, 0], sizes = [8, 128], strides = [1, 1]} : vector<8x384xf32> to vector<8x128xf32>
    %494 = arith.addf %492, %493 : vector<8x128xf32>
    %495 = arith.negf %494 : vector<8x128xf32>
    %496 = math.exp %495 : vector<8x128xf32>
    %cst_147 = arith.constant 1.000000e+00 : f32
    %497 = vector.broadcast %cst_147 : f32 to vector<8x128xf32>
    %498 = arith.addf %497, %496 : vector<8x128xf32>
    %499 = arith.divf %497, %498 : vector<8x128xf32>
    %500 = vector.extract_strided_slice %489 {offsets = [0, 128], sizes = [8, 128], strides = [1, 1]} : vector<8x384xf32> to vector<8x128xf32>
    %501 = vector.extract_strided_slice %491 {offsets = [0, 128], sizes = [8, 128], strides = [1, 1]} : vector<8x384xf32> to vector<8x128xf32>
    %502 = arith.addf %500, %501 : vector<8x128xf32>
    %503 = arith.negf %502 : vector<8x128xf32>
    %504 = math.exp %503 : vector<8x128xf32>
    %cst_148 = arith.constant 1.000000e+00 : f32
    %505 = vector.broadcast %cst_148 : f32 to vector<8x128xf32>
    %506 = arith.addf %505, %504 : vector<8x128xf32>
    %507 = arith.divf %505, %506 : vector<8x128xf32>
    %508 = vector.extract_strided_slice %489 {offsets = [0, 256], sizes = [8, 128], strides = [1, 1]} : vector<8x384xf32> to vector<8x128xf32>
    %509 = vector.extract_strided_slice %491 {offsets = [0, 256], sizes = [8, 128], strides = [1, 1]} : vector<8x384xf32> to vector<8x128xf32>
    %510 = arith.addf %509, %284 : vector<8x128xf32>
    %511 = arith.mulf %499, %510 : vector<8x128xf32>
    %512 = arith.addf %508, %511 : vector<8x128xf32>
    %513 = math.tanh %512 : vector<8x128xf32>
    %514 = arith.subf %487, %513 : vector<8x128xf32>
    %515 = arith.mulf %507, %514 : vector<8x128xf32>
    %516 = arith.addf %513, %515 : vector<8x128xf32>
    %c56_149 = arith.constant 56 : index
    %c0_150 = arith.constant 0 : index
    %517 = vector.load %arg14[%c56_149, %c0_150] : memref<64x128xf32, #tpu.memory_space<vmem>>, vector<8x128xf32>
    tpu.vector_store %arg14[%c56_149, %c0_150], %516 {strides = array<i32>} : memref<64x128xf32, #tpu.memory_space<vmem>>, vector<8x128xf32>,
    %c0_151 = arith.constant 0 : index
    %c0_152 = arith.constant 0 : index
    %518 = vector.load %arg14[%c0_151, %c0_152] : memref<64x128xf32, #tpu.memory_space<vmem>>, vector<64x128xf32>
    %cst_153 = arith.constant 5.000000e-01 : f32
    %519 = vector.broadcast %cst_153 : f32 to vector<64x128xf32>
    %520 = arith.mulf %519, %518 : vector<64x128xf32>
    %cst_154 = arith.constant 4.471500e-02 : f32
    %521 = vector.broadcast %cst_154 : f32 to vector<64x128xf32>
    %522 = arith.mulf %521, %518 : vector<64x128xf32>
    %523 = arith.mulf %522, %518 : vector<64x128xf32>
    %524 = arith.mulf %523, %518 : vector<64x128xf32>
    %525 = arith.addf %518, %524 : vector<64x128xf32>
    %cst_155 = arith.constant 0.797884583 : f32
    %526 = vector.broadcast %cst_155 : f32 to vector<64x128xf32>
    %527 = arith.mulf %526, %525 : vector<64x128xf32>
    %528 = math.tanh %527 : vector<64x128xf32>
    %cst_156 = arith.constant 1.000000e+00 : f32
    %529 = vector.broadcast %cst_156 : f32 to vector<64x128xf32>
    %530 = arith.addf %529, %528 : vector<64x128xf32>
    %531 = arith.mulf %520, %530 : vector<64x128xf32>
    %532 = arith.truncf %531 : vector<64x128xf32> to vector<64x128xbf16>
    %c0_157 = arith.constant 0 : index
    %c0_158 = arith.constant 0 : index
    %533 = vector.load %arg7[%c0_157, %c0_158] : memref<128x32xbf16, #tpu.memory_space<vmem>>, vector<128x32xbf16>
    %cst_159 = arith.constant dense<0.000000e+00> : vector<64x32xf32>
    %534 = tpu.matmul %532, %533, %cst_159 {dimension_numbers = #tpu.dot_dimension_numbers<[1], [0], [0], [1], [0, 0, 1, 1], [], []>} : vector<64x128xbf16>, vector<128x32xbf16>, vector<64x32xf32> -> vector<64x32xf32>
    %c0_160 = arith.constant 0 : index
    %c0_161 = arith.constant 0 : index
    %535 = vector.load %arg8[%c0_160, %c0_161] : memref<1x32xf32, #tpu.memory_space<vmem>>, vector<1x32xf32>
    %536 = vector.broadcast %535 : vector<1x32xf32> to vector<64x32xf32>
    %537 = arith.addf %534, %536 : vector<64x32xf32>
    %c0_162 = arith.constant 0 : index
    %c0_163 = arith.constant 0 : index
    %538 = vector.load %arg9[%c0_162, %c0_163] : memref<32x32xf32, #tpu.memory_space<vmem>>, vector<32x32xf32>
    %cst_164 = arith.constant dense<0.000000e+00> : vector<64x32xf32>
    %539 = tpu.matmul %537, %538, %cst_164 {dimension_numbers = #tpu.dot_dimension_numbers<[1], [0], [0], [1], [0, 0, 1, 1], [], []>} : vector<64x32xf32>, vector<32x32xf32>, vector<64x32xf32> -> vector<64x32xf32>
    %c0_165 = arith.constant 0 : index
    %c0_166 = arith.constant 0 : index
    %540 = vector.load %arg10[%c0_165, %c0_166] : memref<1x32xf32, #tpu.memory_space<vmem>>, vector<1x32xf32>
    %541 = vector.broadcast %540 : vector<1x32xf32> to vector<64x32xf32>
    %542 = arith.addf %539, %541 : vector<64x32xf32>
    %543 = tpu.reciprocal %542 {approx = true} : vector<64x32xf32> -> vector<64x32xf32>
    %544 = arith.mulf %537, %543 : vector<64x32xf32>
    %c0_167 = arith.constant 0 : index
    %c0_168 = arith.constant 0 : index
    %545 = vector.load %arg11[%c0_167, %c0_168] : memref<32x128xf32, #tpu.memory_space<vmem>>, vector<32x128xf32>
    %cst_169 = arith.constant dense<0.000000e+00> : vector<64x128xf32>
    %546 = tpu.matmul %544, %545, %cst_169 {dimension_numbers = #tpu.dot_dimension_numbers<[1], [0], [0], [1], [0, 0, 1, 1], [], []>} : vector<64x32xf32>, vector<32x128xf32>, vector<64x128xf32> -> vector<64x128xf32>
    %c0_170 = arith.constant 0 : index
    %c0_171 = arith.constant 0 : index
    %547 = vector.load %arg12[%c0_170, %c0_171] : memref<32x128xf32, #tpu.memory_space<vmem>>, vector<32x128xf32>
    %cst_172 = arith.constant dense<0.000000e+00> : vector<64x128xf32>
    %548 = tpu.matmul %537, %547, %cst_172 {dimension_numbers = #tpu.dot_dimension_numbers<[1], [0], [0], [1], [0, 0, 1, 1], [], []>} : vector<64x32xf32>, vector<32x128xf32>, vector<64x128xf32> -> vector<64x128xf32>
    %549 = arith.addf %546, %548 : vector<64x128xf32>
    %c0_173 = arith.constant 0 : index
    %c0_174 = arith.constant 0 : index
    %550 = vector.load %arg13[%c0_173, %c0_174] : memref<64x128xf32, #tpu.memory_space<vmem>>, vector<64x128xf32>
    tpu.vector_store %arg13[%c0_173, %c0_174], %549 {strides = array<i32>} : memref<64x128xf32, #tpu.memory_space<vmem>>, vector<64x128xf32>,
    return
  }
}

</mosaic_0001>

<bundles_post_ra>
// kernel: latent_noise_reactor_forward.3
= control target key start
LH: loop header
LB: loop body
LE: loop exit
PB: predicated region body
PF: predicated region fallthrough
CT: control target
= control target key end

     0   :  { %18 = vsyncpa [#allocation5], 0  ;;  %s5055_s0 = inlined_call_operand.vmem [shape: bf16[64,16], index: 0, kind: input, shape index: {}]   ;;  %s5056_s1 = inlined_call_operand.vmem [shape: bf16[16,128], index: 1, kind: input, shape index: {}]   ;;  %s5057_s2 = inlined_call_operand.vmem [shape: f32[1,128], index: 2, kind: input, shape index: {}]   ;;  %s5058_s3 = inlined_call_operand.hbm [shape: bf16[2,128,384], index: 3, kind: input, shape index: {}]   ;;  %s5059_s4 = inlined_call_operand.hbm [shape: bf16[2,128,384], index: 4, kind: input, shape index: {}]   ;;  %s5060_s5 = inlined_call_operand.vmem [shape: f32[2,1,384], index: 5, kind: input, shape index: {}]   ;;  %s5061_s6 = inlined_call_operand.vmem [shape: f32[2,1,128], index: 6, kind: input, shape index: {}]   ;;  %s5062_s7 = inlined_call_operand.vmem [shape: bf16[128,32], index: 7, kind: input, shape index: {}]   ;;  %s5063_s8 = inlined_call_operand.vmem [shape: f32[1,32], index: 8, kind: input, shape index: {}]   ;;  %s5064_s9 = inlined_call_operand.vmem [shape: f32[32,32], index: 9, kind: input, shape index: {}]   ;;  %s5065_s10 = inlined_call_operand.vmem [shape: f32[1,32], index: 10, kind: input, shape index: {}]   ;;  %s5066_s11 = inlined_call_operand.vmem [shape: f32[32,128], index: 11, kind: input, shape index: {}]   ;;  %s5067_s12 = inlined_call_operand.vmem [shape: f32[32,128], index: 12, kind: input, shape index: {}]   ;;  %s5068_s13 = inlined_call_operand.vmem [shape: f32[64,128], index: 13, kind: output, shape index: {}]  }
   0x1   :  { %s30_s27 = sshll.u32 %s5058_s3, 4  ;;  %s31_s27 = int_to_ptr.hbm [resolvable:$true] %s30_s27 }
   0x2   :  { %19 = vsyncpa [#allocation7], 0  ;;  %s3889_s28 = smov [#allocation4]   ;;  %s43_s15 = sshll.u32 %s5059_s4, 4  ;;  %s44_s15 = int_to_ptr.hbm [resolvable:$true] %s43_s15 }
   0x3   :  { %s32_s29 = sshll.u32 %s3889_s28, 4  ;;  %s3890_s16 = smov 192   ;;  %s33_s29 = int_to_ptr.vmem [resolvable:$true] %s32_s29 }
   0x4   :  { %s3891_s17 = smov 12   ;;  %s3892_s18 = smov [#allocation6]  }
   0x5   :  { %38 = dma.hbm_to_vmem [thread:$0]  %s31_s27, 6144, %s33_s29, [#allocation5], %s3890_s16, %s3890_s16, %s3891_s17  }
   0x6   :  { %s45_s19 = sshll.u32 %s3892_s18, 4  ;;  %s46_s19 = int_to_ptr.vmem [resolvable:$true] %s45_s19 }
   0x7   :  { %51 = dma.hbm_to_vmem [thread:$0]  %s44_s15, 6144, %s46_s19, [#allocation7], %s3890_s16, %s3890_s16, %s3891_s17  }
   0x8   :  { %3885 = dma.done.wait [#allocation5], 6144  }
   0x9   :  { %3886 = vsyncadd [#allocation5], 4294961152 }
   0xa   :  { %3887 = dma.done.wait [#allocation7], 6144  }
   0xb   :  { %3888 = vsyncadd [#allocation7], 4294961152  ;;  %v3508_v0 = vld [vmem:[%s5056_s1] sm:$0xff]  ;;  %vm117_vm0 = vcmask 130048   ;;  %v3505_v2 = vld [vmem:[%s5055_s0 + $0x8] sm:$0xff] }
   0xc   :  { %v3504_v1 = vld [vmem:[%s5055_s0] sm:$0xff]  ;;  %137 = vmatpush.bf16.msra.mxu0 %v3508_v0  ;;  %v3506_v3 = vld [vmem:[%s5055_s0 + $0x10] sm:$0xff]  ;;  %v3507_v4 = vld [vmem:[%s5055_s0 + $0x18] sm:$0xff] }
   0xd   :  { %v3116_v5 = vld [vmem:[#allocation4 + $0xa8] sm:$0xf]  ;;  %v3555_v6 = vld [vmem:[#allocation4 + $0xb0] sm:$0xf0]  ;;  %v3554_v7 = vld [vmem:[#allocation4 + $0xac] sm:$0xf] }
   0xe   :  { %v3117_v8 = vor.u32 %v3555_v6, %v3116_v5  ;;  %v3118_v9 = vld [vmem:[#allocation4 + $0xb4] sm:$0xf0]  ;;  %v3124_v10 = vld [vmem:[#allocation4 + $0xb0] sm:$0xf]  ;;  %v3556_v11 = vld [vmem:[#allocation4 + $0xb8] sm:$0xf0] }
   0xf   :  { %3026 = vmatmul.msk.bf16.vlgmr.msra.gmra.mxu0 %vm117_vm0, %v3504_v1  ;;  %v3121_v12 = vor.u32 %v3554_v7, %v3118_v9  ;;  %v3125_v13 = vor.u32 %v3556_v11, %v3124_v10  ;;  %v3212_v14 = vld [vmem:[#allocation6 + $0xa8] sm:$0xf]  ;;  %v3531_v15 = vld [vmem:[#allocation6 + $0xb0] sm:$0xf0]  ;;  %v3104_v17 = vld [vmem:[#allocation4 + $0x90] sm:$0xf] }
  0x10   :  { %451 = vmatpush.bf16.msra.mxu1 %v3117_v8  ;;  %v3985_v16 = vor.u32 %v3531_v15, %v3212_v14  ;;  %v3552_v18 = vld [vmem:[#allocation4 + $0x98] sm:$0xf0]  ;;  %v3551_v19 = vld [vmem:[#allocation4 + $0x94] sm:$0xf]  ;;  %v3106_v21 = vld [vmem:[#allocation4 + $0x9c] sm:$0xf0] }
  0x11   :  { %480 = vmatpush.bf16.msra.mxu2 %v3121_v12  ;;  %509 = vmatpush.bf16.msra.mxu3 %v3125_v13  ;;  %v3105_v20 = vor.u32 %v3552_v18, %v3104_v17  ;;  %v3112_v22 = vld [vmem:[#allocation4 + $0x98] sm:$0xf]  ;;  %v3553_v23 = vld [vmem:[#allocation4 + $0xa0] sm:$0xf0]  ;;  %v3109_v24 = vor.u32 %v3551_v19, %v3106_v21  ;;  %v3200_v26 = vld [vmem:[#allocation6 + $0x90] sm:$0xf] }
  0x12   :  { %697 = vmatpush.bf16.msrb.mxu0 %v3985_v16  ;;  %v3113_v25 = vor.u32 %v3553_v23, %v3112_v22  ;;  %v3528_v27 = vld [vmem:[#allocation6 + $0x98] sm:$0xf0]  ;;  %v3092_v29 = vld [vmem:[#allocation4 + $0x78] sm:$0xf]  ;;  %v3549_v30 = vld [vmem:[#allocation4 + $0x80] sm:$0xf0] }
  0x13   :  { %v3988_v28 = vor.u32 %v3528_v27, %v3200_v26  ;;  %v3548_v31 = vld [vmem:[#allocation4 + $0x7c] sm:$0xf]  ;;  %v3093_v32 = vor.u32 %v3549_v30, %v3092_v29  ;;  %v3094_v33 = vld [vmem:[#allocation4 + $0x84] sm:$0xf0]  ;;  %v3100_v34 = vld [vmem:[#allocation4 + $0x80] sm:$0xf] }
  0x14   :  { %452 = vmatpush.bf16.msra.mxu1 %v3105_v20  ;;  %v3550_v35 = vld [vmem:[#allocation4 + $0x88] sm:$0xf0]  ;;  %v3097_v36 = vor.u32 %v3548_v31, %v3094_v33  ;;  %v3188_v38 = vld [vmem:[#allocation6 + $0x78] sm:$0xf]  ;;  %v3525_v39 = vld [vmem:[#allocation6 + $0x80] sm:$0xf0] }
  0x15   :  { %481 = vmatpush.bf16.msra.mxu2 %v3109_v24  ;;  %510 = vmatpush.bf16.msra.mxu3 %v3113_v25  ;;  %v3101_v37 = vor.u32 %v3550_v35, %v3100_v34  ;;  %v3991_v40 = vor.u32 %v3525_v39, %v3188_v38  ;;  %v3080_v41 = vld [vmem:[#allocation4 + $0x60] sm:$0xf]  ;;  %v3546_v42 = vld [vmem:[#allocation4 + $0x68] sm:$0xf0]  ;;  %v3545_v43 = vld [vmem:[#allocation4 + $0x64] sm:$0xf] }
  0x16   :  { %698 = vmatpush.bf16.msrb.mxu0 %v3988_v28  ;;  %v3081_v44 = vor.u32 %v3546_v42, %v3080_v41  ;;  %v3082_v45 = vld [vmem:[#allocation4 + $0x6c] sm:$0xf0]  ;;  %v3088_v46 = vld [vmem:[#allocation4 + $0x68] sm:$0xf]  ;;  %v3547_v47 = vld [vmem:[#allocation4 + $0x70] sm:$0xf0] }
  0x17   :  { %v3085_v48 = vor.u32 %v3545_v43, %v3082_v45  ;;  %v3089_v49 = vor.u32 %v3547_v47, %v3088_v46  ;;  %v3176_v50 = vld [vmem:[#allocation6 + $0x60] sm:$0xf]  ;;  %v3522_v51 = vld [vmem:[#allocation6 + $0x68] sm:$0xf0]  ;;  %v3068_v53 = vld [vmem:[#allocation4 + $0x48] sm:$0xf] }
  0x18   :  { %453 = vmatpush.bf16.msra.mxu1 %v3093_v32  ;;  %v3994_v52 = vor.u32 %v3522_v51, %v3176_v50  ;;  %v3543_v54 = vld [vmem:[#allocation4 + $0x50] sm:$0xf0]  ;;  %v3542_v55 = vld [vmem:[#allocation4 + $0x4c] sm:$0xf]  ;;  %v3070_v57 = vld [vmem:[#allocation4 + $0x54] sm:$0xf0] }
  0x19   :  { %482 = vmatpush.bf16.msra.mxu2 %v3097_v36  ;;  %511 = vmatpush.bf16.msra.mxu3 %v3101_v37  ;;  %v3069_v56 = vor.u32 %v3543_v54, %v3068_v53  ;;  %v3076_v58 = vld [vmem:[#allocation4 + $0x50] sm:$0xf]  ;;  %v3544_v59 = vld [vmem:[#allocation4 + $0x58] sm:$0xf0]  ;;  %v3073_v60 = vor.u32 %v3542_v55, %v3070_v57  ;;  %v3164_v62 = vld [vmem:[#allocation6 + $0x48] sm:$0xf] }
  0x1a   :  { %699 = vmatpush.bf16.msrb.mxu0 %v3991_v40  ;;  %v3077_v61 = vor.u32 %v3544_v59, %v3076_v58  ;;  %v3519_v63 = vld [vmem:[#allocation6 + $0x50] sm:$0xf0]  ;;  %v3056_v1 = vld [vmem:[#allocation4 + $0x30] sm:$0xf]  ;;  %v3058_v5 = vld [vmem:[#allocation4 + $0x3c] sm:$0xf0] }
  0x1b   :  { %v3997_v0 = vor.u32 %v3519_v63, %v3164_v62  ;;  %v3064_v6 = vld [vmem:[#allocation4 + $0x38] sm:$0xf]  ;;  %v3541_v7 = vld [vmem:[#allocation4 + $0x40] sm:$0xf0]  ;;  %v3152_v10 = vld [vmem:[#allocation6 + $0x30] sm:$0xf] }
  0x1c   :  { %454 = vmatpush.bf16.msra.mxu1 %v3081_v44  ;;  %v3065_v9 = vor.u32 %v3541_v7, %v3064_v6  ;;  %v3516_v11 = vld [vmem:[#allocation6 + $0x38] sm:$0xf0]  ;;  %v3044_v13 = vld [vmem:[#allocation4 + $0x18] sm:$0xf]  ;;  %v3537_v14 = vld [vmem:[#allocation4 + $0x20] sm:$0xf0] }
  0x1d   :  { %483 = vmatpush.bf16.msra.mxu2 %v3085_v48  ;;  %512 = vmatpush.bf16.msra.mxu3 %v3089_v49  ;;  %v4000_v12 = vor.u32 %v3516_v11, %v3152_v10  ;;  %v3536_v15 = vld [vmem:[#allocation4 + $0x1c] sm:$0xf]  ;;  %v3045_v17 = vor.u32 %v3537_v14, %v3044_v13  ;;  %v3046_v18 = vld [vmem:[#allocation4 + $0x24] sm:$0xf0]  ;;  %v3052_v19 = vld [vmem:[#allocation4 + $0x20] sm:$0xf] }
  0x1e   :  { %700 = vmatpush.bf16.msrb.mxu0 %v3994_v52  ;;  %v3538_v20 = vld [vmem:[#allocation4 + $0x28] sm:$0xf0]  ;;  %v3049_v21 = vor.u32 %v3536_v15, %v3046_v18  ;;  %v3140_v23 = vld [vmem:[#allocation6 + $0x18] sm:$0xf]  ;;  %v3513_v24 = vld [vmem:[#allocation6 + $0x20] sm:$0xf0] }
  0x1f   :  { %3027 = vmatmul.msk.bf16.gmra.mxu0 %vm117_vm0, %v3505_v2  ;;  %v3540_v2 = vld [vmem:[#allocation4 + $0x38] sm:$0xf0]  ;;  %v3053_v22 = vor.u32 %v3538_v20, %v3052_v19  ;;  %v4006_v25 = vld [vmem:[%s5057_s2] ss:$0 sm:$0xff]  ;;  %v4008_v26 = vor.u32 %v3513_v24, %v3140_v23  ;;  %v3534_v29 = vld [vmem:[#allocation4 + $0x8] sm:$0xf0] }
  0x20   :  { %455 = vmatpush.bf16.msra.mxu1 %v3069_v56  ;;  %v3032_v27 = vld [vmem:[#allocation4] sm:$0xf]  ;;  %v3533_v30 = vld [vmem:[#allocation4 + $0x4] sm:$0xf]  ;;  %v3034_v32 = vld [vmem:[#allocation4 + $0xc] sm:$0xf0] }
  0x21   :  { %484 = vmatpush.bf16.msra.mxu2 %v3073_v60  ;;  %513 = vmatpush.bf16.msra.mxu3 %v3077_v61  ;;  %v3033_v31 = vor.u32 %v3534_v29, %v3032_v27  ;;  %v3040_v33 = vld [vmem:[#allocation4 + $0x8] sm:$0xf]  ;;  %v3535_v34 = vld [vmem:[#allocation4 + $0x10] sm:$0xf0]  ;;  %v3037_v35 = vor.u32 %v3533_v30, %v3034_v32  ;;  %v3128_v37 = vld [vmem:[#allocation6] sm:$0xf] }
  0x22   :  { %701 = vmatpush.bf16.msrb.mxu0 %v3997_v0  ;;  %v3041_v36 = vor.u32 %v3535_v34, %v3040_v33  ;;  %v3510_v38 = vld [vmem:[#allocation6 + $0x8] sm:$0xf0]  ;;  %v3214_v46 = vld [vmem:[#allocation6 + $0xb4] sm:$0xf0]  ;;  %v5069_v47 = vmov 0  }
  0x23   :  { %v4011_v39 = vor.u32 %v3510_v38, %v3128_v37  ;;  %v3530_v45 = vld [vmem:[#allocation6 + $0xac] sm:$0xf]  ;;  %v3527_v57 = vld [vmem:[#allocation6 + $0x94] sm:$0xf]  ;;  %v3202_v58 = vld [vmem:[#allocation6 + $0x9c] sm:$0xf0] }
  0x24   :  { %v4018_v48 = vor.u32 %v3530_v45, %v3214_v46  ;;  %v3220_v59 = vld [vmem:[#allocation6 + $0xb0] sm:$0xf]  ;;  %v4025_v60 = vor.u32 %v3527_v57, %v3202_v58  ;;  %v3532_v61 = vld [vmem:[#allocation6 + $0xb8] sm:$0xf0]  ;;  %v3529_v11 = vld [vmem:[#allocation6 + $0xa0] sm:$0xf0] }
  0x25   :  { %514 = vmatpush.bf16.msra.mxu3 %v3065_v9  ;;  %v4027_v63 = vor.u32 %v3532_v61, %v3220_v59  ;;  %v3524_v7 = vld [vmem:[#allocation6 + $0x7c] sm:$0xf]  ;;  %v3208_v9 = vld [vmem:[#allocation6 + $0x98] sm:$0xf]  ;;  %v3178_v32 = vld [vmem:[#allocation6 + $0x6c] sm:$0xf0] }
  0x26   :  { %702 = vmatpush.bf16.msrb.mxu0 %v4000_v12  ;;  %v4042_v15 = vor.u32 %v3529_v11, %v3208_v9  ;;  %v3196_v33 = vld [vmem:[#allocation6 + $0x80] sm:$0xf]  ;;  %v3526_v37 = vld [vmem:[#allocation6 + $0x88] sm:$0xf0]  ;;  %v3515_v57 = vld [vmem:[#allocation6 + $0x34] sm:$0xf] }
  0x27   :  { %v3154_v59 = vld [vmem:[#allocation6 + $0x3c] sm:$0xf0]  ;;  %v3172_v61 = vld [vmem:[#allocation6 + $0x50] sm:$0xf] }
  0x29   :  { %515 = vmatpush.bf16.msra.mxu3 %v3053_v22 }
  0x2a   :  { %703 = vmatpush.bf16.msrb.mxu0 %v4008_v26 }
  0x2d   :  { %516 = vmatpush.bf16.msra.mxu3 %v3041_v36 }
  0x2e   :  { %704 = vmatpush.bf16.msrb.mxu0 %v4011_v39 }
  0x2f   :  { %3028 = vmatmul.msk.bf16.gmra.mxu0 %vm117_vm0, %v3506_v3  ;;  %v3539_v3 = vld [vmem:[#allocation4 + $0x34] sm:$0xf] }
  0x30   :  { %v3061_v8 = vor.u32 %v3539_v3, %v3058_v5 }
  0x31   :  { %788 = vmatpush.bf16.msrb.mxu3 %v3985_v16 }
  0x32   :  { %485 = vmatpush.bf16.msra.mxu2 %v3061_v8  ;;  %801 = vmatpush.bf16.msra.mxu0 %v4018_v48  ;;  %v3190_v8 = vld [vmem:[#allocation6 + $0x84] sm:$0xf0] }
  0x33   :  { %v4039_v10 = vor.u32 %v3524_v7, %v3190_v8 }
  0x35   :  { %789 = vmatpush.bf16.msrb.mxu3 %v3988_v28 }
  0x36   :  { %486 = vmatpush.bf16.msra.mxu2 %v3049_v21  ;;  %802 = vmatpush.bf16.msra.mxu0 %v4025_v60 }
  0x39   :  { %790 = vmatpush.bf16.msrb.mxu3 %v3991_v40 }
  0x3a   :  { %487 = vmatpush.bf16.msra.mxu2 %v3037_v35  ;;  %803 = vmatpush.bf16.msra.mxu0 %v4039_v10 }
  0x3d   :  { %791 = vmatpush.bf16.msrb.mxu3 %v3994_v52 }
  0x3e   :  { %723 = vmatpush.bf16.msrb.mxu2 %v4027_v63 }
  0x3f   :  { %3029 = vmatmul.msk.bf16.gmra.mxu0 %vm117_vm0, %v3507_v4  ;;  %v3057_v4 = vor.u32 %v3540_v2, %v3056_v1 }
  0x41   :  { %456 = vmatpush.bf16.msra.mxu1 %v3057_v4  ;;  %792 = vmatpush.bf16.msrb.mxu3 %v3997_v0 }
  0x42   :  { %724 = vmatpush.bf16.msrb.mxu2 %v4042_v15 }
  0x45   :  { %457 = vmatpush.bf16.msra.mxu1 %v3045_v17  ;;  %793 = vmatpush.bf16.msrb.mxu3 %v4000_v12 }
  0x49   :  { %458 = vmatpush.bf16.msra.mxu1 %v3033_v31  ;;  %794 = vmatpush.bf16.msrb.mxu3 %v4008_v26  ;;  %v3521_v31 = vld [vmem:[#allocation6 + $0x64] sm:$0xf] }
  0x4a   :  { %v4055_v36 = vor.u32 %v3521_v31, %v3178_v32  ;;  %v3512_v32 = vld [vmem:[#allocation6 + $0x1c] sm:$0xf] }
  0x4c   :  { %804 = vmatpush.bf16.msra.mxu0 %v4055_v36 }
  0x4d   :  { %710 = vmatpush.bf16.msrb.mxu1 %v4018_v48  ;;  %795 = vmatpush.bf16.msrb.mxu3 %v4011_v39 }
  0x4f   :  { %705 = vmatmul.bf16.vlgmr.msrb.gmra.mxu0 %v5069_v47 }
  0x51   :  { %711 = vmatpush.bf16.msrb.mxu1 %v4025_v60 }
  0x55   :  { %712 = vmatpush.bf16.msrb.mxu1 %v4039_v10 }
  0x59   :  { %713 = vmatpush.bf16.msrb.mxu1 %v4055_v36 }
  0x8c   :  { %v139_v41 = vpop.f32.mrf.mxu0 }
  0x8d   :  { %v140_v42 = vadd.f32 %v4006_v25, %v139_v41  ;;  %v4058_v41 = vor.u32 %v3526_v37, %v3196_v33  ;;  %v3142_v33 = vld [vmem:[#allocation6 + $0x24] sm:$0xf0]  ;;  %v3160_v37 = vld [vmem:[#allocation6 + $0x38] sm:$0xf] }
  0x8f   :  { %v167_v43 = vmul.f32 0.044715, %v140_v42  ;;  %v159_v23 = vmul.f32 0.5, %v140_v42  ;;  %725 = vmatpush.bf16.msrb.mxu2 %v4058_v41 }
  0x91   :  { %v175_v44 = vmul.f32 %v167_v43, %v140_v42 }
  0x93   :  { %v183_v49 = vmul.f32 %v175_v44, %v140_v42 }
  0x94   :  { %v141_v50 = vpop.f32.mrf.mxu0 }
  0x95   :  { %v142_v51 = vadd.f32 %v4006_v25, %v141_v50  ;;  %v191_v53 = vadd.f32 %v183_v49, %v140_v42  ;;  %v3518_v50 = vld [vmem:[#allocation6 + $0x4c] sm:$0xf] }
  0x97   :  { %v168_v54 = vmul.f32 0.044715, %v142_v51  ;;  %v199_v55 = vmul.f32 0.7978846, %v191_v53  ;;  %v160_v24 = vmul.f32 0.5, %v142_v51 }
  0x99   :  { %v176_v56 = vmul.f32 %v168_v54, %v142_v51  ;;  %3627 = vtanh.f32 %v199_v55  ;;  %v3184_v55 = vld [vmem:[#allocation6 + $0x68] sm:$0xf] }
  0x9b   :  { %v184_v62 = vmul.f32 %v176_v56, %v142_v51  ;;  %v3523_v56 = vld [vmem:[#allocation6 + $0x70] sm:$0xf0] }
  0x9c   :  { %v144_v1 = vpop.f32.mrf.mxu0  ;;  %v4072_v58 = vor.u32 %v3523_v56, %v3184_v55 }
  0x9d   :  { %v4032_v2 = vadd.f32 %v4006_v25, %v144_v1  ;;  %v192_v3 = vadd.f32 %v184_v62, %v142_v51  ;;  %v3166_v51 = vld [vmem:[#allocation6 + $0x54] sm:$0xf0]  ;;  %v3520_v62 = vld [vmem:[#allocation6 + $0x58] sm:$0xf0] }
  0x9e   :  { %v4070_v54 = vor.u32 %v3518_v50, %v3166_v51  ;;  %726 = vmatpush.bf16.msrb.mxu2 %v4072_v58 }
  0x9f   :  { %v169_v4 = vmul.f32 0.044715, %v4032_v2  ;;  %v200_v5 = vmul.f32 0.7978846, %v192_v3  ;;  %v3628_v13 = vpop.eup %3627 }
  0xa0   :  { %v215_v20 = vadd.f32 1.0, %v3628_v13  ;;  %714 = vmatpush.bf16.msrb.mxu1 %v4070_v54  ;;  %805 = vmatpush.bf16.msra.mxu0 %v4070_v54 }
  0xa1   :  { %v177_v6 = vmul.f32 %v169_v4, %v4032_v2  ;;  %3629 = vtanh.f32 %v200_v5  ;;  %v4076_v4 = vor.u32 %v3515_v57, %v3154_v59 }
  0xa2   :  { %v223_v34 = vmul.f32 %v215_v20, %v159_v23 }
  0xa3   :  { %v185_v14 = vmul.f32 %v177_v6, %v4032_v2  ;;  %v4080_v6 = vor.u32 %v3520_v62, %v3172_v61  ;;  %v3136_v61 = vld [vmem:[#allocation6 + $0x8] sm:$0xf]  ;;  %v3511_v62 = vld [vmem:[#allocation6 + $0x10] sm:$0xf0] }
  0xa4   :  { %v146_v17 = vpop.f32.mrf.mxu0  ;;  %715 = vmatpush.bf16.msrb.mxu1 %v4076_v4  ;;  %806 = vmatpush.bf16.msra.mxu0 %v4076_v4 }
  0xa5   :  { %v4047_v18 = vadd.f32 %v4006_v25, %v146_v17  ;;  %v193_v19 = vadd.f32 %v185_v14, %v4032_v2  ;;  %v161_v14 = vmul.f32 0.5, %v4032_v2  ;;  %727 = vmatpush.bf16.msrb.mxu2 %v4080_v6 }
  0xa7   :  { %v3630_v21 = vpop.eup %3629  ;;  %v170_v22 = vmul.f32 0.044715, %v4047_v18  ;;  %v201_v29 = vmul.f32 0.7978846, %v193_v19  ;;  %v162_v17 = vmul.f32 0.5, %v4047_v18 }
  0xa8   :  { %v216_v27 = vadd.f32 1.0, %v3630_v21 }
  0xa9   :  { %v178_v30 = vmul.f32 %v170_v22, %v4047_v18  ;;  %3631 = vtanh.f32 %v201_v29 }
  0xaa   :  { %v224_v35 = vmul.f32 %v216_v27, %v160_v24 }
  0xab   :  { %v186_v38 = vmul.f32 %v178_v30, %v4047_v18 }
  0xac   :  { %v149_v42 = vpop.f32.mrf.mxu0  ;;  %v279_v43 = vpack.c.bf16 %v224_v35, %v223_v34  ;;  %v4098_v35 = vor.u32 %v3512_v32, %v3142_v33 }
  0xad   :  { %v4063_v44 = vadd.f32 %v4006_v25, %v149_v42  ;;  %v194_v45 = vadd.f32 %v186_v38, %v4047_v18  ;;  %v3517_v38 = vld [vmem:[#allocation6 + $0x40] sm:$0xf0] }
  0xae   :  { %459 = vmatmul.bf16.vlgmr.msra.gmra.mxu1 %v279_v43  ;;  %488 = vmatmul.bf16.vlgmr.msra.gmra.mxu2 %v279_v43  ;;  %v3509_v42 = vld [vmem:[#allocation6 + $0x4] sm:$0xf] }
  0xaf   :  { %v171_v46 = vmul.f32 0.044715, %v4063_v44  ;;  %517 = vmatmul.bf16.vlgmr.msra.gmra.mxu3 %v279_v43  ;;  %v202_v49 = vmul.f32 0.7978846, %v194_v45  ;;  %v3632_v1 = vpop.eup %3631  ;;  %v4100_v43 = vor.u32 %v3517_v38, %v3160_v37  ;;  %v3130_v45 = vld [vmem:[#allocation6 + $0xc] sm:$0xf0]  ;;  %716 = vmatpush.bf16.msrb.mxu1 %v4098_v35 }
  0xb0   :  { %892 = vmatpush.bf16.msra.mxu3 %v4018_v48  ;;  %v217_v9 = vadd.f32 1.0, %v3632_v1  ;;  %807 = vmatpush.bf16.msra.mxu0 %v4098_v35 }
  0xb1   :  { %v179_v53 = vmul.f32 %v171_v46, %v4063_v44  ;;  %3633 = vtanh.f32 %v202_v49  ;;  %v3148_v46 = vld [vmem:[#allocation6 + $0x20] sm:$0xf]  ;;  %v3514_v49 = vld [vmem:[#allocation6 + $0x28] sm:$0xf0]  ;;  %728 = vmatpush.bf16.msrb.mxu2 %v4100_v43 }
  0xb2   :  { %v225_v22 = vmul.f32 %v217_v9, %v161_v14  ;;  %v4108_v56 = vor.u32 %v3514_v49, %v3148_v46 }
  0xb3   :  { %v187_v3 = vmul.f32 %v179_v53, %v4063_v44  ;;  %v4104_v53 = vor.u32 %v3509_v42, %v3130_v45  ;;  %v315_v45 = vld [vmem:[%s5060_s5] sm:$0x7] }
  0xb4   :  { %v151_v5 = vpop.f32.mrf.mxu0  ;;  %893 = vmatpush.bf16.msra.mxu3 %v4025_v60  ;;  %v4174_v49 = vperm.slane %v315_v45, 0 }
  0xb5   :  { %v152_v7 = vadd.f32 %v4006_v25, %v151_v5  ;;  %v195_v8 = vadd.f32 %v187_v3, %v4063_v44  ;;  %717 = vmatpush.bf16.msrb.mxu1 %v4104_v53  ;;  %808 = vmatpush.bf16.msra.mxu0 %v4104_v53 }
  0xb6   :  { %729 = vmatpush.bf16.msrb.mxu2 %v4108_v56 }
  0xb7   :  { %v3634_v11 = vpop.eup %3633  ;;  %v172_v13 = vmul.f32 0.044715, %v152_v7  ;;  %v203_v21 = vmul.f32 0.7978846, %v195_v8  ;;  %v163_v8 = vmul.f32 0.5, %v4063_v44  ;;  %v164_v9 = vmul.f32 0.5, %v152_v7 }
  0xb8   :  { %v218_v19 = vadd.f32 1.0, %v3634_v11  ;;  %894 = vmatpush.bf16.msra.mxu3 %v4039_v10 }
  0xb9   :  { %v180_v20 = vmul.f32 %v172_v13, %v152_v7  ;;  %3635 = vtanh.f32 %v203_v21  ;;  %v4117_v13 = vor.u32 %v3511_v62, %v3136_v61  ;;  %814 = vmatpush.bf16.msra.mxu1 %v4027_v63  ;;  %905 = vmatpush.bf16.msrb.mxu0 %v4027_v63  ;;  %v4184_v61 = vperm.slane %v315_v45, 2 }
  0xba   :  { %v226_v23 = vmul.f32 %v218_v19, %v162_v17 }
  0xbb   :  { %v188_v24 = vmul.f32 %v180_v20, %v152_v7  ;;  %730 = vmatpush.bf16.msrb.mxu2 %v4117_v13 }
  0xbc   :  { %v154_v27 = vpop.f32.mrf.mxu0  ;;  %v280_v29 = vpack.c.bf16 %v226_v23, %v225_v22  ;;  %895 = vmatpush.bf16.msra.mxu3 %v4055_v36 }
  0xbd   :  { %v4093_v30 = vadd.f32 %v4006_v25, %v154_v27  ;;  %v196_v2 = vadd.f32 %v188_v24, %v152_v7  ;;  %815 = vmatpush.bf16.msra.mxu1 %v4042_v15  ;;  %906 = vmatpush.bf16.msrb.mxu0 %v4042_v15 }
  0xbe   :  { %464 = vmatmul.bf16.gmra.mxu1 %v280_v29  ;;  %493 = vmatmul.bf16.gmra.mxu2 %v280_v29 }
  0xbf   :  { %v173_v18 = vmul.f32 0.044715, %v4093_v30  ;;  %522 = vmatmul.bf16.gmra.mxu3 %v280_v29  ;;  %v204_v31 = vmul.f32 0.7978846, %v196_v2  ;;  %v3636_v50 = vpop.eup %3635  ;;  %879 = vmatpush.bf16.msra.mxu2 %v3985_v16  ;;  %v165_v27 = vmul.f32 0.5, %v4093_v30 }
  0xc0   :  { %896 = vmatpush.bf16.msra.mxu3 %v4070_v54  ;;  %v219_v1 = vadd.f32 1.0, %v3636_v50 }
  0xc1   :  { %v181_v34 = vmul.f32 %v173_v18, %v4093_v30  ;;  %3637 = vtanh.f32 %v204_v31  ;;  %816 = vmatpush.bf16.msra.mxu1 %v4058_v41  ;;  %907 = vmatpush.bf16.msrb.mxu0 %v4058_v41 }
  0xc2   :  { %v227_v17 = vmul.f32 %v219_v1, %v163_v8 }
  0xc3   :  { %v189_v51 = vmul.f32 %v181_v34, %v4093_v30  ;;  %880 = vmatpush.bf16.msra.mxu2 %v3988_v28 }
  0xc4   :  { %v156_v55 = vpop.f32.mrf.mxu0  ;;  %897 = vmatpush.bf16.msra.mxu3 %v4076_v4 }
  0xc5   :  { %v157_v57 = vadd.f32 %v4006_v25, %v156_v55  ;;  %v197_v59 = vadd.f32 %v189_v51, %v4093_v30  ;;  %817 = vmatpush.bf16.msra.mxu1 %v4072_v58  ;;  %908 = vmatpush.bf16.msrb.mxu0 %v4072_v58 }
  0xc7   :  { %v3638_v3 = vpop.eup %3637  ;;  %v174_v5 = vmul.f32 0.044715, %v157_v57  ;;  %v205_v14 = vmul.f32 0.7978846, %v197_v59  ;;  %881 = vmatpush.bf16.msra.mxu2 %v3991_v40  ;;  %v166_v29 = vmul.f32 0.5, %v157_v57 }
  0xc8   :  { %v220_v11 = vadd.f32 1.0, %v3638_v3  ;;  %898 = vmatpush.bf16.msra.mxu3 %v4098_v35 }
  0xc9   :  { %v182_v25 = vmul.f32 %v174_v5, %v157_v57  ;;  %3639 = vtanh.f32 %v205_v14  ;;  %818 = vmatpush.bf16.msra.mxu1 %v4080_v6  ;;  %909 = vmatpush.bf16.msrb.mxu0 %v4080_v6 }
  0xca   :  { %v228_v19 = vmul.f32 %v220_v11, %v164_v9 }
  0xcb   :  { %v190_v20 = vmul.f32 %v182_v25, %v157_v57  ;;  %882 = vmatpush.bf16.msra.mxu2 %v3994_v52 }
  0xcc   :  { %v281_v21 = vpack.c.bf16 %v228_v19, %v227_v17  ;;  %899 = vmatpush.bf16.msra.mxu3 %v4104_v53  ;;  %v706_v30 = vpop.f32.mrf.mxu0 }
  0xcd   :  { %v198_v44 = vadd.f32 %v190_v20, %v157_v57  ;;  %819 = vmatpush.bf16.msra.mxu1 %v4100_v43  ;;  %910 = vmatpush.bf16.msrb.mxu0 %v4100_v43  ;;  %v4181_v57 = vperm.slane %v315_v45, 1 }
  0xce   :  { %469 = vmatmul.bf16.gmra.mxu1 %v281_v21  ;;  %498 = vmatmul.bf16.gmra.mxu2 %v281_v21 }
  0xcf   :  { %527 = vmatmul.bf16.gmra.mxu3 %v281_v21  ;;  %v206_v7 = vmul.f32 0.7978846, %v198_v44  ;;  %v3640_v22 = vpop.eup %3639  ;;  %883 = vmatpush.bf16.msra.mxu2 %v3997_v0 }
  0xd0   :  { %v221_v23 = vadd.f32 1.0, %v3640_v22 }
  0xd1   :  { %3641 = vtanh.f32 %v206_v7  ;;  %820 = vmatpush.bf16.msra.mxu1 %v4108_v56  ;;  %911 = vmatpush.bf16.msrb.mxu0 %v4108_v56 }
  0xd2   :  { %v229_v18 = vmul.f32 %v221_v23, %v165_v27 }
  0xd3   :  { %884 = vmatpush.bf16.msra.mxu2 %v4000_v12 }
  0xd4   :  { %v708_v33 = vpop.f32.mrf.mxu0 }
  0xd5   :  { %821 = vmatpush.bf16.msra.mxu1 %v4117_v13  ;;  %912 = vmatpush.bf16.msrb.mxu0 %v4117_v13 }
  0xd7   :  { %v3642_v24 = vpop.eup %3641  ;;  %885 = vmatpush.bf16.msra.mxu2 %v4008_v26 }
  0xd8   :  { %v222_v2 = vadd.f32 1.0, %v3642_v24 }
  0xda   :  { %v230_v31 = vmul.f32 %v222_v2, %v166_v29 }
  0xdb   :  { %886 = vmatpush.bf16.msra.mxu2 %v4011_v39 }
  0xdc   :  { %v282_v32 = vpack.c.bf16 %v230_v31, %v229_v18 }
  0xde   :  { %474 = vmatmul.bf16.gmra.mxu1 %v282_v32  ;;  %503 = vmatmul.bf16.gmra.mxu2 %v282_v32 }
  0xdf   :  { %532 = vmatmul.bf16.gmra.mxu3 %v282_v32 }
  0xee   :  { %718 = vmatmul.bf16.vlgmr.msrb.gmra.mxu1 %v5069_v47  ;;  %731 = vmatmul.bf16.vlgmr.msrb.gmra.mxu2 %v5069_v47 }
  0xef   :  { %970 = vmatpush.bf16.msrb.mxu1 %v3985_v16  ;;  %983 = vmatpush.bf16.msrb.mxu2 %v4018_v48 }
  0xf3   :  { %971 = vmatpush.bf16.msrb.mxu1 %v3988_v28  ;;  %984 = vmatpush.bf16.msrb.mxu2 %v4025_v60 }
  0xf7   :  { %972 = vmatpush.bf16.msrb.mxu1 %v3991_v40  ;;  %985 = vmatpush.bf16.msrb.mxu2 %v4039_v10 }
  0xfb   :  { %973 = vmatpush.bf16.msrb.mxu1 %v3994_v52  ;;  %986 = vmatpush.bf16.msrb.mxu2 %v4055_v36 }
  0xff   :  { %974 = vmatpush.bf16.msrb.mxu1 %v3997_v0  ;;  %987 = vmatpush.bf16.msrb.mxu2 %v4070_v54 }
 0x103   :  { %975 = vmatpush.bf16.msrb.mxu1 %v4000_v12  ;;  %988 = vmatpush.bf16.msrb.mxu2 %v4076_v4 }
 0x107   :  { %976 = vmatpush.bf16.msrb.mxu1 %v4008_v26  ;;  %989 = vmatpush.bf16.msrb.mxu2 %v4098_v35 }
 0x10b   :  { %977 = vmatpush.bf16.msrb.mxu1 %v4011_v39  ;;  %990 = vmatpush.bf16.msrb.mxu2 %v4104_v53 }
 0x12b   :  { %v460_v34 = vpop.f32.mrf.mxu1 }
 0x12c   :  { %v461_v59 = vadd.f32 %v460_v34, %v4174_v49 }
 0x12e   :  { %v736_v9 = vadd.f32 %v706_v30, %v461_v59 }
 0x130   :  { %v3222_v11 = vmul.f32 -1.442695, %v736_v9 }
 0x131   :  { %v489_v37 = vpop.f32.mrf.mxu2 }
 0x132   :  { %v4165_v38 = vpop.f32.mrf.mxu3  ;;  %3643 = vpow2.f32 %v3222_v11 }
 0x133   :  { %v4167_v42 = vpop.f32.mrf.mxu1 }
 0x138   :  { %v3644_v7 = vpop.eup %3643 }
 0x139   :  { %v4172_v46 = vpop.f32.mrf.mxu2  ;;  %v740_v24 = vadd.f32 1.0, %v3644_v7 }
 0x13a   :  { %v4176_v50 = vpop.f32.mrf.mxu3 }
 0x13b   :  { %v465_v51 = vpop.f32.mrf.mxu1  ;;  %3645 = vrcp.f32 %v740_v24  ;;  %vm746_vm2 = vweird.f32 %v740_v24 }
 0x13c   :  { %v4179_v55 = vadd.f32 %v465_v51, %v4174_v49 }
 0x141   :  { %v494_v62 = vpop.f32.mrf.mxu2  ;;  %v3646_v31 = vpop.eup %3645 }
 0x142   :  { %v4187_v1 = vadd.f32 %v494_v62, %v4181_v57  ;;  %v523_v3 = vpop.f32.mrf.mxu3  ;;  %v742_v51 = vmul.f32 %v3646_v31, %v740_v24  ;;  %vm747_vm1 = vweird.f32 %v3646_v31 }
 0x143   :  { %v4190_v5 = vadd.f32 %v523_v3, %v4184_v61  ;;  %v4192_v8 = vpop.f32.mrf.mxu1  ;;  %v490_v3 = vadd.f32 %v489_v37, %v4181_v57  ;;  %vm748_vm3 = vmor %vm746_vm2, %vm747_vm1 }
 0x144   :  { %v743_v59 = vsub.f32 1.0, %v742_v51 }
 0x146   :  { %v744_v11 = vmul.f32 %v3646_v31, %v743_v59 }
 0x148   :  { %v745_v7 = vadd.f32 %v3646_v31, %v744_v11  ;;  %v519_v11 = vadd.f32 %v4165_v38, %v4184_v61 }
 0x149   :  { %v4194_v25 = vpop.f32.mrf.mxu2 }
 0x14a   :  { %v4196_v14 = vpop.f32.mrf.mxu3  ;;  %v749_v51 = vsel %vm748_vm3, %v3646_v31, %v745_v7 }
 0x14b   :  { %v470_v17 = vpop.f32.mrf.mxu1 }
 0x14c   :  { %v4199_v19 = vadd.f32 %v470_v17, %v4174_v49 }
 0x151   :  { %v499_v20 = vpop.f32.mrf.mxu2 }
 0x152   :  { %v4202_v21 = vadd.f32 %v499_v20, %v4181_v57  ;;  %v528_v44 = vpop.f32.mrf.mxu3 }
 0x153   :  { %v4205_v22 = vadd.f32 %v528_v44, %v4184_v61  ;;  %v4207_v23 = vpop.f32.mrf.mxu1  ;;  %v4230_v44 = vld [vmem:[%s5061_s6] ss:$0 sm:$0xff] }
 0x159   :  { %v4209_v27 = vpop.f32.mrf.mxu2 }
 0x15a   :  { %v4211_v29 = vpop.f32.mrf.mxu3 }
 0x15b   :  { %v475_v2 = vpop.f32.mrf.mxu1 }
 0x15c   :  { %v4214_v18 = vadd.f32 %v475_v2, %v4174_v49  ;;  %v752_v2 = vand.u32 2147483648, %v740_v24 }
 0x15e   :  { %v753_v59 = vor.u32 1.1754944e-38, %v752_v2 }
 0x161   :  { %v504_v32 = vpop.f32.mrf.mxu2 }
 0x162   :  { %v4217_v30 = vadd.f32 %v504_v32, %v4181_v57  ;;  %v533_v33 = vpop.f32.mrf.mxu3 }
 0x163   :  { %v4220_v34 = vadd.f32 %v533_v33, %v4184_v61  ;;  %v4222_v45 = vpop.f32.mrf.mxu1  ;;  %v750_v33 = vand.u32 2147483647, %v740_v24 }
 0x164   :  { %5071 = vst [vmem:[#allocation10_spill] sm:$0xff] %v4217_v30 }
 0x165   :  { %5072 = vst [vmem:[#allocation11_spill] sm:$0xff] %v4220_v34  ;;  %vm751_vm4 = vcmp.eq.f32.partialorder %v750_v33, 8.507059e+37 }
 0x166   :  { %5073 = vst [vmem:[#allocation12_spill] sm:$0xff] %v4222_v45 }
 0x169   :  { %v4224_v62 = vpop.f32.mrf.mxu2 }
 0x16a   :  { %5074 = vst [vmem:[#allocation13_spill] sm:$0xff] %v4224_v62 }
 0x16b   :  { %v719_v9 = vpop.f32.mrf.mxu1 }
 0x16c   :  { %v756_v17 = vadd.f32 %v719_v9, %v490_v3  ;;  %v754_v9 = vsel %vm751_vm4, %v753_v59, %v749_v51 }
 0x16e   :  { %v3223_v20 = vmul.f32 -1.442695, %v756_v17 }
 0x170   :  { %3647 = vpow2.f32 %v3223_v20 }
 0x171   :  { %v732_v32 = vpop.f32.mrf.mxu2 }
 0x172   :  { %v776_v37 = vadd.f32 %v4230_v44, %v732_v32 }
 0x173   :  { %v721_v47 = vpop.f32.mrf.mxu1 }
 0x174   :  { %v777_v62 = vmul.f32 %v776_v37, %v754_v9 }
 0x176   :  { %v3648_v3 = vpop.eup %3647  ;;  %v778_v45 = vadd.f32 %v777_v62, %v519_v11 }
 0x177   :  { %v760_v17 = vadd.f32 1.0, %v3648_v3 }
 0x179   :  { %3649 = vrcp.f32 %v760_v17  ;;  %v734_v20 = vpop.f32.mrf.mxu2  ;;  %v772_v31 = vand.u32 2147483648, %v760_v17  ;;  %v770_v47 = vand.u32 2147483647, %v760_v17  ;;  %vm766_vm6 = vweird.f32 %v760_v17 }
 0x17a   :  { %3651 = vtanh.f32 %v778_v45  ;;  %v463_v20 = vadd.f32 %v4167_v42, %v4174_v49 }
 0x17b   :  { %v773_v33 = vor.u32 1.1754944e-38, %v772_v31  ;;  %vm771_vm8 = vcmp.eq.f32.partialorder %v770_v47, 8.507059e+37 }
 0x17f   :  { %v3650_v34 = vpop.eup %3649 }
 0x180   :  { %v762_v24 = vmul.f32 %v3650_v34, %v760_v17  ;;  %vm767_vm5 = vweird.f32 %v3650_v34  ;;  %v3652_v2 = vpop.eup %3651 }
 0x181   :  { %vm768_vm7 = vmor %vm766_vm6, %vm767_vm5  ;;  %v780_v51 = vsub.f32 0.0, %v3652_v2 }
 0x182   :  { %v763_v30 = vsub.f32 1.0, %v762_v24 }
 0x184   :  { %v764_v7 = vmul.f32 %v3650_v34, %v763_v30  ;;  %v4263_v30 = vpop.f32.mrf.mxu3 }
 0x185   :  { %5075 = vst [vmem:[#allocation14_spill] sm:$0xff] %v4263_v30 }
 0x186   :  { %v765_v32 = vadd.f32 %v3650_v34, %v764_v7 }
 0x188   :  { %v769_v37 = vsel %vm768_vm7, %v3650_v34, %v765_v32  ;;  %v492_v34 = vadd.f32 %v4172_v46, %v4181_v57 }
 0x189   :  { %v774_v38 = vsel %vm771_vm8, %v773_v33, %v769_v37 }
 0x18a   :  { %v781_v59 = vmul.f32 %v780_v51, %v774_v38 }
 0x18c   :  { %v4235_v3 = vadd.f32 %v3652_v2, %v781_v59 }
 0x18e   :  { %v787_v45 = vpack.c.bf16 %v4235_v3, %v4235_v3 }
 0x190   :  { %796 = vmatmul.bf16.vlgmr.msrb.gmra.mxu3 %v787_v45  ;;  %809 = vmatmul.bf16.vlgmr.msra.gmra.mxu0 %v787_v45 }
 0x191   :  { %822 = vmatmul.bf16.vlgmr.msra.gmra.mxu1 %v787_v45  ;;  %996 = vmatpush.bf16.msrb.mxu3 %v4027_v63 }
 0x192   :  { %1061 = vmatpush.bf16.msra.mxu0 %v3985_v16  ;;  %1074 = vmatpush.bf16.msra.mxu1 %v4018_v48 }
 0x195   :  { %997 = vmatpush.bf16.msrb.mxu3 %v4042_v15 }
 0x196   :  { %1062 = vmatpush.bf16.msra.mxu0 %v3988_v28  ;;  %1075 = vmatpush.bf16.msra.mxu1 %v4025_v60 }
 0x199   :  { %998 = vmatpush.bf16.msrb.mxu3 %v4058_v41 }
 0x19a   :  { %1063 = vmatpush.bf16.msra.mxu0 %v3991_v40  ;;  %1076 = vmatpush.bf16.msra.mxu1 %v4039_v10 }
 0x19d   :  { %999 = vmatpush.bf16.msrb.mxu3 %v4072_v58 }
 0x19e   :  { %1064 = vmatpush.bf16.msra.mxu0 %v3994_v52  ;;  %1077 = vmatpush.bf16.msra.mxu1 %v4055_v36 }
 0x1a1   :  { %1000 = vmatpush.bf16.msrb.mxu3 %v4080_v6 }
 0x1a2   :  { %1065 = vmatpush.bf16.msra.mxu0 %v3997_v0  ;;  %1078 = vmatpush.bf16.msra.mxu1 %v4070_v54 }
 0x1a5   :  { %1001 = vmatpush.bf16.msrb.mxu3 %v4100_v43 }
 0x1a6   :  { %1066 = vmatpush.bf16.msra.mxu0 %v4000_v12  ;;  %1079 = vmatpush.bf16.msra.mxu1 %v4076_v4 }
 0x1a9   :  { %1002 = vmatpush.bf16.msrb.mxu3 %v4108_v56 }
 0x1aa   :  { %1067 = vmatpush.bf16.msra.mxu0 %v4008_v26  ;;  %1080 = vmatpush.bf16.msra.mxu1 %v4098_v35 }
 0x1ad   :  { %1003 = vmatpush.bf16.msrb.mxu3 %v4117_v13 }
 0x1ae   :  { %1068 = vmatpush.bf16.msra.mxu0 %v4011_v39  ;;  %1081 = vmatpush.bf16.msra.mxu1 %v4104_v53 }
 0x20d   :  { %v810_v62 = vpop.f32.mrf.mxu0 }
 0x20e   :  { %v847_v9 = vadd.f32 %v810_v62, %v492_v34  ;;  %v823_v17 = vpop.f32.mrf.mxu1 }
 0x210   :  { %v3225_v11 = vmul.f32 -1.442695, %v847_v9 }
 0x212   :  { %3653 = vpow2.f32 %v3225_v11 }
 0x213   :  { %v797_v24 = vpop.f32.mrf.mxu3 }
 0x214   :  { %v827_v31 = vadd.f32 %v797_v24, %v463_v20 }
 0x215   :  { %v812_v7 = vpop.f32.mrf.mxu0 }
 0x216   :  { %v3224_v47 = vmul.f32 -1.442695, %v827_v31  ;;  %v825_v2 = vpop.f32.mrf.mxu1  ;;  %v867_v7 = vadd.f32 %v4230_v44, %v823_v17 }
 0x218   :  { %3655 = vpow2.f32 %v3224_v47  ;;  %v3654_v32 = vpop.eup %3653 }
 0x219   :  { %v851_v37 = vadd.f32 1.0, %v3654_v32  ;;  %v521_v32 = vadd.f32 %v4176_v50, %v4184_v61 }
 0x21b   :  { %v799_v33 = vpop.f32.mrf.mxu3  ;;  %v863_v30 = vand.u32 2147483648, %v851_v37  ;;  %vm857_vm14 = vweird.f32 %v851_v37 }
 0x21e   :  { %v3656_v51 = vpop.eup %3655 }
 0x21f   :  { %v831_v38 = vadd.f32 1.0, %v3656_v51 }
 0x221   :  { %3657 = vrcp.f32 %v831_v38  ;;  %v843_v42 = vand.u32 2147483648, %v831_v38  ;;  %v841_v11 = vand.u32 2147483647, %v831_v38  ;;  %vm837_vm10 = vweird.f32 %v831_v38 }
 0x222   :  { %3659 = vrcp.f32 %v851_v37 }
 0x223   :  { %v844_v31 = vor.u32 1.1754944e-38, %v843_v42  ;;  %vm842_vm12 = vcmp.eq.f32.partialorder %v841_v11, 8.507059e+37 }
 0x227   :  { %v3658_v46 = vpop.eup %3657 }
 0x228   :  { %v3660_v59 = vpop.eup %3659  ;;  %v833_v45 = vmul.f32 %v3658_v46, %v831_v38  ;;  %vm838_vm9 = vweird.f32 %v3658_v46  ;;  %v861_v38 = vand.u32 2147483647, %v851_v37 }
 0x229   :  { %v853_v62 = vmul.f32 %v3660_v59, %v851_v37  ;;  %vm839_vm11 = vmor %vm837_vm10, %vm838_vm9  ;;  %vm858_vm13 = vweird.f32 %v3660_v59 }
 0x22a   :  { %v834_v34 = vsub.f32 1.0, %v833_v45  ;;  %vm859_vm15 = vmor %vm857_vm14, %vm858_vm13  ;;  %vm862_vm0 = vcmp.eq.f32.partialorder %v861_v38, 8.507059e+37 }
 0x22b   :  { %v854_v24 = vsub.f32 1.0, %v853_v62 }
 0x22c   :  { %v835_v9 = vmul.f32 %v3658_v46, %v834_v34 }
 0x22d   :  { %v855_v51 = vmul.f32 %v3660_v59, %v854_v24 }
 0x22e   :  { %v836_v20 = vadd.f32 %v3658_v46, %v835_v9  ;;  %v864_v9 = vor.u32 1.1754944e-38, %v863_v30 }
 0x22f   :  { %v856_v34 = vadd.f32 %v3660_v59, %v855_v51 }
 0x230   :  { %v840_v47 = vsel %vm839_vm11, %v3658_v46, %v836_v20 }
 0x231   :  { %v845_v2 = vsel %vm842_vm12, %v844_v31, %v840_v47  ;;  %v860_v62 = vsel %vm859_vm15, %v3660_v59, %v856_v34 }
 0x232   :  { %v868_v33 = vmul.f32 %v867_v7, %v845_v2  ;;  %v865_v46 = vsel %vm862_vm0, %v864_v9, %v860_v62 }
 0x234   :  { %v869_v45 = vadd.f32 %v868_v33, %v521_v32 }
 0x236   :  { %3661 = vtanh.f32 %v869_v45 }
 0x23c   :  { %v3662_v42 = vpop.eup %3661 }
 0x23d   :  { %v871_v17 = vsub.f32 %v4235_v3, %v3662_v42 }
 0x23f   :  { %v872_v11 = vmul.f32 %v871_v17, %v865_v46 }
 0x241   :  { %v4273_v20 = vadd.f32 %v3662_v42, %v872_v11 }
 0x243   :  { %v878_v50 = vpack.c.bf16 %v4273_v20, %v4273_v20 }
 0x245   :  { %887 = vmatmul.bf16.vlgmr.msra.gmra.mxu2 %v878_v50  ;;  %900 = vmatmul.bf16.vlgmr.msra.gmra.mxu3 %v878_v50 }
 0x246   :  { %913 = vmatmul.bf16.vlgmr.msrb.gmra.mxu0 %v878_v50  ;;  %1087 = vmatpush.bf16.msra.mxu2 %v4027_v63 }
 0x247   :  { %1152 = vmatpush.bf16.msra.mxu3 %v3985_v16  ;;  %1165 = vmatpush.bf16.msrb.mxu0 %v4018_v48 }
 0x24a   :  { %1088 = vmatpush.bf16.msra.mxu2 %v4042_v15 }
 0x24b   :  { %1153 = vmatpush.bf16.msra.mxu3 %v3988_v28  ;;  %1166 = vmatpush.bf16.msrb.mxu0 %v4025_v60 }
 0x24e   :  { %1089 = vmatpush.bf16.msra.mxu2 %v4058_v41 }
 0x24f   :  { %1154 = vmatpush.bf16.msra.mxu3 %v3991_v40  ;;  %1167 = vmatpush.bf16.msrb.mxu0 %v4039_v10 }
 0x252   :  { %1090 = vmatpush.bf16.msra.mxu2 %v4072_v58 }
 0x253   :  { %1155 = vmatpush.bf16.msra.mxu3 %v3994_v52  ;;  %1168 = vmatpush.bf16.msrb.mxu0 %v4055_v36 }
 0x256   :  { %1091 = vmatpush.bf16.msra.mxu2 %v4080_v6 }
 0x257   :  { %1156 = vmatpush.bf16.msra.mxu3 %v3997_v0  ;;  %1169 = vmatpush.bf16.msrb.mxu0 %v4070_v54 }
 0x25a   :  { %1092 = vmatpush.bf16.msra.mxu2 %v4100_v43 }
 0x25b   :  { %1157 = vmatpush.bf16.msra.mxu3 %v4000_v12  ;;  %1170 = vmatpush.bf16.msrb.mxu0 %v4076_v4 }
 0x25e   :  { %1093 = vmatpush.bf16.msra.mxu2 %v4108_v56 }
 0x25f   :  { %1158 = vmatpush.bf16.msra.mxu3 %v4008_v26  ;;  %1171 = vmatpush.bf16.msrb.mxu0 %v4098_v35 }
 0x262   :  { %1094 = vmatpush.bf16.msra.mxu2 %v4117_v13 }
 0x263   :  { %1159 = vmatpush.bf16.msra.mxu3 %v4011_v39  ;;  %1172 = vmatpush.bf16.msrb.mxu0 %v4104_v53 }
 0x2c3   :  { %v914_v30 = vpop.f32.mrf.mxu0 }
 0x2c8   :  { %v888_v37 = vpop.f32.mrf.mxu2  ;;  %v901_v59 = vpop.f32.mrf.mxu3 }
 0x2c9   :  { %v918_v24 = vadd.f32 %v888_v37, %v4179_v55  ;;  %v938_v31 = vadd.f32 %v901_v59, %v4187_v1 }
 0x2cb   :  { %v3226_v7 = vmul.f32 -1.442695, %v918_v24  ;;  %v3227_v47 = vmul.f32 -1.442695, %v938_v31  ;;  %v916_v2 = vpop.f32.mrf.mxu0  ;;  %v958_v24 = vadd.f32 %v4230_v44, %v914_v30 }
 0x2cd   :  { %3663 = vpow2.f32 %v3226_v7 }
 0x2ce   :  { %3665 = vpow2.f32 %v3227_v47 }
 0x2d0   :  { %v890_v32 = vpop.f32.mrf.mxu2  ;;  %v903_v33 = vpop.f32.mrf.mxu3 }
 0x2d3   :  { %v3664_v51 = vpop.eup %3663 }
 0x2d4   :  { %v3666_v45 = vpop.eup %3665  ;;  %v922_v34 = vadd.f32 1.0, %v3664_v51 }
 0x2d5   :  { %v942_v38 = vadd.f32 1.0, %v3666_v45 }
 0x2d6   :  { %3667 = vrcp.f32 %v922_v34  ;;  %v934_v55 = vand.u32 2147483648, %v922_v34  ;;  %v932_v11 = vand.u32 2147483647, %v922_v34  ;;  %vm928_vm2 = vweird.f32 %v922_v34 }
 0x2d7   :  { %3669 = vrcp.f32 %v942_v38  ;;  %v954_v51 = vand.u32 2147483648, %v942_v38  ;;  %vm948_vm6 = vweird.f32 %v942_v38  ;;  %v952_v45 = vand.u32 2147483647, %v942_v38 }
 0x2d8   :  { %v935_v37 = vor.u32 1.1754944e-38, %v934_v55  ;;  %vm933_vm4 = vcmp.eq.f32.partialorder %v932_v11, 8.507059e+37 }
 0x2d9   :  { %vm953_vm8 = vcmp.eq.f32.partialorder %v952_v45, 8.507059e+37 }
 0x2dc   :  { %v3668_v62 = vpop.eup %3667 }
 0x2dd   :  { %v3670_v42 = vpop.eup %3669  ;;  %v924_v9 = vmul.f32 %v3668_v62, %v922_v34  ;;  %vm929_vm1 = vweird.f32 %v3668_v62 }
 0x2de   :  { %v944_v46 = vmul.f32 %v3670_v42, %v942_v38  ;;  %vm930_vm3 = vmor %vm928_vm2, %vm929_vm1  ;;  %vm949_vm5 = vweird.f32 %v3670_v42  ;;  %v468_v38 = vadd.f32 %v4192_v8, %v4174_v49 }
 0x2df   :  { %v925_v17 = vsub.f32 1.0, %v924_v9  ;;  %vm950_vm7 = vmor %vm948_vm6, %vm949_vm5 }
 0x2e0   :  { %v945_v59 = vsub.f32 1.0, %v944_v46 }
 0x2e1   :  { %v926_v1 = vmul.f32 %v3668_v62, %v925_v17  ;;  %v955_v17 = vor.u32 1.1754944e-38, %v954_v51 }
 0x2e2   :  { %v946_v2 = vmul.f32 %v3670_v42, %v945_v59 }
 0x2e3   :  { %v927_v50 = vadd.f32 %v3668_v62, %v926_v1 }
 0x2e4   :  { %v947_v33 = vadd.f32 %v3670_v42, %v946_v2 }
 0x2e5   :  { %v931_v31 = vsel %vm930_vm3, %v3668_v62, %v927_v50  ;;  %v497_v50 = vadd.f32 %v4194_v25, %v4181_v57 }
 0x2e6   :  { %v936_v7 = vsel %vm933_vm4, %v935_v37, %v931_v31  ;;  %v951_v34 = vsel %vm950_vm7, %v3670_v42, %v947_v33 }
 0x2e7   :  { %v959_v47 = vmul.f32 %v958_v24, %v936_v7  ;;  %v956_v62 = vsel %vm953_vm8, %v955_v17, %v951_v34 }
 0x2e9   :  { %v960_v32 = vadd.f32 %v959_v47, %v4190_v5 }
 0x2eb   :  { %3671 = vtanh.f32 %v960_v32 }
 0x2f1   :  { %v3672_v9 = vpop.eup %3671 }
 0x2f2   :  { %v962_v30 = vsub.f32 %v4273_v20, %v3672_v9 }
 0x2f4   :  { %v963_v55 = vmul.f32 %v962_v30, %v956_v62 }
 0x2f6   :  { %v4306_v46 = vadd.f32 %v3672_v9, %v963_v55 }
 0x2f8   :  { %v969_v5 = vpack.c.bf16 %v4306_v46, %v4306_v46 }
 0x2fa   :  { %978 = vmatmul.bf16.vlgmr.msrb.gmra.mxu1 %v969_v5  ;;  %991 = vmatmul.bf16.vlgmr.msrb.gmra.mxu2 %v969_v5 }
 0x2fb   :  { %1004 = vmatmul.bf16.vlgmr.msrb.gmra.mxu3 %v969_v5  ;;  %1178 = vmatpush.bf16.msrb.mxu1 %v4027_v63 }
 0x2fc   :  { %1243 = vmatpush.bf16.msrb.mxu2 %v3985_v16  ;;  %1256 = vmatpush.bf16.msrb.mxu3 %v4018_v48 }
 0x2ff   :  { %1179 = vmatpush.bf16.msrb.mxu1 %v4042_v15 }
 0x300   :  { %1244 = vmatpush.bf16.msrb.mxu2 %v3988_v28  ;;  %1257 = vmatpush.bf16.msrb.mxu3 %v4025_v60 }
 0x303   :  { %1180 = vmatpush.bf16.msrb.mxu1 %v4058_v41 }
 0x304   :  { %1245 = vmatpush.bf16.msrb.mxu2 %v3991_v40  ;;  %1258 = vmatpush.bf16.msrb.mxu3 %v4039_v10 }
 0x307   :  { %1181 = vmatpush.bf16.msrb.mxu1 %v4072_v58 }
 0x308   :  { %1246 = vmatpush.bf16.msrb.mxu2 %v3994_v52  ;;  %1259 = vmatpush.bf16.msrb.mxu3 %v4055_v36 }
 0x30b   :  { %1182 = vmatpush.bf16.msrb.mxu1 %v4080_v6 }
 0x30c   :  { %1247 = vmatpush.bf16.msrb.mxu2 %v3997_v0  ;;  %1260 = vmatpush.bf16.msrb.mxu3 %v4070_v54 }
 0x30f   :  { %1183 = vmatpush.bf16.msrb.mxu1 %v4100_v43 }
 0x310   :  { %1248 = vmatpush.bf16.msrb.mxu2 %v4000_v12  ;;  %1261 = vmatpush.bf16.msrb.mxu3 %v4076_v4 }
 0x313   :  { %1184 = vmatpush.bf16.msrb.mxu1 %v4108_v56 }
 0x314   :  { %1249 = vmatpush.bf16.msrb.mxu2 %v4008_v26  ;;  %1262 = vmatpush.bf16.msrb.mxu3 %v4098_v35 }
 0x317   :  { %1185 = vmatpush.bf16.msrb.mxu1 %v4117_v13 }
 0x318   :  { %1250 = vmatpush.bf16.msrb.mxu2 %v4011_v39  ;;  %1263 = vmatpush.bf16.msrb.mxu3 %v4104_v53 }
 0x377   :  { %v979_v42 = vpop.f32.mrf.mxu1 }
 0x378   :  { %v1009_v1 = vadd.f32 %v979_v42, %v468_v38 }
 0x37a   :  { %v3228_v11 = vmul.f32 -1.442695, %v1009_v1 }
 0x37c   :  { %3673 = vpow2.f32 %v3228_v11 }
 0x37d   :  { %v992_v37 = vpop.f32.mrf.mxu2 }
 0x37e   :  { %v1029_v59 = vadd.f32 %v992_v37, %v497_v50  ;;  %v1005_v24 = vpop.f32.mrf.mxu3  ;;  %v526_v37 = vadd.f32 %v4196_v14, %v4184_v61 }
 0x37f   :  { %v981_v31 = vpop.f32.mrf.mxu1  ;;  %v1049_v11 = vadd.f32 %v4230_v44, %v1005_v24 }
 0x380   :  { %v3229_v7 = vmul.f32 -1.442695, %v1029_v59 }
 0x382   :  { %v3674_v47 = vpop.eup %3673  ;;  %3675 = vpow2.f32 %v3229_v7 }
 0x383   :  { %v1013_v2 = vadd.f32 1.0, %v3674_v47 }
 0x385   :  { %3677 = vrcp.f32 %v1013_v2  ;;  %v994_v32 = vpop.f32.mrf.mxu2  ;;  %v1025_v17 = vand.u32 2147483648, %v1013_v2  ;;  %v1023_v30 = vand.u32 2147483647, %v1013_v2  ;;  %vm1019_vm10 = vweird.f32 %v1013_v2 }
 0x386   :  { %v1007_v33 = vpop.f32.mrf.mxu3 }
 0x387   :  { %v1026_v38 = vor.u32 1.1754944e-38, %v1025_v17  ;;  %vm1024_vm12 = vcmp.eq.f32.partialorder %v1023_v30, 8.507059e+37 }
 0x388   :  { %v3676_v51 = vpop.eup %3675 }
 0x389   :  { %v1033_v8 = vadd.f32 1.0, %v3676_v51 }
 0x38b   :  { %v3678_v45 = vpop.eup %3677  ;;  %3679 = vrcp.f32 %v1033_v8  ;;  %v1045_v32 = vand.u32 2147483648, %v1033_v8  ;;  %vm1039_vm14 = vweird.f32 %v1033_v8 }
 0x38c   :  { %v1015_v34 = vmul.f32 %v3678_v45, %v1013_v2  ;;  %vm1020_vm9 = vweird.f32 %v3678_v45  ;;  %v1043_v2 = vand.u32 2147483647, %v1033_v8 }
 0x38d   :  { %vm1021_vm11 = vmor %vm1019_vm10, %vm1020_vm9 }
 0x38e   :  { %v1016_v9 = vsub.f32 1.0, %v1015_v34  ;;  %vm1044_vm0 = vcmp.eq.f32.partialorder %v1043_v2, 8.507059e+37 }
 0x390   :  { %v1017_v25 = vmul.f32 %v3678_v45, %v1016_v9 }
 0x391   :  { %v3680_v62 = vpop.eup %3679 }
 0x392   :  { %v1035_v55 = vmul.f32 %v3680_v62, %v1033_v8  ;;  %v1018_v5 = vadd.f32 %v3678_v45, %v1017_v25  ;;  %vm1040_vm13 = vweird.f32 %v3680_v62 }
 0x393   :  { %vm1041_vm15 = vmor %vm1039_vm14, %vm1040_vm13 }
 0x394   :  { %v1036_v42 = vsub.f32 1.0, %v1035_v55  ;;  %v1022_v1 = vsel %vm1021_vm11, %v3678_v45, %v1018_v5  ;;  %v1046_v45 = vor.u32 1.1754944e-38, %v1045_v32 }
 0x395   :  { %v1027_v50 = vsel %vm1024_vm12, %v1026_v38, %v1022_v1 }
 0x396   :  { %v1050_v59 = vmul.f32 %v1049_v11, %v1027_v50  ;;  %v1037_v31 = vmul.f32 %v3680_v62, %v1036_v42 }
 0x398   :  { %v1051_v7 = vadd.f32 %v1050_v59, %v526_v37  ;;  %v1038_v47 = vadd.f32 %v3680_v62, %v1037_v31 }
 0x39a   :  { %3681 = vtanh.f32 %v1051_v7  ;;  %v1042_v33 = vsel %vm1041_vm15, %v3680_v62, %v1038_v47 }
 0x39b   :  { %v1047_v34 = vsel %vm1044_vm0, %v1046_v45, %v1042_v33 }
 0x3a0   :  { %v3682_v51 = vpop.eup %3681 }
 0x3a1   :  { %v1053_v24 = vsub.f32 %v4306_v46, %v3682_v51 }
 0x3a3   :  { %v1054_v9 = vmul.f32 %v1053_v24, %v1047_v34 }
 0x3a5   :  { %v4342_v17 = vadd.f32 %v3682_v51, %v1054_v9  ;;  %v502_v9 = vadd.f32 %v4209_v27, %v4181_v57 }
 0x3a7   :  { %v1060_v14 = vpack.c.bf16 %v4342_v17, %v4342_v17 }
 0x3a9   :  { %1069 = vmatmul.bf16.vlgmr.msra.gmra.mxu0 %v1060_v14  ;;  %1082 = vmatmul.bf16.vlgmr.msra.gmra.mxu1 %v1060_v14 }
 0x3aa   :  { %1095 = vmatmul.bf16.vlgmr.msra.gmra.mxu2 %v1060_v14  ;;  %1269 = vmatpush.bf16.msra.mxu0 %v4027_v63 }
 0x3ab   :  { %1334 = vmatpush.bf16.msra.mxu1 %v3985_v16  ;;  %1347 = vmatpush.bf16.msra.mxu2 %v4018_v48 }
 0x3ae   :  { %1270 = vmatpush.bf16.msra.mxu0 %v4042_v15 }
 0x3af   :  { %1335 = vmatpush.bf16.msra.mxu1 %v3988_v28  ;;  %1348 = vmatpush.bf16.msra.mxu2 %v4025_v60 }
 0x3b2   :  { %1271 = vmatpush.bf16.msra.mxu0 %v4058_v41 }
 0x3b3   :  { %1336 = vmatpush.bf16.msra.mxu1 %v3991_v40  ;;  %1349 = vmatpush.bf16.msra.mxu2 %v4039_v10 }
 0x3b6   :  { %1272 = vmatpush.bf16.msra.mxu0 %v4072_v58 }
 0x3b7   :  { %1337 = vmatpush.bf16.msra.mxu1 %v3994_v52  ;;  %1350 = vmatpush.bf16.msra.mxu2 %v4055_v36 }
 0x3ba   :  { %1273 = vmatpush.bf16.msra.mxu0 %v4080_v6 }
 0x3bb   :  { %1338 = vmatpush.bf16.msra.mxu1 %v3997_v0  ;;  %1351 = vmatpush.bf16.msra.mxu2 %v4070_v54 }
 0x3be   :  { %1274 = vmatpush.bf16.msra.mxu0 %v4100_v43 }
 0x3bf   :  { %1339 = vmatpush.bf16.msra.mxu1 %v4000_v12  ;;  %1352 = vmatpush.bf16.msra.mxu2 %v4076_v4 }
 0x3c2   :  { %1275 = vmatpush.bf16.msra.mxu0 %v4108_v56 }
 0x3c3   :  { %1340 = vmatpush.bf16.msra.mxu1 %v4008_v26  ;;  %1353 = vmatpush.bf16.msra.mxu2 %v4098_v35 }
 0x3c6   :  { %1276 = vmatpush.bf16.msra.mxu0 %v4117_v13 }
 0x3c7   :  { %1341 = vmatpush.bf16.msra.mxu1 %v4011_v39  ;;  %1354 = vmatpush.bf16.msra.mxu2 %v4104_v53 }
 0x426   :  { %v1070_v16 = vpop.f32.mrf.mxu0  ;;  %v1083_v28 = vpop.f32.mrf.mxu1 }
 0x427   :  { %v1100_v40 = vadd.f32 %v1070_v16, %v4199_v19  ;;  %v1120_v52 = vadd.f32 %v1083_v28, %v4202_v21 }
 0x429   :  { %v3230_v0 = vmul.f32 -1.442695, %v1100_v40  ;;  %v3231_v12 = vmul.f32 -1.442695, %v1120_v52  ;;  %v3313_v40 = vld [vmem:[#allocation4 + $0x150] sm:$0xf] }
 0x42b   :  { %3683 = vpow2.f32 %v3230_v0 }
 0x42c   :  { %3685 = vpow2.f32 %v3231_v12 }
 0x42d   :  { %v1096_v48 = vpop.f32.mrf.mxu2 }
 0x42e   :  { %v1072_v26 = vpop.f32.mrf.mxu0  ;;  %v1085_v60 = vpop.f32.mrf.mxu1  ;;  %v1140_v1 = vadd.f32 %v4230_v44, %v1096_v48  ;;  %v3301_v48 = vld [vmem:[#allocation4 + $0x138] sm:$0xf] }
 0x42f   :  { %v3597_v26 = vld [vmem:[#allocation4 + $0x140] sm:$0xf0] }
 0x430   :  { %v3302_v60 = vor.u32 %v3597_v26, %v3301_v48  ;;  %v3422_v48 = vld [vmem:[#allocation6 + $0x168] sm:$0xf]  ;;  %v3579_v26 = vld [vmem:[#allocation6 + $0x170] sm:$0xf0] }
 0x431   :  { %v3684_v10 = vpop.eup %3683 }
 0x432   :  { %v3686_v36 = vpop.eup %3685  ;;  %v1104_v54 = vadd.f32 1.0, %v3684_v10  ;;  %v3289_v10 = vld [vmem:[#allocation4 + $0x120] sm:$0xf] }
 0x433   :  { %v1124_v4 = vadd.f32 1.0, %v3686_v36 }
 0x434   :  { %3687 = vrcp.f32 %v1104_v54  ;;  %v1116_v21 = vand.u32 2147483648, %v1104_v54  ;;  %v1114_v62 = vand.u32 2147483647, %v1104_v54  ;;  %vm1110_vm2 = vweird.f32 %v1104_v54 }
 0x435   :  { %3689 = vrcp.f32 %v1124_v4  ;;  %v1098_v39 = vpop.f32.mrf.mxu2  ;;  %v1136_v7 = vand.u32 2147483648, %v1124_v4  ;;  %vm1130_vm6 = vweird.f32 %v1124_v4  ;;  %v1134_v47 = vand.u32 2147483647, %v1124_v4 }
 0x436   :  { %v1117_v38 = vor.u32 1.1754944e-38, %v1116_v21  ;;  %vm1115_vm4 = vcmp.eq.f32.partialorder %v1114_v62, 8.507059e+37  ;;  %v3265_v21 = vld [vmem:[#allocation4 + $0xf0] sm:$0xf] }
 0x437   :  { %v1137_v33 = vor.u32 1.1754944e-38, %v1136_v7  ;;  %vm1135_vm8 = vcmp.eq.f32.partialorder %v1134_v47, 8.507059e+37  ;;  %v3241_v47 = vld [vmem:[#allocation4 + $0xc0] sm:$0xf] }
 0x43a   :  { %v3688_v35 = vpop.eup %3687 }
 0x43b   :  { %v3690_v53 = vpop.eup %3689  ;;  %v1106_v8 = vmul.f32 %v3688_v35, %v1104_v54  ;;  %vm1111_vm1 = vweird.f32 %v3688_v35 }
 0x43c   :  { %v1126_v25 = vmul.f32 %v3690_v53, %v1124_v4  ;;  %vm1112_vm3 = vmor %vm1110_vm2, %vm1111_vm1  ;;  %vm1131_vm5 = vweird.f32 %v3690_v53 }
 0x43d   :  { %v1107_v19 = vsub.f32 1.0, %v1106_v8  ;;  %vm1132_vm7 = vmor %vm1130_vm6, %vm1131_vm5  ;;  %v3277_v8 = vld [vmem:[#allocation4 + $0x108] sm:$0xf] }
 0x43e   :  { %v1127_v5 = vsub.f32 1.0, %v1126_v25 }
 0x43f   :  { %v1108_v30 = vmul.f32 %v3688_v35, %v1107_v19  ;;  %v3591_v19 = vld [vmem:[#allocation4 + $0x110] sm:$0xf0] }
 0x440   :  { %v1128_v37 = vmul.f32 %v3690_v53, %v1127_v5  ;;  %v3278_v25 = vor.u32 %v3591_v19, %v3277_v8 }
 0x441   :  { %v1109_v55 = vadd.f32 %v3688_v35, %v1108_v30  ;;  %v3588_v30 = vld [vmem:[#allocation4 + $0xf8] sm:$0xf0] }
 0x442   :  { %v1129_v31 = vadd.f32 %v3690_v53, %v1128_v37 }
 0x443   :  { %v1113_v42 = vsel %vm1112_vm3, %v3688_v35, %v1109_v55  ;;  %v3266_v55 = vor.u32 %v3588_v30, %v3265_v21  ;;  %v3327_v21 = vld [vmem:[#allocation4 + $0x174] sm:$0xf0]  ;;  %v3333_v30 = vld [vmem:[#allocation4 + $0x170] sm:$0xf] }
 0x444   :  { %v1118_v11 = vsel %vm1115_vm4, %v1117_v38, %v1113_v42  ;;  %v1133_v32 = vsel %vm1132_vm7, %v3690_v53, %v1129_v31  ;;  %v3253_v42 = vld [vmem:[#allocation4 + $0xd8] sm:$0xf] }
 0x445   :  { %v1141_v50 = vmul.f32 %v1140_v1, %v1118_v11  ;;  %v1138_v45 = vsel %vm1135_vm8, %v1137_v33, %v1133_v32  ;;  %v3585_v1 = vld [vmem:[#allocation4 + $0xe0] sm:$0xf0]  ;;  %v3582_v32 = vld [vmem:[#allocation4 + $0xc8] sm:$0xf0] }
 0x447   :  { %v1142_v59 = vadd.f32 %v1141_v50, %v4205_v22 }
 0x449   :  { %3691 = vtanh.f32 %v1142_v59  ;;  %v3254_v59 = vor.u32 %v3585_v1, %v3253_v42 }
 0x44f   :  { %v3692_v2 = vpop.eup %3691 }
 0x450   :  { %v1144_v51 = vsub.f32 %v4342_v17, %v3692_v2 }
 0x452   :  { %v1145_v24 = vmul.f32 %v1144_v51, %v1138_v45  ;;  %v3242_v45 = vor.u32 %v3582_v32, %v3241_v47 }
 0x454   :  { %v4375_v34 = vadd.f32 %v3692_v2, %v1145_v24 }
 0x456   :  { %v1151_v22 = vpack.c.bf16 %v4375_v34, %v4375_v34 }
 0x458   :  { %1160 = vmatmul.bf16.vlgmr.msra.gmra.mxu3 %v1151_v22  ;;  %1173 = vmatmul.bf16.vlgmr.msrb.gmra.mxu0 %v1151_v22 }
 0x459   :  { %1186 = vmatmul.bf16.vlgmr.msrb.gmra.mxu1 %v1151_v22  ;;  %1360 = vmatpush.bf16.msra.mxu3 %v4027_v63 }
 0x45d   :  { %1361 = vmatpush.bf16.msra.mxu3 %v4042_v15  ;;  %v473_v15 = vadd.f32 %v4207_v23, %v4174_v49  ;;  %v3594_v23 = vld [vmem:[#allocation4 + $0x128] sm:$0xf0] }
 0x45e   :  { %v3290_v4 = vor.u32 %v3594_v23, %v3289_v10  ;;  %v3573_v23 = vld [vmem:[#allocation6 + $0x140] sm:$0xf0] }
 0x461   :  { %1362 = vmatpush.bf16.msra.mxu3 %v4058_v41  ;;  %v3325_v41 = vld [vmem:[#allocation4 + $0x168] sm:$0xf] }
 0x465   :  { %1363 = vmatpush.bf16.msra.mxu3 %v4072_v58  ;;  %v3603_v58 = vld [vmem:[#allocation4 + $0x170] sm:$0xf0] }
 0x466   :  { %v3326_v52 = vor.u32 %v3603_v58, %v3325_v41 }
 0x468   :  { %1636 = vmatpush.bf16.msrb.mxu0 %v3326_v52 }
 0x469   :  { %1364 = vmatpush.bf16.msra.mxu3 %v4080_v6 }
 0x46d   :  { %1365 = vmatpush.bf16.msra.mxu3 %v4100_v43  ;;  %v3600_v43 = vld [vmem:[#allocation4 + $0x158] sm:$0xf0] }
 0x471   :  { %1366 = vmatpush.bf16.msra.mxu3 %v4108_v56 }
 0x475   :  { %1367 = vmatpush.bf16.msra.mxu3 %v4117_v13  ;;  %v3314_v13 = vor.u32 %v3600_v43, %v3313_v40 }
 0x477   :  { %1637 = vmatpush.bf16.msrb.mxu0 %v3314_v13  ;;  %v4401_v13 = vpack.c.bf16 %v4273_v20, %v4235_v3  ;;  %v3410_v3 = vld [vmem:[#allocation6 + $0x150] sm:$0xf]  ;;  %v3576_v20 = vld [vmem:[#allocation6 + $0x158] sm:$0xf0] }
 0x478   :  { %v4417_v10 = vor.u32 %v3576_v20, %v3410_v3  ;;  %v3338_v20 = vld [vmem:[#allocation6 + $0xc0] sm:$0xf] }
 0x47b   :  { %1638 = vmatpush.bf16.msrb.mxu0 %v3302_v60  ;;  %v4414_v60 = vor.u32 %v3579_v26, %v3422_v48  ;;  %v3595_v48 = vld [vmem:[#allocation4 + $0x130] sm:$0xf0] }
 0x47f   :  { %1639 = vmatpush.bf16.msrb.mxu0 %v3290_v4  ;;  %v3386_v4 = vld [vmem:[#allocation6 + $0x120] sm:$0xf] }
 0x483   :  { %1640 = vmatpush.bf16.msrb.mxu0 %v3278_v25  ;;  %v3602_v25 = vld [vmem:[#allocation4 + $0x16c] sm:$0xf] }
 0x487   :  { %1641 = vmatpush.bf16.msrb.mxu0 %v3266_v55  ;;  %v3604_v55 = vld [vmem:[#allocation4 + $0x178] sm:$0xf0] }
 0x488   :  { %v3334_v1 = vor.u32 %v3604_v55, %v3333_v30  ;;  %v3273_v30 = vld [vmem:[#allocation4 + $0xf8] sm:$0xf] }
 0x48b   :  { %1642 = vmatpush.bf16.msrb.mxu0 %v3254_v59  ;;  %v3315_v59 = vld [vmem:[#allocation4 + $0x15c] sm:$0xf0] }
 0x48f   :  { %1643 = vmatpush.bf16.msrb.mxu0 %v3242_v45  ;;  %v3564_v45 = vld [vmem:[#allocation6 + $0xf8] sm:$0xf0] }
 0x4d5   :  { %v1174_v14 = vpop.f32.mrf.mxu0 }
 0x4d6   :  { %v1211_v16 = vadd.f32 %v1174_v14, %v502_v9  ;;  %v1187_v63 = vpop.f32.mrf.mxu1  ;;  %v531_v14 = vadd.f32 %v4211_v29, %v4184_v61 }
 0x4d7   :  { %v1231_v24 = vadd.f32 %v4230_v44, %v1187_v63 }
 0x4d8   :  { %v3233_v28 = vmul.f32 -1.442695, %v1211_v16 }
 0x4da   :  { %3693 = vpow2.f32 %v3233_v28 }
 0x4db   :  { %v1161_v6 = vpop.f32.mrf.mxu3 }
 0x4dc   :  { %v1191_v0 = vadd.f32 %v1161_v6, %v473_v15 }
 0x4dd   :  { %v1176_v56 = vpop.f32.mrf.mxu0 }
 0x4de   :  { %v3232_v12 = vmul.f32 -1.442695, %v1191_v0  ;;  %v1189_v27 = vpop.f32.mrf.mxu1 }
 0x4e0   :  { %3695 = vpow2.f32 %v3232_v12  ;;  %v3694_v36 = vpop.eup %3693  ;;  %v4406_v12 = vpack.c.bf16 %v4342_v17, %v4306_v46  ;;  %v3398_v17 = vld [vmem:[#allocation6 + $0x138] sm:$0xf] }
 0x4e1   :  { %v1215_v35 = vadd.f32 1.0, %v3694_v36 }
 0x4e3   :  { %v1163_v54 = vpop.f32.mrf.mxu3  ;;  %v1227_v58 = vand.u32 2147483648, %v1215_v35  ;;  %vm1221_vm14 = vweird.f32 %v1215_v35  ;;  %v1225_v40 = vand.u32 2147483647, %v1215_v35 }
 0x4e5   :  { %v1228_v44 = vor.u32 1.1754944e-38, %v1227_v58  ;;  %vm1226_vm0 = vcmp.eq.f32.partialorder %v1225_v40, 8.507059e+37 }
 0x4e6   :  { %v3696_v39 = vpop.eup %3695 }
 0x4e7   :  { %v1195_v53 = vadd.f32 1.0, %v3696_v39  ;;  %v3570_v39 = vld [vmem:[#allocation6 + $0x128] sm:$0xf0] }
 0x4e8   :  { %v4427_v19 = vor.u32 %v3570_v39, %v3386_v4  ;;  %v3285_v39 = vld [vmem:[#allocation4 + $0x110] sm:$0xf] }
 0x4e9   :  { %3697 = vrcp.f32 %v1195_v53  ;;  %v1207_v37 = vand.u32 2147483648, %v1195_v53  ;;  %v1205_v7 = vand.u32 2147483647, %v1195_v53  ;;  %vm1201_vm10 = vweird.f32 %v1195_v53 }
 0x4ea   :  { %3699 = vrcp.f32 %v1215_v35 }
 0x4eb   :  { %v1208_v51 = vor.u32 1.1754944e-38, %v1207_v37  ;;  %vm1206_vm12 = vcmp.eq.f32.partialorder %v1205_v7, 8.507059e+37  ;;  %v3599_v37 = vld [vmem:[#allocation4 + $0x154] sm:$0xf]  ;;  %v3601_v7 = vld [vmem:[#allocation4 + $0x160] sm:$0xf0] }
 0x4ec   :  { %v3318_v47 = vor.u32 %v3599_v37, %v3315_v59  ;;  %v3584_v37 = vld [vmem:[#allocation4 + $0xdc] sm:$0xf]  ;;  %v3255_v59 = vld [vmem:[#allocation4 + $0xe4] sm:$0xf0] }
 0x4ef   :  { %v3698_v62 = vpop.eup %3697 }
 0x4f0   :  { %v3700_v5 = vpop.eup %3699  ;;  %v1197_v38 = vmul.f32 %v3698_v62, %v1195_v53  ;;  %vm1202_vm9 = vweird.f32 %v3698_v62  ;;  %v5076_v53 = vld [vmem:[#allocation10_spill] sm:$0xff] }
 0x4f1   :  { %v1217_v50 = vmul.f32 %v3700_v5, %v1215_v35  ;;  %vm1203_vm11 = vmor %vm1201_vm10, %vm1202_vm9  ;;  %vm1222_vm13 = vweird.f32 %v3700_v5 }
 0x4f2   :  { %v1198_v11 = vsub.f32 1.0, %v1197_v38  ;;  %vm1223_vm15 = vmor %vm1221_vm14, %vm1222_vm13 }
 0x4f3   :  { %v1218_v33 = vsub.f32 1.0, %v1217_v50  ;;  %v3567_v50 = vld [vmem:[#allocation6 + $0x110] sm:$0xf0] }
 0x4f4   :  { %v1199_v31 = vmul.f32 %v3698_v62, %v1198_v11  ;;  %v3374_v11 = vld [vmem:[#allocation6 + $0x108] sm:$0xf] }
 0x4f5   :  { %v1219_v28 = vmul.f32 %v3700_v5, %v1218_v33 }
 0x4f6   :  { %v1200_v2 = vadd.f32 %v3698_v62, %v1199_v31  ;;  %v3321_v31 = vld [vmem:[#allocation4 + $0x158] sm:$0xf] }
 0x4f7   :  { %v1220_v41 = vadd.f32 %v3700_v5, %v1219_v28  ;;  %v3322_v32 = vor.u32 %v3601_v7, %v3321_v31  ;;  %v3598_v28 = vld [vmem:[#allocation4 + $0x148] sm:$0xf0] }
 0x4f8   :  { %v1204_v22 = vsel %vm1203_vm11, %v3698_v62, %v1200_v2  ;;  %v3330_v62 = vor.u32 %v3602_v25, %v3327_v21  ;;  %v3587_v25 = vld [vmem:[#allocation4 + $0xf4] sm:$0xf]  ;;  %v3267_v21 = vld [vmem:[#allocation4 + $0xfc] sm:$0xf0] }
 0x4f9   :  { %v1209_v9 = vsel %vm1206_vm12, %v1208_v51, %v1204_v22  ;;  %v1224_v6 = vsel %vm1223_vm15, %v3700_v5, %v1220_v41  ;;  %v3362_v51 = vld [vmem:[#allocation6 + $0xf0] sm:$0xf]  ;;  %v3596_v22 = vld [vmem:[#allocation4 + $0x13c] sm:$0xf] }
 0x4fa   :  { %v1232_v16 = vmul.f32 %v1231_v24, %v1209_v9  ;;  %v1229_v43 = vsel %vm1226_vm0, %v1228_v44, %v1224_v6  ;;  %1665 = vmatpush.bf16.msrb.mxu1 %v3330_v62  ;;  %v4433_v24 = vor.u32 %v3564_v45, %v3362_v51  ;;  %v3303_v9 = vld [vmem:[#allocation4 + $0x144] sm:$0xf0]  ;;  %v3350_v6 = vld [vmem:[#allocation6 + $0xd8] sm:$0xf] }
 0x4fc   :  { %v1233_v15 = vadd.f32 %v1232_v16, %v531_v14  ;;  %v3309_v14 = vld [vmem:[#allocation4 + $0x140] sm:$0xf]  ;;  %v3306_v16 = vor.u32 %v3596_v22, %v3303_v9  ;;  %v3581_v9 = vld [vmem:[#allocation4 + $0xc4] sm:$0xf] }
 0x4fd   :  { %v3310_v41 = vor.u32 %v3598_v28, %v3309_v14  ;;  %v3243_v14 = vld [vmem:[#allocation4 + $0xcc] sm:$0xf0]  ;;  %v4456_v28 = vld [vmem:[%s5061_s6] ss:$0 sm:$0xff] }
 0x4fe   :  { %3701 = vtanh.f32 %v1233_v15  ;;  %1666 = vmatpush.bf16.msrb.mxu1 %v3318_v47  ;;  %v3261_v47 = vld [vmem:[#allocation4 + $0xe0] sm:$0xf] }
 0x502   :  { %1667 = vmatpush.bf16.msrb.mxu1 %v3306_v16  ;;  %v3249_v16 = vld [vmem:[#allocation4 + $0xc8] sm:$0xf] }
 0x504   :  { %v3702_v52 = vpop.eup %3701 }
 0x505   :  { %v1235_v63 = vsub.f32 %v4375_v34, %v3702_v52 }
 0x507   :  { %v1236_v0 = vmul.f32 %v1235_v63, %v1229_v43  ;;  %v3593_v43 = vld [vmem:[#allocation4 + $0x124] sm:$0xf] }
 0x509   :  { %v4395_v29 = vadd.f32 %v3702_v52, %v1236_v0  ;;  %v3561_v52 = vld [vmem:[#allocation6 + $0xe0] sm:$0xf0]  ;;  %v3291_v0 = vld [vmem:[#allocation4 + $0x12c] sm:$0xf0] }
 0x50a   :  { %v4440_v63 = vor.u32 %v3561_v52, %v3350_v6  ;;  %v3294_v26 = vor.u32 %v3593_v43, %v3291_v0  ;;  %v3246_v6 = vor.u32 %v3581_v9, %v3243_v14  ;;  %v5079_v14 = vld [vmem:[#allocation12_spill] sm:$0xff] }
 0x50b   :  { %v1242_v56 = vpack.c.bf16 %v4395_v29, %v4395_v29  ;;  %v4411_v27 = vpack.c.bf16 %v4395_v29, %v4375_v34  ;;  %v4422_v34 = vor.u32 %v3573_v23, %v3398_v17  ;;  %v3558_v17 = vld [vmem:[#allocation6 + $0xc8] sm:$0xf0] }
 0x50c   :  { %v4445_v23 = vor.u32 %v3558_v17, %v3338_v20  ;;  %1668 = vmatpush.bf16.msrb.mxu1 %v3294_v26 }
 0x50d   :  { %1251 = vmatmul.bf16.vlgmr.msrb.gmra.mxu2 %v1242_v56  ;;  %1264 = vmatmul.bf16.vlgmr.msrb.gmra.mxu3 %v1242_v56 }
 0x50e   :  { %1277 = vmatmul.bf16.vlgmr.msra.gmra.mxu0 %v1242_v56  ;;  %1883 = vmatpush.bf16.msrb.mxu3 %v4414_v60  ;;  %v3297_v56 = vld [vmem:[#allocation4 + $0x128] sm:$0xf] }
 0x50f   :  { %1694 = vmatpush.bf16.msrb.mxu2 %v3334_v1  ;;  %v3298_v3 = vor.u32 %v3595_v48, %v3297_v56  ;;  %v5077_v56 = vld [vmem:[#allocation11_spill] sm:$0xff] }
 0x512   :  { %1884 = vmatpush.bf16.msrb.mxu3 %v4417_v10 }
 0x513   :  { %1695 = vmatpush.bf16.msrb.mxu2 %v3322_v32  ;;  %v3586_v32 = vld [vmem:[#allocation4 + $0xe8] sm:$0xf0] }
 0x516   :  { %1885 = vmatpush.bf16.msrb.mxu3 %v4422_v34 }
 0x517   :  { %1696 = vmatpush.bf16.msrb.mxu2 %v3310_v41 }
 0x51a   :  { %1886 = vmatpush.bf16.msrb.mxu3 %v4427_v19 }
 0x51b   :  { %1697 = vmatpush.bf16.msrb.mxu2 %v3298_v3 }
 0x51e   :  { %1644 = vmatmul.bf16.vlgmr.msrb.gmra.mxu0 %v4401_v13 }
 0x52e   :  { %1649 = vmatmul.bf16.gmra.mxu0 %v4406_v12 }
 0x53e   :  { %1654 = vmatmul.bf16.gmra.mxu0 %v4411_v27 }
 0x58b   :  { %v4419_v46 = vpop.f32.mrf.mxu0 }
 0x590   :  { %v1252_v36 = vpop.f32.mrf.mxu2  ;;  %v1265_v54 = vpop.f32.mrf.mxu3 }
 0x591   :  { %v1282_v35 = vadd.f32 %v1252_v36, %v4214_v18  ;;  %v1302_v8 = vadd.f32 %v1265_v54, %v5076_v53  ;;  %v4430_v18 = vor.u32 %v3567_v50, %v3374_v11  ;;  %v3590_v36 = vld [vmem:[#allocation4 + $0x10c] sm:$0xf]  ;;  %v3279_v54 = vld [vmem:[#allocation4 + $0x114] sm:$0xf0] }
 0x592   :  { %v3282_v4 = vor.u32 %v3590_v36, %v3279_v54 }
 0x593   :  { %v3234_v5 = vmul.f32 -1.442695, %v1282_v35  ;;  %v3235_v38 = vmul.f32 -1.442695, %v1302_v8  ;;  %v1280_v42 = vpop.f32.mrf.mxu0  ;;  %1887 = vmatpush.bf16.msrb.mxu3 %v4430_v18  ;;  %v3592_v35 = vld [vmem:[#allocation4 + $0x118] sm:$0xf0] }
 0x594   :  { %v3286_v53 = vor.u32 %v3592_v35, %v3285_v39  ;;  %1669 = vmatpush.bf16.msrb.mxu1 %v3282_v4  ;;  %v3578_v35 = vld [vmem:[#allocation6 + $0x16c] sm:$0xf] }
 0x595   :  { %3703 = vpow2.f32 %v3234_v5  ;;  %v3589_v5 = vld [vmem:[#allocation4 + $0x100] sm:$0xf0] }
 0x596   :  { %3705 = vpow2.f32 %v3235_v38  ;;  %1698 = vmatpush.bf16.msrb.mxu2 %v3286_v53  ;;  %v3270_v38 = vor.u32 %v3587_v25, %v3267_v21  ;;  %v3274_v42 = vor.u32 %v3589_v5, %v3273_v30  ;;  %v3424_v53 = vld [vmem:[#allocation6 + $0x174] sm:$0xf0]  ;;  %v3575_v30 = vld [vmem:[#allocation6 + $0x154] sm:$0xf] }
 0x597   :  { %1888 = vmatpush.bf16.msrb.mxu3 %v4433_v24  ;;  %v4469_v21 = vor.u32 %v3578_v35, %v3424_v53 }
 0x598   :  { %v1254_v2 = vpop.f32.mrf.mxu2  ;;  %v1267_v33 = vpop.f32.mrf.mxu3  ;;  %1670 = vmatpush.bf16.msrb.mxu1 %v3270_v38  ;;  %v3569_v38 = vld [vmem:[#allocation6 + $0x124] sm:$0xf] }
 0x599   :  { %v3258_v2 = vor.u32 %v3584_v37, %v3255_v59  ;;  %v3262_v33 = vor.u32 %v3586_v32, %v3261_v47  ;;  %v3563_v59 = vld [vmem:[#allocation6 + $0xf4] sm:$0xf]  ;;  %v3560_v32 = vld [vmem:[#allocation6 + $0xdc] sm:$0xf] }
 0x59a   :  { %1699 = vmatpush.bf16.msrb.mxu2 %v3274_v42  ;;  %v3388_v42 = vld [vmem:[#allocation6 + $0x12c] sm:$0xf0] }
 0x59b   :  { %v3704_v15 = vpop.eup %3703  ;;  %1889 = vmatpush.bf16.msrb.mxu3 %v4440_v63 }
 0x59c   :  { %v3706_v58 = vpop.eup %3705  ;;  %v4436_v40 = vadd.f32 1.0, %v3704_v15  ;;  %v1322_v15 = vadd.f32 %v4456_v28, %v4419_v46  ;;  %1671 = vmatpush.bf16.msrb.mxu1 %v3258_v2  ;;  %v3352_v2 = vld [vmem:[#allocation6 + $0xe4] sm:$0xf0] }
 0x59d   :  { %v4438_v44 = vadd.f32 1.0, %v3706_v58  ;;  %v3583_v58 = vld [vmem:[#allocation4 + $0xd0] sm:$0xf0] }
 0x59e   :  { %3707 = vrcp.f32 %v4436_v40  ;;  %v1298_v11 = vand.u32 2147483648, %v4436_v40  ;;  %v1296_v7 = vand.u32 2147483647, %v4436_v40  ;;  %vm1292_vm2 = vweird.f32 %v4436_v40  ;;  %1700 = vmatpush.bf16.msrb.mxu2 %v3262_v33 }
 0x59f   :  { %3709 = vrcp.f32 %v4438_v44  ;;  %1890 = vmatpush.bf16.msrb.mxu3 %v4445_v23  ;;  %v3250_v52 = vor.u32 %v3583_v58, %v3249_v16  ;;  %v1318_v3 = vand.u32 2147483648, %v4438_v44  ;;  %vm1312_vm6 = vweird.f32 %v4438_v44  ;;  %v3418_v58 = vld [vmem:[#allocation6 + $0x158] sm:$0xf] }
 0x5a0   :  { %v1299_v45 = vor.u32 1.1754944e-38, %v1298_v11  ;;  %vm1297_vm4 = vcmp.eq.f32.partialorder %v1296_v7, 8.507059e+37  ;;  %1672 = vmatpush.bf16.msrb.mxu1 %v3246_v6  ;;  %v1316_v46 = vand.u32 2147483647, %v4438_v44  ;;  %v3566_v11 = vld [vmem:[#allocation6 + $0x10c] sm:$0xf]  ;;  %v4501_v33 = vor.u32 %v3560_v32, %v3352_v2 }
 0x5a1   :  { %v1319_v36 = vor.u32 1.1754944e-38, %v1318_v3  ;;  %v5078_v7 = vmov 0   ;;  %v478_v16 = vadd.f32 %v5079_v14, %v4174_v49 }
 0x5a2   :  { %1701 = vmatpush.bf16.msrb.mxu2 %v3250_v52  ;;  %vm1317_vm8 = vcmp.eq.f32.partialorder %v1316_v46, 8.507059e+37  ;;  %v3406_v52 = vld [vmem:[#allocation6 + $0x140] sm:$0xf]  ;;  %v3394_v46 = vld [vmem:[#allocation6 + $0x128] sm:$0xf] }
 0x5a4   :  { %v3708_v8 = vpop.eup %3707 }
 0x5a5   :  { %v3710_v62 = vpop.eup %3709  ;;  %v1288_v55 = vmul.f32 %v3708_v8, %v4436_v40  ;;  %vm1293_vm1 = vweird.f32 %v3708_v8 }
 0x5a6   :  { %v1308_v50 = vmul.f32 %v3710_v62, %v4438_v44  ;;  %vm1294_vm3 = vmor %vm1292_vm2, %vm1293_vm1  ;;  %vm1313_vm5 = vweird.f32 %v3710_v62  ;;  %v3412_v44 = vld [vmem:[#allocation6 + $0x15c] sm:$0xf0] }
 0x5a7   :  { %v1289_v1 = vsub.f32 1.0, %v1288_v55  ;;  %vm1314_vm7 = vmor %vm1312_vm6, %vm1313_vm5  ;;  %v3400_v55 = vld [vmem:[#allocation6 + $0x144] sm:$0xf0] }
 0x5a8   :  { %v1309_v22 = vsub.f32 1.0, %v1308_v50  ;;  %v3376_v50 = vld [vmem:[#allocation6 + $0x114] sm:$0xf0] }
 0x5a9   :  { %v1290_v31 = vmul.f32 %v3708_v8, %v1289_v1  ;;  %v4483_v1 = vor.u32 %v3569_v38, %v3388_v42  ;;  %v4488_v37 = vor.u32 %v3566_v11, %v3376_v50  ;;  %v3370_v42 = vld [vmem:[#allocation6 + $0xf8] sm:$0xf]  ;;  %v3565_v11 = vld [vmem:[#allocation6 + $0x100] sm:$0xf0] }
 0x5aa   :  { %v1310_v0 = vmul.f32 %v3710_v62, %v1309_v22  ;;  %v3580_v22 = vld [vmem:[#allocation6 + $0x178] sm:$0xf0]  ;;  %v4557_v50 = vor.u32 %v3565_v11, %v3370_v42 }
 0x5ab   :  { %v1291_v51 = vadd.f32 %v3708_v8, %v1290_v31  ;;  %v3364_v31 = vld [vmem:[#allocation6 + $0xfc] sm:$0xf0] }
 0x5ac   :  { %v1311_v26 = vadd.f32 %v3710_v62, %v1310_v0  ;;  %v4496_v47 = vor.u32 %v3563_v59, %v3364_v31  ;;  %v5080_v0 = vld [vmem:[#allocation13_spill] sm:$0xff] }
 0x5ad   :  { %v1295_v41 = vsel %vm1294_vm3, %v3708_v8, %v1291_v51  ;;  %v3340_v51 = vld [vmem:[#allocation6 + $0xcc] sm:$0xf0] }
 0x5ae   :  { %v1300_v40 = vsel %vm1297_vm4, %v1299_v45, %v1295_v41  ;;  %v1315_v20 = vsel %vm1314_vm7, %v3710_v62, %v1311_v26  ;;  %v3572_v62 = vld [vmem:[#allocation6 + $0x13c] sm:$0xf] }
 0x5af   :  { %v1323_v43 = vmul.f32 %v1322_v15, %v1300_v40  ;;  %v1320_v4 = vsel %vm1317_vm8, %v1319_v36, %v1315_v20  ;;  %v4478_v5 = vor.u32 %v3572_v62, %v3400_v55  ;;  %v3577_v40 = vld [vmem:[#allocation6 + $0x160] sm:$0xf0]  ;;  %v3571_v20 = vld [vmem:[#allocation6 + $0x130] sm:$0xf0] }
 0x5b0   :  { %v4532_v6 = vor.u32 %v3577_v40, %v3418_v58 }
 0x5b1   :  { %v1324_v48 = vadd.f32 %v1323_v43, %v5077_v56  ;;  %v3574_v43 = vld [vmem:[#allocation6 + $0x148] sm:$0xf0]  ;;  %v507_v56 = vadd.f32 %v5080_v0, %v4181_v57 }
 0x5b2   :  { %v4537_v26 = vor.u32 %v3574_v43, %v3406_v52  ;;  %v3346_v52 = vld [vmem:[#allocation6 + $0xc8] sm:$0xf]  ;;  %v3559_v43 = vld [vmem:[#allocation6 + $0xd0] sm:$0xf0] }
 0x5b3   :  { %3711 = vtanh.f32 %v1324_v48 }
 0x5b9   :  { %v3712_v17 = vpop.eup %3711 }
 0x5ba   :  { %v1326_v54 = vsub.f32 %v4395_v29, %v3712_v17  ;;  %v4473_v29 = vor.u32 %v3575_v30, %v3412_v44 }
 0x5bc   :  { %v1327_v39 = vmul.f32 %v1326_v54, %v1320_v4  ;;  %v4542_v54 = vor.u32 %v3571_v20, %v3394_v46  ;;  %v3382_v4 = vld [vmem:[#allocation6 + $0x110] sm:$0xf] }
 0x5be   :  { %v4465_v8 = vadd.f32 %v3712_v17, %v1327_v39  ;;  %v3568_v39 = vld [vmem:[#allocation6 + $0x118] sm:$0xf0] }
 0x5c0   :  { %v1333_v25 = vpack.c.bf16 %v4465_v8, %v4465_v8 }
 0x5c2   :  { %1342 = vmatmul.bf16.vlgmr.msra.gmra.mxu1 %v1333_v25  ;;  %1355 = vmatmul.bf16.vlgmr.msra.gmra.mxu2 %v1333_v25 }
 0x5c3   :  { %1368 = vmatmul.bf16.vlgmr.msra.gmra.mxu3 %v1333_v25  ;;  %1974 = vmatpush.bf16.msra.mxu1 %v4414_v60  ;;  %v4547_v25 = vor.u32 %v3568_v39, %v3382_v4 }
 0x5c4   :  { %1896 = vmatpush.bf16.msra.mxu3 %v4469_v21  ;;  %1987 = vmatpush.bf16.msra.mxu2 %v4469_v21 }
 0x5c7   :  { %1975 = vmatpush.bf16.msra.mxu1 %v4417_v10 }
 0x5c8   :  { %1897 = vmatpush.bf16.msra.mxu3 %v4473_v29  ;;  %1988 = vmatpush.bf16.msra.mxu2 %v4473_v29 }
 0x5cb   :  { %1976 = vmatpush.bf16.msra.mxu1 %v4422_v34 }
 0x5cc   :  { %1898 = vmatpush.bf16.msra.mxu3 %v4478_v5  ;;  %1989 = vmatpush.bf16.msra.mxu2 %v4478_v5 }
 0x5cf   :  { %1977 = vmatpush.bf16.msra.mxu1 %v4427_v19 }
 0x5d0   :  { %1899 = vmatpush.bf16.msra.mxu3 %v4483_v1  ;;  %1990 = vmatpush.bf16.msra.mxu2 %v4483_v1 }
 0x5d2   :  { %1673 = vmatmul.bf16.vlgmr.msrb.gmra.mxu1 %v4401_v13  ;;  %1702 = vmatmul.bf16.vlgmr.msrb.gmra.mxu2 %v4401_v13  ;;  %v3557_v13 = vld [vmem:[#allocation6 + $0xc4] sm:$0xf] }
 0x5d3   :  { %1891 = vmatmul.bf16.vlgmr.msrb.gmra.mxu3 %v5078_v7  ;;  %1978 = vmatpush.bf16.msra.mxu1 %v4430_v18  ;;  %v4506_v45 = vor.u32 %v3557_v13, %v3340_v51  ;;  %v3358_v51 = vld [vmem:[#allocation6 + $0xe0] sm:$0xf] }
 0x5d4   :  { %1900 = vmatpush.bf16.msra.mxu3 %v4488_v37  ;;  %1991 = vmatpush.bf16.msra.mxu2 %v4488_v37 }
 0x5d7   :  { %1979 = vmatpush.bf16.msra.mxu1 %v4433_v24 }
 0x5d8   :  { %1901 = vmatpush.bf16.msra.mxu3 %v4496_v47  ;;  %1992 = vmatpush.bf16.msra.mxu2 %v4496_v47 }
 0x5db   :  { %1980 = vmatpush.bf16.msra.mxu1 %v4440_v63 }
 0x5dc   :  { %1902 = vmatpush.bf16.msra.mxu3 %v4501_v33  ;;  %1993 = vmatpush.bf16.msra.mxu2 %v4501_v33 }
 0x5df   :  { %1981 = vmatpush.bf16.msra.mxu1 %v4445_v23 }
 0x5e0   :  { %1903 = vmatpush.bf16.msra.mxu3 %v4506_v45  ;;  %1994 = vmatpush.bf16.msra.mxu2 %v4506_v45 }
 0x5e2   :  { %1678 = vmatmul.bf16.gmra.mxu1 %v4406_v12  ;;  %1707 = vmatmul.bf16.gmra.mxu2 %v4406_v12  ;;  %v3430_v12 = vld [vmem:[#allocation6 + $0x170] sm:$0xf] }
 0x5e3   :  { %2078 = vmatpush.bf16.msrb.mxu1 %v4469_v21  ;;  %1904 = vmatmul.bf16.vlgmr.msra.gmra.mxu3 %v5078_v7  ;;  %v4525_v9 = vor.u32 %v3580_v22, %v3430_v12  ;;  %v3562_v12 = vld [vmem:[#allocation6 + $0xe8] sm:$0xf0] }
 0x5e4   :  { %v4564_v14 = vor.u32 %v3562_v12, %v3358_v51 }
 0x5e5   :  { %1909 = vmatpush.bf16.msra.mxu0 %v4525_v9  ;;  %2000 = vmatpush.bf16.msrb.mxu3 %v4525_v9 }
 0x5e6   :  { %2091 = vmatpush.bf16.msrb.mxu2 %v4525_v9 }
 0x5e7   :  { %2079 = vmatpush.bf16.msrb.mxu1 %v4473_v29 }
 0x5e9   :  { %1910 = vmatpush.bf16.msra.mxu0 %v4532_v6  ;;  %2001 = vmatpush.bf16.msrb.mxu3 %v4532_v6 }
 0x5ea   :  { %2092 = vmatpush.bf16.msrb.mxu2 %v4532_v6 }
 0x5eb   :  { %2080 = vmatpush.bf16.msrb.mxu1 %v4478_v5 }
 0x5ed   :  { %1911 = vmatpush.bf16.msra.mxu0 %v4537_v26  ;;  %2002 = vmatpush.bf16.msrb.mxu3 %v4537_v26 }
 0x5ee   :  { %2093 = vmatpush.bf16.msrb.mxu2 %v4537_v26 }
 0x5ef   :  { %2081 = vmatpush.bf16.msrb.mxu1 %v4483_v1 }
 0x5f1   :  { %1912 = vmatpush.bf16.msra.mxu0 %v4542_v54  ;;  %2003 = vmatpush.bf16.msrb.mxu3 %v4542_v54 }
 0x5f2   :  { %1683 = vmatmul.bf16.gmra.mxu1 %v4411_v27  ;;  %1712 = vmatmul.bf16.gmra.mxu2 %v4411_v27 }
 0x5f3   :  { %2082 = vmatpush.bf16.msrb.mxu1 %v4488_v37  ;;  %2094 = vmatpush.bf16.msrb.mxu2 %v4542_v54 }
 0x5f5   :  { %1913 = vmatpush.bf16.msra.mxu0 %v4547_v25  ;;  %2004 = vmatpush.bf16.msrb.mxu3 %v4547_v25 }
 0x5f7   :  { %2083 = vmatpush.bf16.msrb.mxu1 %v4496_v47  ;;  %2095 = vmatpush.bf16.msrb.mxu2 %v4547_v25 }
 0x5f9   :  { %1914 = vmatpush.bf16.msra.mxu0 %v4557_v50  ;;  %2005 = vmatpush.bf16.msrb.mxu3 %v4557_v50 }
 0x5fb   :  { %2084 = vmatpush.bf16.msrb.mxu1 %v4501_v33  ;;  %2096 = vmatpush.bf16.msrb.mxu2 %v4557_v50 }
 0x5fd   :  { %1915 = vmatpush.bf16.msra.mxu0 %v4564_v14  ;;  %2006 = vmatpush.bf16.msrb.mxu3 %v4564_v14 }
 0x5ff   :  { %2085 = vmatpush.bf16.msrb.mxu1 %v4506_v45  ;;  %2097 = vmatpush.bf16.msrb.mxu2 %v4564_v14 }
 0x63f   :  { %v1343_v27 = vpop.f32.mrf.mxu1 }
 0x640   :  { %v1373_v15 = vadd.f32 %v1343_v27, %v478_v16 }
 0x642   :  { %v3236_v41 = vmul.f32 -1.442695, %v1373_v15 }
 0x644   :  { %3713 = vpow2.f32 %v3236_v41 }
 0x645   :  { %v1356_v48 = vpop.f32.mrf.mxu2 }
 0x646   :  { %v1393_v49 = vadd.f32 %v1356_v48, %v507_v56  ;;  %v1369_v3 = vpop.f32.mrf.mxu3  ;;  %v4571_v56 = vor.u32 %v3559_v43, %v3346_v52  ;;  %v5081_v48 = vld [vmem:[#allocation14_spill] sm:$0xff] }
 0x647   :  { %v1345_v17 = vpop.f32.mrf.mxu1  ;;  %v1413_v40 = vadd.f32 %v4456_v28, %v1369_v3 }
 0x648   :  { %v3237_v36 = vmul.f32 -1.442695, %v1393_v49  ;;  %v536_v49 = vadd.f32 %v5081_v48, %v4184_v61  ;;  %1916 = vmatpush.bf16.msra.mxu0 %v4571_v56  ;;  %2007 = vmatpush.bf16.msrb.mxu3 %v4571_v56 }
 0x649   :  { %2098 = vmatpush.bf16.msrb.mxu2 %v4571_v56 }
 0x64a   :  { %v3714_v57 = vpop.eup %3713  ;;  %3715 = vpow2.f32 %v3237_v36 }
 0x64b   :  { %v1377_v35 = vadd.f32 1.0, %v3714_v57 }
 0x64c   :  { %2065 = vmatpush.bf16.msrb.mxu0 %v4414_v60  ;;  %2156 = vmatpush.bf16.msra.mxu3 %v4414_v60 }
 0x64d   :  { %3717 = vrcp.f32 %v1377_v35  ;;  %v1358_v53 = vpop.f32.mrf.mxu2  ;;  %v1389_v32 = vand.u32 2147483648, %v1377_v35  ;;  %v1387_v13 = vand.u32 2147483647, %v1377_v35  ;;  %vm1383_vm10 = vweird.f32 %v1377_v35 }
 0x64e   :  { %v1371_v30 = vpop.f32.mrf.mxu3 }
 0x64f   :  { %v1390_v15 = vor.u32 1.1754944e-38, %v1389_v32  ;;  %vm1388_vm12 = vcmp.eq.f32.partialorder %v1387_v13, 8.507059e+37 }
 0x650   :  { %v3716_v44 = vpop.eup %3715  ;;  %2066 = vmatpush.bf16.msrb.mxu0 %v4417_v10  ;;  %2157 = vmatpush.bf16.msra.mxu3 %v4417_v10 }
 0x651   :  { %v4551_v62 = vadd.f32 1.0, %v3716_v44 }
 0x653   :  { %v3718_v55 = vpop.eup %3717  ;;  %3719 = vrcp.f32 %v4551_v62  ;;  %v1409_v3 = vand.u32 2147483648, %v4551_v62  ;;  %vm1403_vm14 = vweird.f32 %v4551_v62  ;;  %v1407_v61 = vand.u32 2147483647, %v4551_v62 }
 0x654   :  { %v1379_v38 = vmul.f32 %v3718_v55, %v1377_v35  ;;  %vm1384_vm9 = vweird.f32 %v3718_v55  ;;  %2067 = vmatpush.bf16.msrb.mxu0 %v4422_v34  ;;  %2158 = vmatpush.bf16.msra.mxu3 %v4422_v34 }
 0x655   :  { %vm1385_vm11 = vmor %vm1383_vm10, %vm1384_vm9  ;;  %v1410_v35 = vor.u32 1.1754944e-38, %v1409_v3  ;;  %vm1408_vm0 = vcmp.eq.f32.partialorder %v1407_v61, 8.507059e+37 }
 0x656   :  { %v1380_v59 = vsub.f32 1.0, %v1379_v38  ;;  %v4559_v31 = vpop.f32.mrf.mxu3 }
 0x658   :  { %v1381_v2 = vmul.f32 %v3718_v55, %v1380_v59  ;;  %2068 = vmatpush.bf16.msrb.mxu0 %v4427_v19  ;;  %2159 = vmatpush.bf16.msra.mxu3 %v4427_v19 }
 0x659   :  { %v3720_v22 = vpop.eup %3719 }
 0x65a   :  { %v1399_v16 = vmul.f32 %v3720_v22, %v4551_v62  ;;  %v1382_v27 = vadd.f32 %v3718_v55, %v1381_v2  ;;  %vm1404_vm13 = vweird.f32 %v3720_v22 }
 0x65b   :  { %vm1405_vm15 = vmor %vm1403_vm14, %vm1404_vm13 }
 0x65c   :  { %v1400_v41 = vsub.f32 1.0, %v1399_v16  ;;  %v1386_v58 = vsel %vm1385_vm11, %v3718_v55, %v1382_v27  ;;  %2069 = vmatpush.bf16.msrb.mxu0 %v4430_v18  ;;  %2160 = vmatpush.bf16.msra.mxu3 %v4430_v18 }
 0x65d   :  { %v1391_v0 = vsel %vm1388_vm12, %v1390_v15, %v1386_v58 }
 0x65e   :  { %v1414_v46 = vmul.f32 %v1413_v40, %v1391_v0  ;;  %v1894_v20 = vpop.f32.mrf.mxu3  ;;  %v1401_v17 = vmul.f32 %v3720_v22, %v1400_v41 }
 0x660   :  { %v1415_v36 = vadd.f32 %v1414_v46, %v536_v49  ;;  %v1402_v28 = vadd.f32 %v3720_v22, %v1401_v17  ;;  %2070 = vmatpush.bf16.msrb.mxu0 %v4433_v24  ;;  %2161 = vmatpush.bf16.msra.mxu3 %v4433_v24 }
 0x662   :  { %3721 = vtanh.f32 %v1415_v36  ;;  %v1406_v4 = vsel %vm1405_vm15, %v3720_v22, %v1402_v28  ;;  %v1674_v22 = vpop.f32.mrf.mxu1 }
 0x663   :  { %v1411_v30 = vsel %vm1408_vm0, %v1410_v35, %v1406_v4 }
 0x664   :  { %2071 = vmatpush.bf16.msrb.mxu0 %v4440_v63  ;;  %2162 = vmatpush.bf16.msra.mxu3 %v4440_v63 }
 0x666   :  { %v1905_v57 = vpop.f32.mrf.mxu3 }
 0x668   :  { %v3722_v39 = vpop.eup %3721  ;;  %2072 = vmatpush.bf16.msrb.mxu0 %v4445_v23  ;;  %2163 = vmatpush.bf16.msra.mxu3 %v4445_v23 }
 0x669   :  { %v1417_v53 = vsub.f32 %v4465_v8, %v3722_v39 }
 0x66b   :  { %v1418_v44 = vmul.f32 %v1417_v53, %v1411_v30  ;;  %v1703_v53 = vpop.f32.mrf.mxu2 }
 0x66d   :  { %v1419_v55 = vadd.f32 %v3722_v39, %v1418_v44 }
 0x66e   :  { %v1907_v62 = vpop.f32.mrf.mxu3 }
 0x66f   :  { %v1465_v38 = vpack.c.bf16 %v1419_v55, %v4465_v8  ;;  %v1645_v8 = vpop.f32.mrf.mxu0 }
 0x671   :  { %1659 = vmatmul.bf16.gmra.mxu0 %v1465_v38  ;;  %1688 = vmatmul.bf16.gmra.mxu1 %v1465_v38 }
 0x672   :  { %1717 = vmatmul.bf16.gmra.mxu2 %v1465_v38 }
 0x677   :  { %v4608_v42 = vpop.f32.mrf.mxu0 }
 0x67f   :  { %v4615_v59 = vpop.f32.mrf.mxu0 }
 0x681   :  { %1917 = vmatmul.bf16.vlgmr.msra.gmra.mxu0 %v5078_v7  ;;  %v3238_v7 = vld [vmem:[%s5060_s5 + $0x3] sm:$0x7] }
 0x682   :  { %2169 = vmatpush.bf16.msra.mxu0 %v4469_v21  ;;  %v4613_v11 = vperm.slane %v3238_v7, 0  ;;  %v4621_v12 = vperm.slane %v3238_v7, 1  ;;  %v4637_v39 = vperm.slane %v3238_v7, 2 }
 0x684   :  { %v1646_v32 = vadd.f32 %v1645_v8, %v4613_v11  ;;  %v1675_v16 = vadd.f32 %v1674_v22, %v4621_v12  ;;  %v1704_v8 = vadd.f32 %v1703_v53, %v4637_v39 }
 0x686   :  { %2170 = vmatpush.bf16.msra.mxu0 %v4473_v29  ;;  %v1922_v2 = vadd.f32 %v4559_v31, %v1646_v32  ;;  %v1942_v41 = vadd.f32 %v1905_v57, %v1675_v16  ;;  %v4635_v57 = vld [vmem:[%s5061_s6 + $0x1] ss:$0 sm:$0xff] }
 0x687   :  { %v4619_v13 = vpop.f32.mrf.mxu0 }
 0x688   :  { %v3432_v51 = vmul.f32 -1.442695, %v1922_v2  ;;  %v3433_v40 = vmul.f32 -1.442695, %v1942_v41 }
 0x68a   :  { %2171 = vmatpush.bf16.msra.mxu0 %v4478_v5  ;;  %3723 = vpow2.f32 %v3432_v51 }
 0x68e   :  { %2172 = vmatpush.bf16.msra.mxu0 %v4483_v1 }
 0x68f   :  { %v4624_v15 = vpop.f32.mrf.mxu0 }
 0x690   :  { %v3724_v27 = vpop.eup %3723 }
 0x691   :  { %v1926_v58 = vadd.f32 1.0, %v3724_v27 }
 0x692   :  { %2173 = vmatpush.bf16.msra.mxu0 %v4488_v37 }
 0x693   :  { %3725 = vrcp.f32 %v1926_v58  ;;  %v1938_v61 = vand.u32 2147483648, %v1926_v58  ;;  %vm1932_vm2 = vweird.f32 %v1926_v58  ;;  %v1936_v4 = vand.u32 2147483647, %v1926_v58 }
 0x694   :  { %3727 = vpow2.f32 %v3433_v40 }
 0x695   :  { %v1939_v55 = vor.u32 1.1754944e-38, %v1938_v61  ;;  %vm1937_vm4 = vcmp.eq.f32.partialorder %v1936_v4, 8.507059e+37 }
 0x696   :  { %2174 = vmatpush.bf16.msra.mxu0 %v4496_v47 }
 0x697   :  { %v4626_v52 = vpop.f32.mrf.mxu0 }
 0x699   :  { %v3726_v31 = vpop.eup %3725 }
 0x69a   :  { %2175 = vmatpush.bf16.msra.mxu0 %v4501_v33  ;;  %v3728_v43 = vpop.eup %3727  ;;  %v1928_v48 = vmul.f32 %v3726_v31, %v1926_v58  ;;  %vm1933_vm1 = vweird.f32 %v3726_v31 }
 0x69b   :  { %v1946_v0 = vadd.f32 1.0, %v3728_v43  ;;  %vm1934_vm3 = vmor %vm1932_vm2, %vm1933_vm1 }
 0x69c   :  { %v1929_v46 = vsub.f32 1.0, %v1928_v48 }
 0x69d   :  { %3729 = vrcp.f32 %v1946_v0  ;;  %v1958_v7 = vand.u32 2147483648, %v1946_v0  ;;  %vm1952_vm6 = vweird.f32 %v1946_v0  ;;  %v1956_v27 = vand.u32 2147483647, %v1946_v0 }
 0x69e   :  { %2176 = vmatpush.bf16.msra.mxu0 %v4506_v45  ;;  %v1930_v20 = vmul.f32 %v3726_v31, %v1929_v46 }
 0x69f   :  { %v1959_v40 = vor.u32 1.1754944e-38, %v1958_v7  ;;  %vm1957_vm8 = vcmp.eq.f32.partialorder %v1956_v27, 8.507059e+37 }
 0x6a0   :  { %v1931_v28 = vadd.f32 %v3726_v31, %v1930_v20 }
 0x6a2   :  { %v1935_v35 = vsel %vm1934_vm3, %v3726_v31, %v1931_v28 }
 0x6a3   :  { %v3730_v36 = vpop.eup %3729  ;;  %v1940_v38 = vsel %vm1937_vm4, %v1939_v55, %v1935_v35 }
 0x6a4   :  { %v1948_v3 = vmul.f32 %v3730_v36, %v1946_v0  ;;  %vm1953_vm5 = vweird.f32 %v3730_v36  ;;  %v1676_v0 = vpop.f32.mrf.mxu1 }
 0x6a5   :  { %vm1954_vm7 = vmor %vm1952_vm6, %vm1953_vm5 }
 0x6a6   :  { %v1949_v30 = vsub.f32 1.0, %v1948_v3 }
 0x6a8   :  { %v1950_v2 = vmul.f32 %v3730_v36, %v1949_v30 }
 0x6aa   :  { %v1951_v22 = vadd.f32 %v3730_v36, %v1950_v2 }
 0x6ac   :  { %v1955_v41 = vsel %vm1954_vm7, %v3730_v36, %v1951_v22  ;;  %v1705_v36 = vpop.f32.mrf.mxu2  ;;  %v4669_v28 = vpop.f32.mrf.mxu1 }
 0x6ad   :  { %v1960_v43 = vsel %vm1957_vm8, %v1959_v40, %v1955_v41 }
 0x6b4   :  { %v4671_v3 = vpop.f32.mrf.mxu2  ;;  %v4673_v61 = vpop.f32.mrf.mxu1 }
 0x6bc   :  { %v4675_v4 = vpop.f32.mrf.mxu2  ;;  %v4677_v35 = vpop.f32.mrf.mxu1 }
 0x6c4   :  { %v4679_v53 = vpop.f32.mrf.mxu2  ;;  %v4681_v30 = vpop.f32.mrf.mxu1 }
 0x6ee   :  { %v4628_v49 = vpop.f32.mrf.mxu0  ;;  %v4685_v55 = vpop.f32.mrf.mxu1 }
 0x6ef   :  { %5083 = vst [vmem:[#allocation11_spill] sm:$0xff] %v4685_v55 }
 0x6f6   :  { %v4630_v17 = vpop.f32.mrf.mxu0 }
 0x6f7   :  { %5082 = vst [vmem:[#allocation10_spill] sm:$0xff] %v4630_v17 }
 0x6fe   :  { %v1918_v44 = vpop.f32.mrf.mxu0 }
 0x6ff   :  { %v1962_v62 = vadd.f32 %v4635_v57, %v1918_v44  ;;  %v4683_v44 = vpop.f32.mrf.mxu2 }
 0x701   :  { %v1963_v32 = vmul.f32 %v1962_v62, %v1940_v38  ;;  %v4689_v38 = vpop.f32.mrf.mxu1 }
 0x702   :  { %5085 = vst [vmem:[#allocation13_spill] sm:$0xff] %v4689_v38 }
 0x703   :  { %v1964_v51 = vadd.f32 %v1963_v32, %v1704_v8  ;;  %v1648_v32 = vadd.f32 %v4608_v42, %v4613_v11 }
 0x705   :  { %3731 = vtanh.f32 %v1964_v51 }
 0x706   :  { %v1920_v16 = vpop.f32.mrf.mxu0 }
 0x707   :  { %v4687_v62 = vpop.f32.mrf.mxu2  ;;  %v1677_v16 = vadd.f32 %v1676_v0, %v4621_v12 }
 0x708   :  { %5084 = vst [vmem:[#allocation12_spill] sm:$0xff] %v4687_v62 }
 0x70b   :  { %v3732_v58 = vpop.eup %3731 }
 0x70c   :  { %v1966_v31 = vsub.f32 0.0, %v3732_v58 }
 0x70e   :  { %v1967_v48 = vmul.f32 %v1966_v31, %v1960_v43 }
 0x70f   :  { %v4691_v8 = vpop.f32.mrf.mxu2 }
 0x710   :  { %v4641_v46 = vadd.f32 %v3732_v58, %v1967_v48  ;;  %5086 = vst [vmem:[#allocation14_spill] sm:$0xff] %v4691_v8 }
 0x712   :  { %v1973_v20 = vpack.c.bf16 %v4641_v46, %v4641_v46 }
 0x714   :  { %1982 = vmatmul.bf16.vlgmr.msra.gmra.mxu1 %v1973_v20  ;;  %1995 = vmatmul.bf16.vlgmr.msra.gmra.mxu2 %v1973_v20 }
 0x715   :  { %2008 = vmatmul.bf16.vlgmr.msrb.gmra.mxu3 %v1973_v20  ;;  %2182 = vmatpush.bf16.msra.mxu1 %v4525_v9 }
 0x716   :  { %2247 = vmatpush.bf16.msra.mxu2 %v4414_v60  ;;  %2260 = vmatpush.bf16.msrb.mxu3 %v4469_v21 }
 0x719   :  { %2183 = vmatpush.bf16.msra.mxu1 %v4532_v6 }
 0x71a   :  { %2248 = vmatpush.bf16.msra.mxu2 %v4417_v10  ;;  %2261 = vmatpush.bf16.msrb.mxu3 %v4473_v29 }
 0x71d   :  { %2184 = vmatpush.bf16.msra.mxu1 %v4537_v26 }
 0x71e   :  { %2249 = vmatpush.bf16.msra.mxu2 %v4422_v34  ;;  %2262 = vmatpush.bf16.msrb.mxu3 %v4478_v5 }
 0x721   :  { %2185 = vmatpush.bf16.msra.mxu1 %v4542_v54 }
 0x722   :  { %2250 = vmatpush.bf16.msra.mxu2 %v4427_v19  ;;  %2263 = vmatpush.bf16.msrb.mxu3 %v4483_v1 }
 0x725   :  { %2186 = vmatpush.bf16.msra.mxu1 %v4547_v25 }
 0x726   :  { %2251 = vmatpush.bf16.msra.mxu2 %v4430_v18  ;;  %2264 = vmatpush.bf16.msrb.mxu3 %v4488_v37 }
 0x729   :  { %2187 = vmatpush.bf16.msra.mxu1 %v4557_v50 }
 0x72a   :  { %2252 = vmatpush.bf16.msra.mxu2 %v4433_v24  ;;  %2265 = vmatpush.bf16.msrb.mxu3 %v4496_v47 }
 0x72d   :  { %2188 = vmatpush.bf16.msra.mxu1 %v4564_v14 }
 0x72e   :  { %2253 = vmatpush.bf16.msra.mxu2 %v4440_v63  ;;  %2266 = vmatpush.bf16.msrb.mxu3 %v4501_v33 }
 0x731   :  { %2189 = vmatpush.bf16.msra.mxu1 %v4571_v56 }
 0x732   :  { %2254 = vmatpush.bf16.msra.mxu2 %v4445_v23  ;;  %2267 = vmatpush.bf16.msrb.mxu3 %v4506_v45 }
 0x791   :  { %v1983_v2 = vpop.f32.mrf.mxu1 }
 0x792   :  { %v2013_v51 = vadd.f32 %v1983_v2, %v1648_v32 }
 0x794   :  { %v3434_v22 = vmul.f32 -1.442695, %v2013_v51 }
 0x796   :  { %3733 = vpow2.f32 %v3434_v22 }
 0x797   :  { %v1996_v7 = vpop.f32.mrf.mxu2 }
 0x798   :  { %v2033_v27 = vadd.f32 %v1996_v7, %v1677_v16  ;;  %v2009_v41 = vpop.f32.mrf.mxu3 }
 0x799   :  { %v1985_v58 = vpop.f32.mrf.mxu1 }
 0x79a   :  { %v3435_v40 = vmul.f32 -1.442695, %v2033_v27 }
 0x79c   :  { %v3734_v31 = vpop.eup %3733  ;;  %3735 = vpow2.f32 %v3435_v40 }
 0x79d   :  { %v2017_v43 = vadd.f32 1.0, %v3734_v31 }
 0x79f   :  { %3737 = vrcp.f32 %v2017_v43  ;;  %v1998_v48 = vpop.f32.mrf.mxu2  ;;  %v2029_v51 = vand.u32 2147483648, %v2017_v43  ;;  %v2027_v22 = vand.u32 2147483647, %v2017_v43  ;;  %vm2023_vm10 = vweird.f32 %v2017_v43 }
 0x7a0   :  { %v2011_v20 = vpop.f32.mrf.mxu3  ;;  %v2053_v48 = vadd.f32 %v4635_v57, %v2009_v41 }
 0x7a1   :  { %v2030_v27 = vor.u32 1.1754944e-38, %v2029_v51  ;;  %vm2028_vm12 = vcmp.eq.f32.partialorder %v2027_v22, 8.507059e+37  ;;  %v1706_v20 = vadd.f32 %v1705_v36, %v4637_v39 }
 0x7a2   :  { %v3736_v8 = vpop.eup %3735 }
 0x7a3   :  { %v2037_v17 = vadd.f32 1.0, %v3736_v8 }
 0x7a5   :  { %v3738_v42 = vpop.eup %3737  ;;  %3739 = vrcp.f32 %v2037_v17  ;;  %v2049_v55 = vand.u32 2147483648, %v2037_v17  ;;  %vm2043_vm14 = vweird.f32 %v2037_v17 }
 0x7a6   :  { %v2019_v32 = vmul.f32 %v3738_v42, %v2017_v43  ;;  %vm2024_vm9 = vweird.f32 %v3738_v42 }
 0x7a7   :  { %vm2025_vm11 = vmor %vm2023_vm10, %vm2024_vm9 }
 0x7a8   :  { %v2020_v2 = vsub.f32 1.0, %v2019_v32 }
 0x7aa   :  { %v2021_v0 = vmul.f32 %v3738_v42, %v2020_v2 }
 0x7ab   :  { %v3740_v16 = vpop.eup %3739 }
 0x7ac   :  { %v2039_v7 = vmul.f32 %v3740_v16, %v2037_v17  ;;  %v2022_v58 = vadd.f32 %v3738_v42, %v2021_v0  ;;  %vm2044_vm13 = vweird.f32 %v3740_v16  ;;  %v2047_v0 = vand.u32 2147483647, %v2037_v17 }
 0x7ad   :  { %vm2045_vm15 = vmor %vm2043_vm14, %vm2044_vm13  ;;  %v1651_v17 = vadd.f32 %v4615_v59, %v4613_v11 }
 0x7ae   :  { %v2040_v40 = vsub.f32 1.0, %v2039_v7  ;;  %v2026_v31 = vsel %vm2025_vm11, %v3738_v42, %v2022_v58  ;;  %v2050_v7 = vor.u32 1.1754944e-38, %v2049_v55  ;;  %vm2048_vm0 = vcmp.eq.f32.partialorder %v2047_v0, 8.507059e+37 }
 0x7af   :  { %v2031_v8 = vsel %vm2028_vm12, %v2030_v27, %v2026_v31  ;;  %v1680_v55 = vadd.f32 %v4669_v28, %v4621_v12 }
 0x7b0   :  { %v2054_v38 = vmul.f32 %v2053_v48, %v2031_v8  ;;  %v2041_v32 = vmul.f32 %v3740_v16, %v2040_v40 }
 0x7b2   :  { %v2055_v62 = vadd.f32 %v2054_v38, %v1706_v20  ;;  %v2042_v2 = vadd.f32 %v3740_v16, %v2041_v32 }
 0x7b4   :  { %3741 = vtanh.f32 %v2055_v62  ;;  %v2046_v43 = vsel %vm2045_vm15, %v3740_v16, %v2042_v2 }
 0x7b5   :  { %v2051_v41 = vsel %vm2048_vm0, %v2050_v7, %v2046_v43 }
 0x7ba   :  { %v3742_v51 = vpop.eup %3741 }
 0x7bb   :  { %v2057_v42 = vsub.f32 %v4641_v46, %v3742_v51 }
 0x7bd   :  { %v2058_v22 = vmul.f32 %v2057_v42, %v2051_v41 }
 0x7bf   :  { %v4699_v58 = vadd.f32 %v3742_v51, %v2058_v22 }
 0x7c1   :  { %v2064_v36 = vpack.c.bf16 %v4699_v58, %v4699_v58 }
 0x7c3   :  { %2073 = vmatmul.bf16.vlgmr.msrb.gmra.mxu0 %v2064_v36  ;;  %2086 = vmatmul.bf16.vlgmr.msrb.gmra.mxu1 %v2064_v36 }
 0x7c4   :  { %2099 = vmatmul.bf16.vlgmr.msrb.gmra.mxu2 %v2064_v36  ;;  %2273 = vmatpush.bf16.msrb.mxu0 %v4525_v9 }
 0x7c5   :  { %2338 = vmatpush.bf16.msrb.mxu1 %v4414_v60  ;;  %2351 = vmatpush.bf16.msrb.mxu2 %v4469_v21 }
 0x7c8   :  { %2274 = vmatpush.bf16.msrb.mxu0 %v4532_v6 }
 0x7c9   :  { %2339 = vmatpush.bf16.msrb.mxu1 %v4417_v10  ;;  %2352 = vmatpush.bf16.msrb.mxu2 %v4473_v29 }
 0x7cc   :  { %2275 = vmatpush.bf16.msrb.mxu0 %v4537_v26 }
 0x7cd   :  { %2340 = vmatpush.bf16.msrb.mxu1 %v4422_v34  ;;  %2353 = vmatpush.bf16.msrb.mxu2 %v4478_v5 }
 0x7d0   :  { %2276 = vmatpush.bf16.msrb.mxu0 %v4542_v54 }
 0x7d1   :  { %2341 = vmatpush.bf16.msrb.mxu1 %v4427_v19  ;;  %2354 = vmatpush.bf16.msrb.mxu2 %v4483_v1 }
 0x7d4   :  { %2277 = vmatpush.bf16.msrb.mxu0 %v4547_v25 }
 0x7d5   :  { %2342 = vmatpush.bf16.msrb.mxu1 %v4430_v18  ;;  %2355 = vmatpush.bf16.msrb.mxu2 %v4488_v37 }
 0x7d8   :  { %2278 = vmatpush.bf16.msrb.mxu0 %v4557_v50 }
 0x7d9   :  { %2343 = vmatpush.bf16.msrb.mxu1 %v4433_v24  ;;  %2356 = vmatpush.bf16.msrb.mxu2 %v4496_v47 }
 0x7dc   :  { %2279 = vmatpush.bf16.msrb.mxu0 %v4564_v14 }
 0x7dd   :  { %2344 = vmatpush.bf16.msrb.mxu1 %v4440_v63  ;;  %2357 = vmatpush.bf16.msrb.mxu2 %v4501_v33 }
 0x7e0   :  { %2280 = vmatpush.bf16.msrb.mxu0 %v4571_v56 }
 0x7e1   :  { %2345 = vmatpush.bf16.msrb.mxu1 %v4445_v23  ;;  %2358 = vmatpush.bf16.msrb.mxu2 %v4506_v45 }
 0x840   :  { %v2074_v62 = vpop.f32.mrf.mxu0  ;;  %v2087_v38 = vpop.f32.mrf.mxu1 }
 0x841   :  { %v2104_v16 = vadd.f32 %v2074_v62, %v1651_v17  ;;  %v2124_v27 = vadd.f32 %v2087_v38, %v1680_v55 }
 0x843   :  { %v3436_v40 = vmul.f32 -1.442695, %v2104_v16  ;;  %v3437_v31 = vmul.f32 -1.442695, %v2124_v27 }
 0x845   :  { %3743 = vpow2.f32 %v3436_v40 }
 0x846   :  { %3745 = vpow2.f32 %v3437_v31  ;;  %v1709_v31 = vadd.f32 %v4671_v3, %v4637_v39 }
 0x847   :  { %v2100_v48 = vpop.f32.mrf.mxu2 }
 0x848   :  { %v2076_v8 = vpop.f32.mrf.mxu0  ;;  %v2089_v20 = vpop.f32.mrf.mxu1  ;;  %v2144_v27 = vadd.f32 %v4635_v57, %v2100_v48 }
 0x84b   :  { %v3744_v32 = vpop.eup %3743 }
 0x84c   :  { %v3746_v2 = vpop.eup %3745  ;;  %v2108_v0 = vadd.f32 1.0, %v3744_v32 }
 0x84d   :  { %v2128_v43 = vadd.f32 1.0, %v3746_v2 }
 0x84e   :  { %3747 = vrcp.f32 %v2108_v0  ;;  %v2120_v22 = vand.u32 2147483648, %v2108_v0  ;;  %v2118_v17 = vand.u32 2147483647, %v2108_v0  ;;  %vm2114_vm2 = vweird.f32 %v2108_v0 }
 0x84f   :  { %3749 = vrcp.f32 %v2128_v43  ;;  %v2102_v59 = vpop.f32.mrf.mxu2  ;;  %vm2134_vm6 = vweird.f32 %v2128_v43 }
 0x850   :  { %v2121_v38 = vor.u32 1.1754944e-38, %v2120_v22  ;;  %vm2119_vm4 = vcmp.eq.f32.partialorder %v2118_v17, 8.507059e+37  ;;  %v2140_v59 = vand.u32 2147483648, %v2128_v43 }
 0x854   :  { %v3748_v51 = vpop.eup %3747 }
 0x855   :  { %v3750_v28 = vpop.eup %3749  ;;  %v2110_v7 = vmul.f32 %v3748_v51, %v2108_v0  ;;  %vm2115_vm1 = vweird.f32 %v3748_v51  ;;  %v2138_v0 = vand.u32 2147483647, %v2128_v43 }
 0x856   :  { %v2130_v41 = vmul.f32 %v3750_v28, %v2128_v43  ;;  %vm2116_vm3 = vmor %vm2114_vm2, %vm2115_vm1  ;;  %vm2135_vm5 = vweird.f32 %v3750_v28  ;;  %v1682_v43 = vadd.f32 %v4673_v61, %v4621_v12 }
 0x857   :  { %v2111_v42 = vsub.f32 1.0, %v2110_v7  ;;  %vm2136_vm7 = vmor %vm2134_vm6, %vm2135_vm5  ;;  %vm2139_vm8 = vcmp.eq.f32.partialorder %v2138_v0, 8.507059e+37 }
 0x858   :  { %v2131_v62 = vsub.f32 1.0, %v2130_v41 }
 0x859   :  { %v2112_v36 = vmul.f32 %v3748_v51, %v2111_v42 }
 0x85a   :  { %v2132_v20 = vmul.f32 %v3750_v28, %v2131_v62 }
 0x85b   :  { %v2113_v55 = vadd.f32 %v3748_v51, %v2112_v36 }
 0x85c   :  { %v2133_v2 = vadd.f32 %v3750_v28, %v2132_v20 }
 0x85d   :  { %v2117_v16 = vsel %vm2116_vm3, %v3748_v51, %v2113_v55  ;;  %v2141_v51 = vor.u32 1.1754944e-38, %v2140_v59 }
 0x85e   :  { %v2122_v40 = vsel %vm2119_vm4, %v2121_v38, %v2117_v16  ;;  %v2137_v7 = vsel %vm2136_vm7, %v3750_v28, %v2133_v2  ;;  %v1653_v38 = vadd.f32 %v4619_v13, %v4613_v11 }
 0x85f   :  { %v2145_v8 = vmul.f32 %v2144_v27, %v2122_v40  ;;  %v2142_v41 = vsel %vm2139_vm8, %v2141_v51, %v2137_v7 }
 0x861   :  { %v2146_v32 = vadd.f32 %v2145_v8, %v1709_v31 }
 0x863   :  { %3751 = vtanh.f32 %v2146_v32 }
 0x869   :  { %v3752_v42 = vpop.eup %3751 }
 0x86a   :  { %v2148_v48 = vsub.f32 %v4699_v58, %v3752_v42 }
 0x86c   :  { %v2149_v22 = vmul.f32 %v2148_v48, %v2142_v41 }
 0x86e   :  { %v4735_v36 = vadd.f32 %v3752_v42, %v2149_v22 }
 0x870   :  { %v2155_v3 = vpack.c.bf16 %v4735_v36, %v4735_v36 }
 0x872   :  { %2164 = vmatmul.bf16.vlgmr.msra.gmra.mxu3 %v2155_v3  ;;  %2177 = vmatmul.bf16.vlgmr.msra.gmra.mxu0 %v2155_v3 }
 0x873   :  { %2190 = vmatmul.bf16.vlgmr.msra.gmra.mxu1 %v2155_v3  ;;  %2364 = vmatpush.bf16.msra.mxu3 %v4525_v9 }
 0x874   :  { %2429 = vmatpush.bf16.msra.mxu0 %v4414_v60  ;;  %2442 = vmatpush.bf16.msra.mxu1 %v4469_v21 }
 0x877   :  { %2365 = vmatpush.bf16.msra.mxu3 %v4532_v6 }
 0x878   :  { %2430 = vmatpush.bf16.msra.mxu0 %v4417_v10  ;;  %2443 = vmatpush.bf16.msra.mxu1 %v4473_v29 }
 0x87b   :  { %2366 = vmatpush.bf16.msra.mxu3 %v4537_v26 }
 0x87c   :  { %2431 = vmatpush.bf16.msra.mxu0 %v4422_v34  ;;  %2444 = vmatpush.bf16.msra.mxu1 %v4478_v5 }
 0x87f   :  { %2367 = vmatpush.bf16.msra.mxu3 %v4542_v54 }
 0x880   :  { %2432 = vmatpush.bf16.msra.mxu0 %v4427_v19  ;;  %2445 = vmatpush.bf16.msra.mxu1 %v4483_v1 }
 0x883   :  { %2368 = vmatpush.bf16.msra.mxu3 %v4547_v25 }
 0x884   :  { %2433 = vmatpush.bf16.msra.mxu0 %v4430_v18  ;;  %2446 = vmatpush.bf16.msra.mxu1 %v4488_v37 }
 0x887   :  { %2369 = vmatpush.bf16.msra.mxu3 %v4557_v50 }
 0x888   :  { %2434 = vmatpush.bf16.msra.mxu0 %v4433_v24  ;;  %2447 = vmatpush.bf16.msra.mxu1 %v4496_v47 }
 0x88b   :  { %2370 = vmatpush.bf16.msra.mxu3 %v4564_v14 }
 0x88c   :  { %2435 = vmatpush.bf16.msra.mxu0 %v4440_v63  ;;  %2448 = vmatpush.bf16.msra.mxu1 %v4501_v33 }
 0x88f   :  { %2371 = vmatpush.bf16.msra.mxu3 %v4571_v56 }
 0x890   :  { %2436 = vmatpush.bf16.msra.mxu0 %v4445_v23  ;;  %2449 = vmatpush.bf16.msra.mxu1 %v4506_v45 }
 0x8ef   :  { %v2178_v28 = vpop.f32.mrf.mxu0 }
 0x8f0   :  { %v2215_v17 = vadd.f32 %v2178_v28, %v1682_v43  ;;  %v2191_v55 = vpop.f32.mrf.mxu1 }
 0x8f2   :  { %v3439_v62 = vmul.f32 -1.442695, %v2215_v17  ;;  %v2235_v17 = vadd.f32 %v4635_v57, %v2191_v55 }
 0x8f4   :  { %3753 = vpow2.f32 %v3439_v62 }
 0x8f5   :  { %v2165_v16 = vpop.f32.mrf.mxu3 }
 0x8f6   :  { %v2195_v27 = vadd.f32 %v2165_v16, %v1653_v38  ;;  %v1711_v16 = vadd.f32 %v4675_v4, %v4637_v39 }
 0x8f7   :  { %v2180_v40 = vpop.f32.mrf.mxu0 }
 0x8f8   :  { %v3438_v31 = vmul.f32 -1.442695, %v2195_v27  ;;  %v2193_v8 = vpop.f32.mrf.mxu1 }
 0x8fa   :  { %3755 = vpow2.f32 %v3438_v31  ;;  %v3754_v20 = vpop.eup %3753 }
 0x8fb   :  { %v2219_v59 = vadd.f32 1.0, %v3754_v20 }
 0x8fd   :  { %v2167_v32 = vpop.f32.mrf.mxu3  ;;  %v2231_v20 = vand.u32 2147483648, %v2219_v59  ;;  %vm2225_vm14 = vweird.f32 %v2219_v59 }
 0x8fe   :  { %v2229_v32 = vand.u32 2147483647, %v2219_v59 }
 0x900   :  { %v3756_v2 = vpop.eup %3755  ;;  %vm2230_vm0 = vcmp.eq.f32.partialorder %v2229_v32, 8.507059e+37 }
 0x901   :  { %v2199_v0 = vadd.f32 1.0, %v3756_v2 }
 0x903   :  { %3757 = vrcp.f32 %v2199_v0  ;;  %v2211_v13 = vand.u32 2147483648, %v2199_v0  ;;  %v2209_v22 = vand.u32 2147483647, %v2199_v0  ;;  %vm2205_vm10 = vweird.f32 %v2199_v0 }
 0x904   :  { %3759 = vrcp.f32 %v2219_v59 }
 0x905   :  { %v2212_v28 = vor.u32 1.1754944e-38, %v2211_v13  ;;  %vm2210_vm12 = vcmp.eq.f32.partialorder %v2209_v22, 8.507059e+37 }
 0x909   :  { %v3758_v61 = vpop.eup %3757 }
 0x90a   :  { %v3760_v7 = vpop.eup %3759  ;;  %v2201_v42 = vmul.f32 %v3758_v61, %v2199_v0  ;;  %vm2206_vm9 = vweird.f32 %v3758_v61 }
 0x90b   :  { %v2221_v48 = vmul.f32 %v3760_v7, %v2219_v59  ;;  %vm2207_vm11 = vmor %vm2205_vm10, %vm2206_vm9  ;;  %vm2226_vm13 = vweird.f32 %v3760_v7 }
 0x90c   :  { %v2202_v51 = vsub.f32 1.0, %v2201_v42  ;;  %vm2227_vm15 = vmor %vm2225_vm14, %vm2226_vm13  ;;  %v2232_v42 = vor.u32 1.1754944e-38, %v2231_v20 }
 0x90d   :  { %v2222_v43 = vsub.f32 1.0, %v2221_v48 }
 0x90e   :  { %v2203_v41 = vmul.f32 %v3758_v61, %v2202_v51 }
 0x90f   :  { %v2223_v40 = vmul.f32 %v3760_v7, %v2222_v43 }
 0x910   :  { %v2204_v3 = vadd.f32 %v3758_v61, %v2203_v41 }
 0x911   :  { %v2224_v8 = vadd.f32 %v3760_v7, %v2223_v40 }
 0x912   :  { %v2208_v62 = vsel %vm2207_vm11, %v3758_v61, %v2204_v3 }
 0x913   :  { %v2213_v38 = vsel %vm2210_vm12, %v2212_v28, %v2208_v62  ;;  %v2228_v2 = vsel %vm2227_vm15, %v3760_v7, %v2224_v8 }
 0x914   :  { %v2236_v27 = vmul.f32 %v2235_v17, %v2213_v38  ;;  %v2233_v61 = vsel %vm2230_vm0, %v2232_v42, %v2228_v2 }
 0x916   :  { %v2237_v31 = vadd.f32 %v2236_v27, %v1711_v16  ;;  %v1714_v27 = vadd.f32 %v4679_v53, %v4637_v39 }
 0x918   :  { %3761 = vtanh.f32 %v2237_v31 }
 0x91e   :  { %v3762_v0 = vpop.eup %3761 }
 0x91f   :  { %v2239_v55 = vsub.f32 %v4735_v36, %v3762_v0 }
 0x921   :  { %v2240_v51 = vmul.f32 %v2239_v55, %v2233_v61 }
 0x923   :  { %v4771_v48 = vadd.f32 %v3762_v0, %v2240_v51 }
 0x925   :  { %v2246_v4 = vpack.c.bf16 %v4771_v48, %v4771_v48 }
 0x927   :  { %2255 = vmatmul.bf16.vlgmr.msra.gmra.mxu2 %v2246_v4  ;;  %2268 = vmatmul.bf16.vlgmr.msrb.gmra.mxu3 %v2246_v4 }
 0x928   :  { %2281 = vmatmul.bf16.vlgmr.msrb.gmra.mxu0 %v2246_v4  ;;  %2455 = vmatpush.bf16.msra.mxu2 %v4525_v9 }
 0x929   :  { %2520 = vmatpush.bf16.msrb.mxu3 %v4414_v60  ;;  %2533 = vmatpush.bf16.msrb.mxu0 %v4469_v21 }
 0x92c   :  { %2456 = vmatpush.bf16.msra.mxu2 %v4532_v6 }
 0x92d   :  { %2521 = vmatpush.bf16.msrb.mxu3 %v4417_v10  ;;  %2534 = vmatpush.bf16.msrb.mxu0 %v4473_v29  ;;  %v1656_v10 = vadd.f32 %v4624_v15, %v4613_v11 }
 0x930   :  { %2457 = vmatpush.bf16.msra.mxu2 %v4537_v26 }
 0x931   :  { %2522 = vmatpush.bf16.msrb.mxu3 %v4422_v34  ;;  %2535 = vmatpush.bf16.msrb.mxu0 %v4478_v5  ;;  %v1685_v34 = vadd.f32 %v4677_v35, %v4621_v12 }
 0x934   :  { %2458 = vmatpush.bf16.msra.mxu2 %v4542_v54 }
 0x935   :  { %2523 = vmatpush.bf16.msrb.mxu3 %v4427_v19  ;;  %2536 = vmatpush.bf16.msrb.mxu0 %v4483_v1 }
 0x938   :  { %2459 = vmatpush.bf16.msra.mxu2 %v4547_v25 }
 0x939   :  { %2524 = vmatpush.bf16.msrb.mxu3 %v4430_v18  ;;  %2537 = vmatpush.bf16.msrb.mxu0 %v4488_v37 }
 0x93c   :  { %2460 = vmatpush.bf16.msra.mxu2 %v4557_v50 }
 0x93d   :  { %2525 = vmatpush.bf16.msrb.mxu3 %v4433_v24  ;;  %2538 = vmatpush.bf16.msrb.mxu0 %v4496_v47 }
 0x940   :  { %2461 = vmatpush.bf16.msra.mxu2 %v4564_v14 }
 0x941   :  { %2526 = vmatpush.bf16.msrb.mxu3 %v4440_v63  ;;  %2539 = vmatpush.bf16.msrb.mxu0 %v4501_v33 }
 0x944   :  { %2462 = vmatpush.bf16.msra.mxu2 %v4571_v56 }
 0x945   :  { %2527 = vmatpush.bf16.msrb.mxu3 %v4445_v23  ;;  %2540 = vmatpush.bf16.msrb.mxu0 %v4506_v45 }
 0x9a5   :  { %v2282_v60 = vpop.f32.mrf.mxu0 }
 0x9a6   :  { %v2326_v62 = vadd.f32 %v4635_v57, %v2282_v60 }
 0x9aa   :  { %v2256_v19 = vpop.f32.mrf.mxu2  ;;  %v2269_v18 = vpop.f32.mrf.mxu3 }
 0x9ab   :  { %v2286_v24 = vadd.f32 %v2256_v19, %v1656_v10  ;;  %v2306_v21 = vadd.f32 %v2269_v18, %v1685_v34  ;;  %v1658_v10 = vadd.f32 %v4626_v52, %v4613_v11 }
 0x9ad   :  { %v3440_v63 = vmul.f32 -1.442695, %v2286_v24  ;;  %v3441_v29 = vmul.f32 -1.442695, %v2306_v21  ;;  %v2284_v5 = vpop.f32.mrf.mxu0  ;;  %v3610_v24 = vld [vmem:[%s5062_s7 + $0x28] sm:$0xff] }
 0x9af   :  { %3763 = vpow2.f32 %v3440_v63  ;;  %v3609_v63 = vld [vmem:[%s5062_s7 + $0x20] sm:$0xff] }
 0x9b0   :  { %3765 = vpow2.f32 %v3441_v29 }
 0x9b2   :  { %v2258_v1 = vpop.f32.mrf.mxu2  ;;  %v2271_v23 = vpop.f32.mrf.mxu3 }
 0x9b3   :  { %v3608_v23 = vld [vmem:[%s5062_s7 + $0x18] sm:$0xff] }
 0x9b5   :  { %v3764_v37 = vpop.eup %3763 }
 0x9b6   :  { %v3766_v47 = vpop.eup %3765  ;;  %v2290_v33 = vadd.f32 1.0, %v3764_v37 }
 0x9b7   :  { %v2310_v45 = vadd.f32 1.0, %v3766_v47 }
 0x9b8   :  { %3767 = vrcp.f32 %v2290_v33  ;;  %v2302_v13 = vand.u32 2147483648, %v2290_v33  ;;  %v2300_v3 = vand.u32 2147483647, %v2290_v33  ;;  %vm2296_vm2 = vweird.f32 %v2290_v33 }
 0x9b9   :  { %3769 = vrcp.f32 %v2310_v45  ;;  %v2322_v32 = vand.u32 2147483648, %v2310_v45  ;;  %vm2316_vm6 = vweird.f32 %v2310_v45  ;;  %v2320_v2 = vand.u32 2147483647, %v2310_v45 }
 0x9ba   :  { %v2303_v28 = vor.u32 1.1754944e-38, %v2302_v13  ;;  %vm2301_vm4 = vcmp.eq.f32.partialorder %v2300_v3, 8.507059e+37 }
 0x9bb   :  { %v2323_v55 = vor.u32 1.1754944e-38, %v2322_v32  ;;  %vm2321_vm8 = vcmp.eq.f32.partialorder %v2320_v2, 8.507059e+37 }
 0x9be   :  { %v3768_v15 = vpop.eup %3767 }
 0x9bf   :  { %v3770_v59 = vpop.eup %3769  ;;  %v2292_v35 = vmul.f32 %v3768_v15, %v2290_v33  ;;  %vm2297_vm1 = vweird.f32 %v3768_v15  ;;  %v3607_v33 = vld [vmem:[%s5062_s7 + $0x10] sm:$0xff] }
 0x9c0   :  { %v2312_v41 = vmul.f32 %v3770_v59, %v2310_v45  ;;  %vm2298_vm3 = vmor %vm2296_vm2, %vm2297_vm1  ;;  %vm2317_vm5 = vweird.f32 %v3770_v59 }
 0x9c1   :  { %v2293_v7 = vsub.f32 1.0, %v2292_v35  ;;  %vm2318_vm7 = vmor %vm2316_vm6, %vm2317_vm5 }
 0x9c2   :  { %v2313_v17 = vsub.f32 1.0, %v2312_v41 }
 0x9c3   :  { %v2294_v22 = vmul.f32 %v3768_v15, %v2293_v7  ;;  %v3606_v7 = vld [vmem:[%s5062_s7 + $0x8] sm:$0xff] }
 0x9c4   :  { %v2314_v31 = vmul.f32 %v3770_v59, %v2313_v17 }
 0x9c5   :  { %v2295_v43 = vadd.f32 %v3768_v15, %v2294_v22 }
 0x9c6   :  { %v2315_v20 = vadd.f32 %v3770_v59, %v2314_v31 }
 0x9c7   :  { %v2299_v38 = vsel %vm2298_vm3, %v3768_v15, %v2295_v43  ;;  %v2624_v43 = vmul.f32 0.044715, %v4699_v58 }
 0x9c8   :  { %v2304_v16 = vsel %vm2301_vm4, %v2303_v28, %v2299_v38  ;;  %v2319_v0 = vsel %vm2318_vm7, %v3770_v59, %v2315_v20  ;;  %v3605_v38 = vld [vmem:[%s5062_s7] sm:$0xff] }
 0x9c9   :  { %v2327_v40 = vmul.f32 %v2326_v62, %v2304_v16  ;;  %v2324_v51 = vsel %vm2321_vm8, %v2323_v55, %v2319_v0  ;;  %v2632_v20 = vmul.f32 %v2624_v43, %v4699_v58 }
 0x9cb   :  { %v2328_v8 = vadd.f32 %v2327_v40, %v1714_v27  ;;  %v2623_v27 = vmul.f32 0.044715, %v4641_v46  ;;  %v1716_v40 = vadd.f32 %v4683_v44, %v4637_v39  ;;  %v2640_v0 = vmul.f32 %v2632_v20, %v4699_v58 }
 0x9cd   :  { %3771 = vtanh.f32 %v2328_v8  ;;  %v2631_v2 = vmul.f32 %v2623_v27, %v4641_v46  ;;  %v2617_v27 = vmul.f32 0.5, %v4735_v36 }
 0x9d3   :  { %v3772_v42 = vpop.eup %3771 }
 0x9d4   :  { %v2330_v61 = vsub.f32 %v4771_v48, %v3772_v42 }
 0x9d6   :  { %v2331_v4 = vmul.f32 %v2330_v61, %v2324_v51  ;;  %v2639_v61 = vmul.f32 %v2631_v2, %v4641_v46  ;;  %v2648_v51 = vadd.f32 %v2640_v0, %v4699_v58 }
 0x9d8   :  { %v4807_v60 = vadd.f32 %v3772_v42, %v2331_v4 }
 0x9da   :  { %v2337_v53 = vpack.c.bf16 %v4807_v60, %v4807_v60 }
 0x9dc   :  { %2346 = vmatmul.bf16.vlgmr.msrb.gmra.mxu1 %v2337_v53  ;;  %2359 = vmatmul.bf16.vlgmr.msrb.gmra.mxu2 %v2337_v53 }
 0x9dd   :  { %2372 = vmatmul.bf16.vlgmr.msra.gmra.mxu3 %v2337_v53  ;;  %2546 = vmatpush.bf16.msrb.mxu1 %v4525_v9 }
 0x9e1   :  { %2547 = vmatpush.bf16.msrb.mxu1 %v4532_v6  ;;  %v3612_v6 = vld [vmem:[%s5062_s7 + $0x38] sm:$0xff] }
 0x9e2   :  { %2759 = vmatpush.bf16.msrb.mxu2 %v3612_v6  ;;  %v2656_v6 = vmul.f32 0.7978846, %v2648_v51  ;;  %v5087_v51 = vld [vmem:[#allocation11_spill] sm:$0xff] }
 0x9e5   :  { %2548 = vmatpush.bf16.msrb.mxu1 %v4537_v26  ;;  %v1687_v26 = vadd.f32 %v4681_v30, %v4621_v12 }
 0x9e9   :  { %2549 = vmatpush.bf16.msrb.mxu1 %v4542_v54 }
 0x9ed   :  { %2550 = vmatpush.bf16.msrb.mxu1 %v4547_v25 }
 0x9f1   :  { %2551 = vmatpush.bf16.msrb.mxu1 %v4557_v50 }
 0x9f5   :  { %2552 = vmatpush.bf16.msrb.mxu1 %v4564_v14  ;;  %v3611_v14 = vld [vmem:[%s5062_s7 + $0x30] sm:$0xff] }
 0x9f6   :  { %2760 = vmatpush.bf16.msrb.mxu2 %v3611_v14 }
 0x9f9   :  { %2553 = vmatpush.bf16.msrb.mxu1 %v4571_v56 }
 0x9fa   :  { %2761 = vmatpush.bf16.msrb.mxu2 %v3610_v24 }
 0x9fe   :  { %2762 = vmatpush.bf16.msrb.mxu2 %v3609_v63 }
 0xa02   :  { %2763 = vmatpush.bf16.msrb.mxu2 %v3608_v23 }
 0xa06   :  { %2764 = vmatpush.bf16.msrb.mxu2 %v3607_v33  ;;  %v2615_v33 = vmul.f32 0.5, %v4641_v46 }
 0xa0a   :  { %2765 = vmatpush.bf16.msrb.mxu2 %v3606_v7 }
 0xa0e   :  { %2766 = vmatpush.bf16.msrb.mxu2 %v3605_v38 }
 0xa59   :  { %v2347_v34 = vpop.f32.mrf.mxu1 }
 0xa5a   :  { %v2377_v19 = vadd.f32 %v2347_v34, %v1658_v10  ;;  %v2647_v34 = vadd.f32 %v2639_v61, %v4641_v46 }
 0xa5c   :  { %v3442_v9 = vmul.f32 -1.442695, %v2377_v19 }
 0xa5e   :  { %3773 = vpow2.f32 %v3442_v9 }
 0xa5f   :  { %v2360_v54 = vpop.f32.mrf.mxu2 }
 0xa60   :  { %v2397_v25 = vadd.f32 %v2360_v54, %v1687_v26  ;;  %v2373_v50 = vpop.f32.mrf.mxu3  ;;  %v2626_v26 = vmul.f32 0.044715, %v4771_v48 }
 0xa61   :  { %v2349_v56 = vpop.f32.mrf.mxu1  ;;  %v2417_v62 = vadd.f32 %v4635_v57, %v2373_v50  ;;  %v2625_v50 = vmul.f32 0.044715, %v4735_v36 }
 0xa62   :  { %v3443_v52 = vmul.f32 -1.442695, %v2397_v25  ;;  %v2655_v25 = vmul.f32 0.7978846, %v2647_v34  ;;  %v2634_v56 = vmul.f32 %v2626_v26, %v4771_v48 }
 0xa64   :  { %v3774_v18 = vpop.eup %3773  ;;  %3775 = vpow2.f32 %v3443_v52  ;;  %v2633_v52 = vmul.f32 %v2625_v50, %v4735_v36 }
 0xa65   :  { %v2381_v21 = vadd.f32 1.0, %v3774_v18  ;;  %v2642_v18 = vmul.f32 %v2634_v56, %v4771_v48 }
 0xa67   :  { %3777 = vrcp.f32 %v2381_v21  ;;  %v2362_v30 = vpop.f32.mrf.mxu2  ;;  %v2393_v15 = vand.u32 2147483648, %v2381_v21  ;;  %v2391_v35 = vand.u32 2147483647, %v2381_v21  ;;  %vm2387_vm10 = vweird.f32 %v2381_v21 }
 0xa68   :  { %v2375_v29 = vpop.f32.mrf.mxu3  ;;  %v2650_v63 = vadd.f32 %v2642_v18, %v4771_v48 }
 0xa69   :  { %v2394_v3 = vor.u32 1.1754944e-38, %v2393_v15  ;;  %vm2392_vm12 = vcmp.eq.f32.partialorder %v2391_v35, 8.507059e+37 }
 0xa6a   :  { %v3776_v5 = vpop.eup %3775 }
 0xa6b   :  { %v2401_v1 = vadd.f32 1.0, %v3776_v5 }
 0xa6d   :  { %v3778_v37 = vpop.eup %3777  ;;  %3779 = vrcp.f32 %v2401_v1  ;;  %v2413_v42 = vand.u32 2147483648, %v2401_v1  ;;  %vm2407_vm14 = vweird.f32 %v2401_v1  ;;  %v2411_v55 = vand.u32 2147483647, %v2401_v1 }
 0xa6e   :  { %v2383_v47 = vmul.f32 %v3778_v37, %v2381_v21  ;;  %vm2388_vm9 = vweird.f32 %v3778_v37  ;;  %v2641_v21 = vmul.f32 %v2633_v52, %v4735_v36 }
 0xa6f   :  { %vm2389_vm11 = vmor %vm2387_vm10, %vm2388_vm9  ;;  %v2414_v53 = vor.u32 1.1754944e-38, %v2413_v42  ;;  %vm2412_vm0 = vcmp.eq.f32.partialorder %v2411_v55, 8.507059e+37  ;;  %v2619_v55 = vmul.f32 0.5, %v4807_v60  ;;  %vm2796_vm9 = vcmask 261120  }
 0xa70   :  { %v2384_v45 = vsub.f32 1.0, %v2383_v47  ;;  %v2649_v5 = vadd.f32 %v2641_v21, %v4735_v36  ;;  %v1661_v36 = vadd.f32 %v4628_v49, %v4613_v11 }
 0xa72   :  { %v2385_v59 = vmul.f32 %v3778_v37, %v2384_v45  ;;  %v2657_v15 = vmul.f32 0.7978846, %v2649_v5  ;;  %v2791_v5 = vld [vmem:[%s5064_s9 + $0x18] sm:$0xff] }
 0xa73   :  { %v3780_v13 = vpop.eup %3779  ;;  %2833 = vmatpush.msra.mxu3 %v2791_v5 }
 0xa74   :  { %v2403_v41 = vmul.f32 %v3780_v13, %v2401_v1  ;;  %v2386_v22 = vadd.f32 %v3778_v37, %v2385_v59  ;;  %vm2408_vm13 = vweird.f32 %v3780_v13  ;;  %v2616_v1 = vmul.f32 0.5, %v4699_v58 }
 0xa75   :  { %vm2409_vm15 = vmor %vm2407_vm14, %vm2408_vm13  ;;  %v2627_v59 = vmul.f32 0.044715, %v4807_v60 }
 0xa76   :  { %v2404_v28 = vsub.f32 1.0, %v2403_v41  ;;  %v2390_v17 = vsel %vm2389_vm11, %v3778_v37, %v2386_v22  ;;  %v2658_v37 = vmul.f32 0.7978846, %v2650_v63 }
 0xa77   :  { %v2395_v16 = vsel %vm2392_vm12, %v2394_v3, %v2390_v17  ;;  %v2635_v41 = vmul.f32 %v2627_v59, %v4807_v60 }
 0xa78   :  { %v2418_v31 = vmul.f32 %v2417_v62, %v2395_v16  ;;  %v2405_v8 = vmul.f32 %v3780_v13, %v2404_v28  ;;  %v2618_v62 = vmul.f32 0.5, %v4771_v48 }
 0xa79   :  { %v2643_v3 = vmul.f32 %v2635_v41, %v4807_v60 }
 0xa7a   :  { %v2419_v32 = vadd.f32 %v2418_v31, %v1716_v40  ;;  %v2406_v57 = vadd.f32 %v3780_v13, %v2405_v8 }
 0xa7b   :  { %v2651_v17 = vadd.f32 %v2643_v3, %v4807_v60 }
 0xa7c   :  { %3781 = vtanh.f32 %v2419_v32  ;;  %v2410_v44 = vsel %vm2409_vm15, %v3780_v13, %v2406_v57 }
 0xa7d   :  { %v2415_v19 = vsel %vm2412_vm0, %v2414_v53, %v2410_v44  ;;  %3783 = vtanh.f32 %v2656_v6  ;;  %v2659_v31 = vmul.f32 0.7978846, %v2651_v17  ;;  %v2788_v17 = vld [vmem:[%s5064_s9] sm:$0xff] }
 0xa7e   :  { %3785 = vtanh.f32 %v2655_v25 }
 0xa7f   :  { %3787 = vtanh.f32 %v2658_v37 }
 0xa80   :  { %3789 = vtanh.f32 %v2657_v15 }
 0xa82   :  { %v3782_v4 = vpop.eup %3781 }
 0xa83   :  { %v2421_v10 = vsub.f32 %v4807_v60, %v3782_v4  ;;  %v3784_v24 = vpop.eup %3783 }
 0xa84   :  { %v3786_v30 = vpop.eup %3785  ;;  %v2672_v29 = vadd.f32 1.0, %v3784_v24 }
 0xa85   :  { %v2422_v9 = vmul.f32 %v2421_v10, %v2415_v19  ;;  %v2671_v23 = vadd.f32 1.0, %v3786_v30  ;;  %v3788_v22 = vpop.eup %3787 }
 0xa86   :  { %v2680_v45 = vmul.f32 %v2672_v29, %v2616_v1  ;;  %v3790_v43 = vpop.eup %3789  ;;  %v2674_v28 = vadd.f32 1.0, %v3788_v22  ;;  %v2885_v1 = vld [vmem:[%s5067_s12 + $0x18] sm:$0xff] }
 0xa87   :  { %v4860_v54 = vadd.f32 %v3782_v4, %v2422_v9  ;;  %v2679_v35 = vmul.f32 %v2671_v23, %v2615_v33  ;;  %v2673_v38 = vadd.f32 1.0, %v3790_v43  ;;  %v1690_v4 = vadd.f32 %v5087_v51, %v4621_v12  ;;  %v2790_v23 = vld [vmem:[%s5064_s9 + $0x10] sm:$0xff] }
 0xa88   :  { %v2682_v40 = vmul.f32 %v2674_v28, %v2618_v62  ;;  %v2884_v33 = vld [vmem:[%s5067_s12 + $0x10] sm:$0xff]  ;;  %2834 = vmatpush.msra.mxu3 %v2790_v23  ;;  %v2883_v28 = vld [vmem:[%s5067_s12 + $0x8] sm:$0xff] }
 0xa89   :  { %v2428_v14 = vpack.c.bf16 %v4860_v54, %v4860_v54  ;;  %v2628_v47 = vmul.f32 0.044715, %v4860_v54  ;;  %v2687_v13 = vpack.c.bf16 %v2680_v45, %v2679_v35  ;;  %v2681_v8 = vmul.f32 %v2673_v38, %v2617_v27  ;;  %v2882_v38 = vld [vmem:[%s5067_s12] sm:$0xff] }
 0xa8a   :  { %v2620_v0 = vmul.f32 0.5, %v4860_v54 }
 0xa8b   :  { %2437 = vmatmul.bf16.vlgmr.msra.gmra.mxu0 %v2428_v14  ;;  %2450 = vmatmul.bf16.vlgmr.msra.gmra.mxu1 %v2428_v14  ;;  %v2636_v7 = vmul.f32 %v2628_v47, %v4860_v54  ;;  %v2688_v20 = vpack.c.bf16 %v2682_v40, %v2681_v8 }
 0xa8c   :  { %2463 = vmatmul.bf16.vlgmr.msra.gmra.mxu2 %v2428_v14  ;;  %2898 = vmatpush.msra.mxu0 %v2885_v1 }
 0xa8d   :  { %v2644_v58 = vmul.f32 %v2636_v7, %v4860_v54  ;;  %v4904_v7 = vld [vmem:[%s5061_s6 + $0x1] ss:$0 sm:$0xff] }
 0xa8e   :  { %2899 = vmatpush.msra.mxu0 %v2884_v33 }
 0xa8f   :  { %v2652_v46 = vadd.f32 %v2644_v58, %v4860_v54  ;;  %v5088_v58 = vld [vmem:[#allocation12_spill] sm:$0xff] }
 0xa90   :  { %v1719_v22 = vadd.f32 %v5088_v58, %v4637_v39  ;;  %2900 = vmatpush.msra.mxu0 %v2883_v28 }
 0xa91   :  { %v2660_v16 = vmul.f32 0.7978846, %v2652_v46  ;;  %v2789_v46 = vld [vmem:[%s5064_s9 + $0x8] sm:$0xff] }
 0xa92   :  { %2835 = vmatpush.msra.mxu3 %v2789_v46  ;;  %2901 = vmatpush.msra.mxu0 %v2882_v38 }
 0xa93   :  { %3791 = vtanh.f32 %v2660_v16 }
 0xa94   :  { %3793 = vtanh.f32 %v2659_v31  ;;  %2836 = vmatpush.msra.mxu3 %v2788_v17 }
 0xa99   :  { %v3792_v32 = vpop.eup %3791 }
 0xa9a   :  { %v3794_v2 = vpop.eup %3793  ;;  %v2676_v57 = vadd.f32 1.0, %v3792_v32 }
 0xa9b   :  { %v2675_v42 = vadd.f32 1.0, %v3794_v2 }
 0xa9c   :  { %2767 = vmatmul.bf16.vlgmr.msrb.gmra.mxu2 %v2687_v13  ;;  %v2684_v48 = vmul.f32 %v2676_v57, %v2620_v0 }
 0xa9d   :  { %v2683_v61 = vmul.f32 %v2675_v42, %v2619_v55 }
 0xa9f   :  { %v2689_v44 = vpack.c.bf16 %v2684_v48, %v2683_v61  ;;  %v4929_v48 = vld [vmem:[%s5063_s8] ss:$0 sm:$0xff] }
 0xaac   :  { %2772 = vmatmul.bf16.gmra.mxu2 %v2688_v20 }
 0xabc   :  { %2777 = vmatmul.bf16.gmra.mxu2 %v2689_v44 }
 0xb08   :  { %v2438_v53 = vpop.f32.mrf.mxu0  ;;  %v2451_v10 = vpop.f32.mrf.mxu1 }
 0xb09   :  { %v2468_v34 = vadd.f32 %v2438_v53, %v1661_v36  ;;  %v2488_v19 = vadd.f32 %v2451_v10, %v1690_v4 }
 0xb0b   :  { %v3444_v9 = vmul.f32 -1.442695, %v2468_v34  ;;  %v3445_v6 = vmul.f32 -1.442695, %v2488_v19 }
 0xb0d   :  { %3795 = vpow2.f32 %v3444_v9 }
 0xb0e   :  { %3797 = vpow2.f32 %v3445_v6  ;;  %v2881_v6 = vld [vmem:[%s5066_s11 + $0x18] sm:$0xff] }
 0xb0f   :  { %v2464_v26 = vpop.f32.mrf.mxu2  ;;  %2963 = vmatpush.msra.mxu1 %v2881_v6 }
 0xb10   :  { %v2440_v60 = vpop.f32.mrf.mxu0  ;;  %v2453_v25 = vpop.f32.mrf.mxu1  ;;  %v2508_v13 = vadd.f32 %v4904_v7, %v2464_v26  ;;  %v2880_v26 = vld [vmem:[%s5066_s11 + $0x10] sm:$0xff] }
 0xb11   :  { %v5089_v60 = vld [vmem:[#allocation13_spill] sm:$0xff]  ;;  %2964 = vmatpush.msra.mxu1 %v2880_v26 }
 0xb12   :  { %v1692_v25 = vadd.f32 %v5089_v60, %v4621_v12  ;;  %v5090_v12 = vld [vmem:[#allocation10_spill] sm:$0xff] }
 0xb13   :  { %v3796_v50 = vpop.eup %3795 }
 0xb14   :  { %v3798_v14 = vpop.eup %3797  ;;  %v2472_v56 = vadd.f32 1.0, %v3796_v50 }
 0xb15   :  { %v2492_v52 = vadd.f32 1.0, %v3798_v14  ;;  %v2879_v14 = vld [vmem:[%s5066_s11 + $0x8] sm:$0xff] }
 0xb16   :  { %3799 = vrcp.f32 %v2472_v56  ;;  %v2484_v29 = vand.u32 2147483648, %v2472_v56  ;;  %v2482_v47 = vand.u32 2147483647, %v2472_v56  ;;  %vm2478_vm2 = vweird.f32 %v2472_v56  ;;  %2965 = vmatpush.msra.mxu1 %v2879_v14 }
 0xb17   :  { %3801 = vrcp.f32 %v2492_v52  ;;  %v2466_v49 = vpop.f32.mrf.mxu2  ;;  %v2504_v27 = vand.u32 2147483648, %v2492_v52  ;;  %vm2498_vm6 = vweird.f32 %v2492_v52  ;;  %v2502_v40 = vand.u32 2147483647, %v2492_v52 }
 0xb18   :  { %v2485_v59 = vor.u32 1.1754944e-38, %v2484_v29  ;;  %vm2483_vm4 = vcmp.eq.f32.partialorder %v2482_v47, 8.507059e+37  ;;  %v2878_v49 = vld [vmem:[%s5066_s11] sm:$0xff] }
 0xb19   :  { %v2505_v20 = vor.u32 1.1754944e-38, %v2504_v27  ;;  %vm2503_vm8 = vcmp.eq.f32.partialorder %v2502_v40, 8.507059e+37  ;;  %2966 = vmatpush.msra.mxu1 %v2878_v49 }
 0xb1c   :  { %v3800_v18 = vpop.eup %3799 }
 0xb1d   :  { %v3802_v24 = vpop.eup %3801  ;;  %v2474_v21 = vmul.f32 %v3800_v18, %v2472_v56  ;;  %vm2479_vm1 = vweird.f32 %v3800_v18 }
 0xb1e   :  { %v2494_v63 = vmul.f32 %v3802_v24, %v2492_v52  ;;  %vm2480_vm3 = vmor %vm2478_vm2, %vm2479_vm1  ;;  %vm2499_vm5 = vweird.f32 %v3802_v24 }
 0xb1f   :  { %v2475_v30 = vsub.f32 1.0, %v2474_v21  ;;  %vm2500_vm7 = vmor %vm2498_vm6, %vm2499_vm5  ;;  %v2768_v55 = vpop.f32.mrf.mxu2 }
 0xb20   :  { %v2495_v15 = vsub.f32 1.0, %v2494_v63 }
 0xb21   :  { %v2476_v37 = vmul.f32 %v3800_v18, %v2475_v30 }
 0xb22   :  { %v2496_v43 = vmul.f32 %v3802_v24, %v2495_v15 }
 0xb23   :  { %v2477_v45 = vadd.f32 %v3800_v18, %v2476_v37 }
 0xb24   :  { %v2497_v16 = vadd.f32 %v3802_v24, %v2496_v43 }
 0xb25   :  { %v2481_v35 = vsel %vm2480_vm3, %v3800_v18, %v2477_v45  ;;  %v4992_v45 = vld [vmem:[%s5065_s10] ss:$0 sm:$0xff] }
 0xb26   :  { %v2486_v41 = vsel %vm2483_vm4, %v2485_v59, %v2481_v35  ;;  %v2501_v31 = vsel %vm2500_vm7, %v3802_v24, %v2497_v16  ;;  %v1663_v24 = vadd.f32 %v5090_v12, %v4613_v11 }
 0xb27   :  { %v2509_v3 = vmul.f32 %v2508_v13, %v2486_v41  ;;  %v2506_v2 = vsel %vm2503_vm8, %v2505_v20, %v2501_v31  ;;  %v2770_v61 = vpop.f32.mrf.mxu2  ;;  %v5091_v20 = vld [vmem:[#allocation14_spill] sm:$0xff] }
 0xb28   :  { %v4939_v36 = vadd.f32 %v4929_v48, %v2770_v61 }
 0xb29   :  { %v2510_v62 = vadd.f32 %v2509_v3, %v1719_v22 }
 0xb2b   :  { %3803 = vtanh.f32 %v2510_v62 }
 0xb2f   :  { %v2773_v44 = vpop.f32.mrf.mxu2 }
 0xb30   :  { %v4946_v51 = vadd.f32 %v4929_v48, %v2773_v44 }
 0xb31   :  { %v3804_v8 = vpop.eup %3803 }
 0xb32   :  { %v2512_v32 = vsub.f32 %v4860_v54, %v3804_v8  ;;  %v4932_v54 = vadd.f32 %v4929_v48, %v2768_v55 }
 0xb34   :  { %v2513_v57 = vmul.f32 %v2512_v32, %v2506_v2  ;;  %v1721_v32 = vadd.f32 %v5091_v20, %v4637_v39 }
 0xb36   :  { %v4922_v0 = vadd.f32 %v3804_v8, %v2513_v57 }
 0xb37   :  { %v2775_v4 = vpop.f32.mrf.mxu2 }
 0xb38   :  { %v2519_v42 = vpack.c.bf16 %v4922_v0, %v4922_v0  ;;  %v4953_v53 = vadd.f32 %v4929_v48, %v2775_v4  ;;  %v2629_v4 = vmul.f32 0.044715, %v4922_v0 }
 0xb3a   :  { %2528 = vmatmul.bf16.vlgmr.msrb.gmra.mxu3 %v2519_v42  ;;  %2541 = vmatmul.bf16.vlgmr.msrb.gmra.mxu0 %v2519_v42 }
 0xb3b   :  { %2554 = vmatmul.bf16.vlgmr.msrb.gmra.mxu1 %v2519_v42  ;;  %3613 = vmatpush.msrb.mxu3 %v2881_v6 }
 0xb3d   :  { %3614 = vmatpush.msrb.mxu3 %v2880_v26 }
 0xb3f   :  { %v2778_v10 = vpop.f32.mrf.mxu2  ;;  %3615 = vmatpush.msrb.mxu3 %v2879_v14 }
 0xb40   :  { %v4960_v34 = vadd.f32 %v4929_v48, %v2778_v10 }
 0xb41   :  { %3616 = vmatpush.msrb.mxu3 %v2878_v49 }
 0xb47   :  { %v2780_v19 = vpop.f32.mrf.mxu2 }
 0xb48   :  { %v4967_v9 = vadd.f32 %v4929_v48, %v2780_v19  ;;  %v2637_v19 = vmul.f32 %v2629_v4, %v4922_v0 }
 0xb4a   :  { %3480 = vmatmul.msk.f32.vlgmr.msra.gmra.mxu3 %vm2796_vm9, %v4932_v54  ;;  %3488 = vmatmul.msk.f32.vlgmr.msra.gmra.mxu0 %vm2796_vm9, %v4932_v54 }
 0xb52   :  { %3481 = vmatmul.msk.f32.gmra.mxu3 %vm2796_vm9, %v4939_v36  ;;  %3489 = vmatmul.msk.f32.gmra.mxu0 %vm2796_vm9, %v4939_v36 }
 0xb5a   :  { %3482 = vmatmul.msk.f32.gmra.mxu3 %vm2796_vm9, %v4946_v51  ;;  %3490 = vmatmul.msk.f32.gmra.mxu0 %vm2796_vm9, %v4946_v51 }
 0xb62   :  { %3483 = vmatmul.msk.f32.gmra.mxu3 %vm2796_vm9, %v4953_v53  ;;  %3491 = vmatmul.msk.f32.gmra.mxu0 %vm2796_vm9, %v4953_v53 }
 0xb6a   :  { %3484 = vmatmul.msk.f32.gmra.mxu3 %vm2796_vm9, %v4960_v34  ;;  %3492 = vmatmul.msk.f32.gmra.mxu0 %vm2796_vm9, %v4960_v34 }
 0xb72   :  { %3485 = vmatmul.msk.f32.gmra.mxu3 %vm2796_vm9, %v4967_v9  ;;  %3493 = vmatmul.msk.f32.gmra.mxu0 %vm2796_vm9, %v4967_v9 }
 0xbb7   :  { %v2542_v50 = vpop.f32.mrf.mxu0 }
 0xbb8   :  { %v2579_v56 = vadd.f32 %v2542_v50, %v1692_v25  ;;  %v2555_v52 = vpop.f32.mrf.mxu1 }
 0xbb9   :  { %v2599_v40 = vadd.f32 %v4904_v7, %v2555_v52 }
 0xbba   :  { %v3447_v18 = vmul.f32 -1.442695, %v2579_v56  ;;  %v2645_v56 = vmul.f32 %v2637_v19, %v4922_v0 }
 0xbbc   :  { %3805 = vpow2.f32 %v3447_v18 }
 0xbbd   :  { %v2529_v21 = vpop.f32.mrf.mxu3 }
 0xbbe   :  { %v2559_v30 = vadd.f32 %v2529_v21, %v1663_v24  ;;  %v2653_v24 = vadd.f32 %v2645_v56, %v4922_v0 }
 0xbbf   :  { %v2544_v63 = vpop.f32.mrf.mxu0 }
 0xbc0   :  { %v3446_v29 = vmul.f32 -1.442695, %v2559_v30  ;;  %v2557_v5 = vpop.f32.mrf.mxu1 }
 0xbc2   :  { %3807 = vpow2.f32 %v3446_v29  ;;  %v3806_v1 = vpop.eup %3805 }
 0xbc3   :  { %v2583_v47 = vadd.f32 1.0, %v3806_v1 }
 0xbc5   :  { %v2531_v23 = vpop.f32.mrf.mxu3  ;;  %v2595_v7 = vand.u32 2147483648, %v2583_v47  ;;  %vm2589_vm15 = vweird.f32 %v2583_v47  ;;  %v2593_v39 = vand.u32 2147483647, %v2583_v47 }
 0xbc6   :  { %v2661_v23 = vmul.f32 0.7978846, %v2653_v24 }
 0xbc7   :  { %v2596_v25 = vor.u32 1.1754944e-38, %v2595_v7  ;;  %vm2594_vm1 = vcmp.eq.f32.partialorder %v2593_v39, 8.507059e+37 }
 0xbc8   :  { %v3808_v37 = vpop.eup %3807 }
 0xbc9   :  { %v2563_v33 = vadd.f32 1.0, %v3808_v37 }
 0xbcb   :  { %3809 = vrcp.f32 %v2563_v33  ;;  %v2575_v22 = vand.u32 2147483648, %v2563_v33  ;;  %v2573_v28 = vand.u32 2147483647, %v2563_v33  ;;  %vm2569_vm11 = vweird.f32 %v2563_v33 }
 0xbcc   :  { %3811 = vrcp.f32 %v2583_v47 }
 0xbcd   :  { %v2838_v11 = vpop.f32.mrf.mxu3  ;;  %v2576_v27 = vor.u32 1.1754944e-38, %v2575_v22  ;;  %vm2574_vm13 = vcmp.eq.f32.partialorder %v2573_v28, 8.507059e+37 }
 0xbce   :  { %v2839_v15 = vadd.f32 %v4992_v45, %v2838_v11 }
 0xbd0   :  { %3813 = vrcp.f32 %v2839_v15 }
 0xbd1   :  { %v3810_v59 = vpop.eup %3809 }
 0xbd2   :  { %v3812_v35 = vpop.eup %3811  ;;  %v2565_v13 = vmul.f32 %v3810_v59, %v2563_v33  ;;  %vm2570_vm10 = vweird.f32 %v3810_v59 }
 0xbd3   :  { %v2585_v58 = vmul.f32 %v3812_v35, %v2583_v47  ;;  %vm2571_vm12 = vmor %vm2569_vm11, %vm2570_vm10  ;;  %vm2590_vm14 = vweird.f32 %v3812_v35 }
 0xbd4   :  { %v2566_v41 = vsub.f32 1.0, %v2565_v13  ;;  %vm2591_vm0 = vmor %vm2589_vm15, %vm2590_vm14 }
 0xbd5   :  { %v2841_v3 = vpop.f32.mrf.mxu3  ;;  %v2586_v16 = vsub.f32 1.0, %v2585_v58  ;;  %v2621_v58 = vmul.f32 0.5, %v4922_v0 }
 0xbd6   :  { %v3814_v43 = vpop.eup %3813  ;;  %v2567_v46 = vmul.f32 %v3810_v59, %v2566_v41  ;;  %v2842_v17 = vadd.f32 %v4992_v45, %v2841_v3 }
 0xbd7   :  { %v2870_v62 = vmul.f32 %v3814_v43, %v4932_v54  ;;  %v2587_v57 = vmul.f32 %v3812_v35, %v2586_v16 }
 0xbd8   :  { %v2568_v38 = vadd.f32 %v3810_v59, %v2567_v46  ;;  %3815 = vrcp.f32 %v2842_v17 }
 0xbd9   :  { %3496 = vmatmul.msk.f32.vlgmr.msra.gmra.mxu1 %vm2796_vm9, %v2870_v62  ;;  %v2588_v10 = vadd.f32 %v3812_v35, %v2587_v57 }
 0xbda   :  { %v2572_v31 = vsel %vm2571_vm12, %v3810_v59, %v2568_v38 }
 0xbdb   :  { %v2577_v8 = vsel %vm2574_vm13, %v2576_v27, %v2572_v31  ;;  %v2592_v6 = vsel %vm2591_vm0, %v3812_v35, %v2588_v10 }
 0xbdc   :  { %v2600_v2 = vmul.f32 %v2599_v40, %v2577_v8  ;;  %v2597_v52 = vsel %vm2594_vm1, %v2596_v25, %v2592_v6 }
 0xbdd   :  { %v2844_v42 = vpop.f32.mrf.mxu3 }
 0xbde   :  { %v3816_v55 = vpop.eup %3815  ;;  %v2601_v61 = vadd.f32 %v2600_v2, %v1721_v32  ;;  %v2845_v54 = vadd.f32 %v4992_v45, %v2844_v42 }
 0xbdf   :  { %v2871_v44 = vmul.f32 %v3816_v55, %v4939_v36 }
 0xbe0   :  { %3817 = vtanh.f32 %v2601_v61 }
 0xbe1   :  { %3819 = vrcp.f32 %v2845_v54  ;;  %3497 = vmatmul.msk.f32.gmra.mxu1 %vm2796_vm9, %v2871_v44 }
 0xbe5   :  { %v2847_v26 = vpop.f32.mrf.mxu3 }
 0xbe6   :  { %v3818_v60 = vpop.eup %3817  ;;  %v2848_v36 = vadd.f32 %v4992_v45, %v2847_v26 }
 0xbe7   :  { %v3820_v50 = vpop.eup %3819  ;;  %v2603_v14 = vsub.f32 %v4922_v0, %v3818_v60 }
 0xbe8   :  { %3821 = vrcp.f32 %v2848_v36  ;;  %v2872_v49 = vmul.f32 %v3820_v50, %v4946_v51 }
 0xbe9   :  { %v2604_v18 = vmul.f32 %v2603_v14, %v2597_v52 }
 0xbea   :  { %3498 = vmatmul.msk.f32.gmra.mxu1 %vm2796_vm9, %v2872_v49 }
 0xbeb   :  { %v2605_v12 = vadd.f32 %v3818_v60, %v2604_v18 }
 0xbed   :  { %v2850_v21 = vpop.f32.mrf.mxu3  ;;  %v2630_v30 = vmul.f32 0.044715, %v2605_v12  ;;  %v2622_v22 = vmul.f32 0.5, %v2605_v12 }
 0xbee   :  { %v3822_v63 = vpop.eup %3821  ;;  %v2851_v29 = vadd.f32 %v4992_v45, %v2850_v21 }
 0xbef   :  { %v2873_v5 = vmul.f32 %v3822_v63, %v4953_v53  ;;  %v2638_v1 = vmul.f32 %v2630_v30, %v2605_v12 }
 0xbf0   :  { %3823 = vrcp.f32 %v2851_v29 }
 0xbf1   :  { %v2646_v37 = vmul.f32 %v2638_v1, %v2605_v12  ;;  %3825 = vtanh.f32 %v2661_v23 }
 0xbf2   :  { %3499 = vmatmul.msk.f32.gmra.mxu1 %vm2796_vm9, %v2873_v5 }
 0xbf3   :  { %v2654_v51 = vadd.f32 %v2646_v37, %v2605_v12 }
 0xbf5   :  { %v2853_v47 = vpop.f32.mrf.mxu3  ;;  %v2662_v33 = vmul.f32 0.7978846, %v2654_v51 }
 0xbf6   :  { %v3824_v11 = vpop.eup %3823  ;;  %v2854_v15 = vadd.f32 %v4992_v45, %v2853_v47 }
 0xbf7   :  { %v2874_v59 = vmul.f32 %v3824_v11, %v4960_v34  ;;  %3827 = vtanh.f32 %v2662_v33  ;;  %v3826_v35 = vpop.eup %3825  ;;  %v2903_v34 = vpop.f32.mrf.mxu0 }
 0xbf8   :  { %3829 = vrcp.f32 %v2854_v15  ;;  %v2677_v53 = vadd.f32 1.0, %v3826_v35 }
 0xbfa   :  { %3500 = vmatmul.msk.f32.gmra.mxu1 %vm2796_vm9, %v2874_v59  ;;  %v2685_v46 = vmul.f32 %v2677_v53, %v2621_v58 }
 0xbfd   :  { %v3828_v13 = vpop.eup %3827 }
 0xbfe   :  { %v3830_v41 = vpop.eup %3829  ;;  %v2678_v3 = vadd.f32 1.0, %v3828_v13 }
 0xbff   :  { %v2875_v43 = vmul.f32 %v3830_v41, %v4967_v9  ;;  %v2906_v38 = vpop.f32.mrf.mxu0 }
 0xc00   :  { %v2686_v28 = vmul.f32 %v2678_v3, %v2622_v22 }
 0xc02   :  { %3501 = vmatmul.msk.f32.gmra.mxu1 %vm2796_vm9, %v2875_v43  ;;  %v2690_v17 = vpack.c.bf16 %v2686_v28, %v2685_v46 }
 0xc04   :  { %2782 = vmatmul.bf16.gmra.mxu2 %v2690_v17 }
 0xc07   :  { %v2909_v40 = vpop.f32.mrf.mxu0 }
 0xc0f   :  { %v2912_v8 = vpop.f32.mrf.mxu0 }
 0xc17   :  { %v2915_v2 = vpop.f32.mrf.mxu0 }
 0xc1f   :  { %v2918_v55 = vpop.f32.mrf.mxu0 }
 0xc56   :  { %v2968_v62 = vpop.f32.mrf.mxu1 }
 0xc57   :  { %v2969_v16 = vadd.f32 %v2968_v62, %v2903_v34 }
 0xc59   :  { %2992 = vst [vmem:[%s5068_s13] sm:$0xff] %v2969_v16 }
 0xc5e   :  { %v2971_v27 = vpop.f32.mrf.mxu1 }
 0xc5f   :  { %v2972_v0 = vadd.f32 %v2971_v27, %v2906_v38 }
 0xc61   :  { %2993 = vst [vmem:[%s5068_s13 + $0x8] sm:$0xff] %v2972_v0 }
 0xc67   :  { %v2974_v9 = vpop.f32.mrf.mxu1 }
 0xc68   :  { %v2975_v31 = vadd.f32 %v2974_v9, %v2909_v40 }
 0xc6a   :  { %2994 = vst [vmem:[%s5068_s13 + $0x10] sm:$0xff] %v2975_v31 }
 0xc6f   :  { %v2977_v20 = vpop.f32.mrf.mxu1 }
 0xc70   :  { %v2978_v32 = vadd.f32 %v2977_v20, %v2912_v8 }
 0xc72   :  { %2995 = vst [vmem:[%s5068_s13 + $0x18] sm:$0xff] %v2978_v32 }
 0xc77   :  { %v2980_v57 = vpop.f32.mrf.mxu1 }
 0xc78   :  { %v2981_v42 = vadd.f32 %v2980_v57, %v2915_v2 }
 0xc7a   :  { %2996 = vst [vmem:[%s5068_s13 + $0x20] sm:$0xff] %v2981_v42 }
 0xc7f   :  { %v2983_v61 = vpop.f32.mrf.mxu1 }
 0xc80   :  { %v2984_v54 = vadd.f32 %v2983_v61, %v2918_v55 }
 0xc82   :  { %2997 = vst [vmem:[%s5068_s13 + $0x28] sm:$0xff] %v2984_v54 }
 0xc87   :  { %v2783_v44 = vpop.f32.mrf.mxu2 }
 0xc88   :  { %v2784_v4 = vadd.f32 %v4929_v48, %v2783_v44 }
 0xc8a   :  { %3486 = vmatmul.msk.f32.gmra.mxu3 %vm2796_vm9, %v2784_v4  ;;  %3494 = vmatmul.msk.f32.gmra.mxu0 %vm2796_vm9, %v2784_v4 }
 0xc8f   :  { %v2785_v10 = vpop.f32.mrf.mxu2 }
 0xc90   :  { %v2786_v7 = vadd.f32 %v4929_v48, %v2785_v10 }
 0xc92   :  { %3487 = vmatmul.msk.f32.gmra.mxu3 %vm2796_vm9, %v2786_v7  ;;  %3495 = vmatmul.msk.f32.gmra.mxu0 %vm2796_vm9, %v2786_v7 }
 0xd07   :  { %v2921_v48 = vpop.f32.mrf.mxu0 }
 0xd0d   :  { %v2856_v39 = vpop.f32.mrf.mxu3 }
 0xd0e   :  { %v2857_v19 = vadd.f32 %v4992_v45, %v2856_v39 }
 0xd0f   :  { %v2924_v52 = vpop.f32.mrf.mxu0 }
 0xd10   :  { %3831 = vrcp.f32 %v2857_v19 }
 0xd15   :  { %v2859_v6 = vpop.f32.mrf.mxu3 }
 0xd16   :  { %v3832_v26 = vpop.eup %3831  ;;  %v2860_v60 = vadd.f32 %v4992_v45, %v2859_v6 }
 0xd17   :  { %v2876_v25 = vmul.f32 %v3832_v26, %v2784_v4 }
 0xd18   :  { %3833 = vrcp.f32 %v2860_v60 }
 0xd19   :  { %3502 = vmatmul.msk.f32.vlgmr.msrb.gmra.mxu3 %vm2796_vm9, %v2876_v25 }
 0xd1e   :  { %v3834_v36 = vpop.eup %3833 }
 0xd1f   :  { %v2877_v50 = vmul.f32 %v3834_v36, %v2786_v7 }
 0xd21   :  { %3503 = vmatmul.msk.f32.gmra.mxu3 %vm2796_vm9, %v2877_v50 }
 0xd9c   :  { %v2986_v14 = vpop.f32.mrf.mxu3 }
 0xd9d   :  { %v2987_v56 = vadd.f32 %v2986_v14, %v2921_v48 }
 0xd9f   :  { %2998 = vst [vmem:[%s5068_s13 + $0x30] sm:$0xff] %v2987_v56 }
 0xda4   :  { %v2989_v49 = vpop.f32.mrf.mxu3 }
 0xda5   :  { %v2990_v18 = vadd.f32 %v2989_v49, %v2924_v52 }
 0xda7   :  { %2999 = vst [vmem:[%s5068_s13 + $0x38] sm:$0xff] %v2990_v18 }
 0xda8   :  { %3004 = vsyncpa [#allocation5], 1 }
 0xda9   :  { %3005 = vsyncpa [#allocation7], 1 }

</bundles_post_ra>
